<compile_context>
chip_gen: v7x
topology: tpu7x:2x2x1
jax: 0.10.0
libtpu: 0.0.40
codegen_flags: <defaults>
</compile_context>

<pallas_src>
import functools
import math

import jax
import jax.numpy as jnp
from jax import lax
from jax.experimental import pallas as pl
from jax.experimental.pallas import tpu as pltpu


# ----------------------------------------------------------------------------
# Fused Pallas kernel: one grid step == one batch element, full forward pass.
# ----------------------------------------------------------------------------
def _critic_kernel(x_ref, ta_ref,
                   w1_ref, s1_ref, b1_ref,
                   w2_ref, s2_ref, b2_ref,
                   wfc0_ref, bfc0_ref,
                   wfc1x_ref, wfc1y_ref, bfc1_ref,
                   wfc2_ref, bfc2_ref,
                   o_ref,
                   xpad_ref, ppad_ref,
                   *, H0, C1, C2):
    f32 = jnp.float32
    H1c = H0 + 1        # conv1 output spatial size (k=2, s=1, p=1)
    H1 = H1c // 2       # after 2x2 max-pool (floor)
    H2c = H1 + 1        # conv2 output spatial size
    H2 = H2c // 2       # after 2x2 max-pool (floor)

    # ---- stage 0: zero-padded input image / pooled-feature buffers (VMEM) --
    xpad_ref[...] = jnp.zeros((H0 + 2, H0 + 2, 1), f32)
    xpad_ref[1:H0 + 1, 1:H0 + 1, :] = x_ref[0]          # (H0, H0, 1)
    ppad_ref[...] = jnp.zeros((H1 + 2, H1 + 2, C1), f32)

    w1 = w1_ref[...]        # (4, C1)   taps ordered di*2 + dj
    s1 = s1_ref[...]        # (1, C1)
    b1 = b1_ref[...]        # (1, C1)
    s2 = s2_ref[...]        # (1, C2)
    b2 = b2_ref[...]        # (1, C2)

    # Even-column selection matrices (W-direction pooling stride-2), built
    # in-kernel with 2D iota so the max-pool downsample is a tiny MXU matmul
    # instead of a strided HBM gather.
    def even_sel(rows, cols):
        r = lax.broadcasted_iota(jnp.int32, (rows, cols), 0)
        c = lax.broadcasted_iota(jnp.int32, (rows, cols), 1)
        return (c == 2 * r).astype(f32)

    sel1 = even_sel(H1, 2 * H1)       # (H1, 2*H1)
    sel2 = even_sel(H2, 2 * H2)       # (H2, 2*H2)

    # ---- fc0 branch: yout = relu(cat(target, action) @ Wfc0 + b0) ----------
    ta = ta_ref[0]                                                   # (1, 2+A)
    yout = jnp.maximum(
        jnp.dot(ta, wfc0_ref[...], preferred_element_type=f32) + bfc0_ref[...],
        0.0)                                                         # (1, 128)
    # fc1 pre-activation accumulator, seeded with the yout partial matmul.
    fc1_acc = jnp.dot(yout, wfc1y_ref[...], preferred_element_type=f32)

    # ---- layer 1: conv(1->C1) + BN + ReLU, fused pool -----------------------
    def conv1_row(h):                     # conv1 output row h -> (H1c, C1)
        acc = jnp.zeros((H1c, C1), f32)
        for di in (0, 1):
            row = xpad_ref[h + di]                       # (H0+2, 1)
            for dj in (0, 1):
                win = row[dj:dj + H1c, :]                # (H1c, 1)
                k = 2 * di + dj
                acc = acc + win * w1[k:k + 1, :]         # VPU broadcast MAC
        return jnp.maximum(acc * s1 + b1, 0.0)

    for hp in range(H1):
        r0 = conv1_row(2 * hp)
        r1 = conv1_row(2 * hp + 1)
        m = jnp.maximum(r0, r1)                                   # (H1c, C1)
        mw = jnp.maximum(m[0:2 * H1, :], m[1:2 * H1 + 1, :])      # (2H1, C1)
        prow = jnp.dot(sel1, mw, preferred_element_type=f32)      # (H1, C1)
        ppad_ref[1 + hp, 1:1 + H1, :] = prow                      # into pad buf

    # ---- layer 2: conv(C1->C2) + BN + ReLU, fused pool + fc1 partials ------
    def conv2_row(h):                     # conv2 output row h -> (H2c, C2)
        acc = jnp.zeros((H2c, C2), f32)
        for di in (0, 1):
            row = ppad_ref[h + di]                       # (H1+2, C1)
            for dj in (0, 1):
                win = row[dj:dj + H2c, :]                # (H2c, C1)
                acc = acc + jnp.dot(win, w2_ref[2 * di + dj],
                                    preferred_element_type=f32)
        return jnp.maximum(acc * s2 + b2, 0.0)

    for hp in range(H2):
        r0 = conv2_row(2 * hp)
        r1 = conv2_row(2 * hp + 1)
        m = jnp.maximum(r0, r1)                                   # (H2c, C2)
        mw = jnp.maximum(m[0:2 * H2, :], m[1:2 * H2 + 1, :])      # (2H2, C2)
        prow = jnp.dot(sel2, mw, preferred_element_type=f32)      # (H2, C2)
        # xout contribution of this pooled row (NCHW flatten order is folded
        # into the wfc1x weight layout at init): no flatten / concat needed.
        for wp in range(H2):
            fc1_acc = fc1_acc + jnp.dot(prow[wp:wp + 1, :],
                                        wfc1x_ref[hp, wp],
                                        preferred_element_type=f32)

    # ---- fc tail ------------------------------------------------------------
    h_fc1 = jnp.maximum(fc1_acc + bfc1_ref[...], 0.0)             # (1, NH)
    out = jnp.dot(h_fc1, wfc2_ref[...], preferred_element_type=f32) + bfc2_ref[...]
    o_ref[0] = out                                                 # (1, 1)


# ----------------------------------------------------------------------------
# Wrapper: one pallas_call for the entire forward pass.
# ----------------------------------------------------------------------------
def make_forward(input_width, num_hidden, num_action):
    H0 = input_width
    H1 = (H0 + 1) // 2
    H2 = (H1 + 1) // 2
    C1, C2 = 32, 64

    kernel = functools.partial(_critic_kernel, H0=H0, C1=C1, C2=C2)

    def fullmap(nd):
        return lambda b: (0,) * nd

    def forward(params, sensor_nchw, target, action):
        B = sensor_nchw.shape[0]
        # C == 1, so NCHW -> (B, H, W, 1) is a pure (free) reshape.
        x = sensor_nchw.astype(jnp.float32).reshape(B, H0, H0, 1)
        ta = jnp.concatenate([target, action], axis=1).astype(jnp.float32)
        ta = ta.reshape(B, 1, 2 + num_action)

        out = pl.pallas_call(
            kernel,
            out_shape=jax.ShapeDtypeStruct((B, 1, 1), jnp.float32),
            grid=(B,),
            in_specs=[
                pl.BlockSpec((1, H0, H0, 1), lambda b: (b, 0, 0, 0)),
                pl.BlockSpec((1, 1, 2 + num_action), lambda b: (b, 0, 0)),
                pl.BlockSpec((4, C1), fullmap(2)),
                pl.BlockSpec((1, C1), fullmap(2)),
                pl.BlockSpec((1, C1), fullmap(2)),
                pl.BlockSpec((4, C1, C2), fullmap(3)),
                pl.BlockSpec((1, C2), fullmap(2)),
                pl.BlockSpec((1, C2), fullmap(2)),
                pl.BlockSpec((2 + num_action, 128), fullmap(2)),
                pl.BlockSpec((1, 128), fullmap(2)),
                pl.BlockSpec((H2, H2, C2, num_hidden), fullmap(4)),
                pl.BlockSpec((128, num_hidden), fullmap(2)),
                pl.BlockSpec((1, num_hidden), fullmap(2)),
                pl.BlockSpec((num_hidden, 1), fullmap(2)),
                pl.BlockSpec((1, 1), fullmap(2)),
            ],
            out_specs=pl.BlockSpec((1, 1, 1), lambda b: (b, 0, 0)),
            scratch_shapes=[
                pltpu.VMEM((H0 + 2, H0 + 2, 1), jnp.float32),   # padded input
                pltpu.VMEM((H1 + 2, H1 + 2, C1), jnp.float32),  # padded pooled1
            ],
            compiler_params=pltpu.CompilerParams(
                dimension_semantics=("parallel",),
                vmem_limit_bytes=32 * 1024 * 1024,
            ),
        )(x, ta,
          params["w1"], params["s1"], params["b1"],
          params["w2"], params["s2"], params["b2"],
          params["w_fc0"], params["b_fc0"],
          params["w_fc1x"], params["w_fc1y"], params["b_fc1"],
          params["w_fc2"], params["b_fc2"])
        return out.reshape(B, 1)

    return forward


# ----------------------------------------------------------------------------
# Deterministic parameter init (Xavier uniform weights, zero biases),
# pre-arranged in the layouts the fused kernel consumes.
# ----------------------------------------------------------------------------
def init_params(key, input_width, num_hidden, num_action):
    def xavier(k, shape, fan_in, fan_out):
        bound = math.sqrt(6.0 / (fan_in + fan_out))
        return jax.random.uniform(k, shape, jnp.float32, -bound, bound)

    H1 = (input_width + 1) // 2
    H2 = (H1 + 1) // 2
    C1, C2 = 32, 64
    feature_size = C2 * H2 * H2          # == CriticConvNet.featureSize()
    eps = 1e-5
    ks = jax.random.split(key, 5)

    # Conv weights: torch (Cout, Cin, kh, kw) -> per-tap layout.
    w1_t = xavier(ks[0], (C1, 1, 2, 2), fan_in=1 * 4, fan_out=C1 * 4)
    w1 = jnp.transpose(w1_t, (2, 3, 1, 0)).reshape(4, C1)            # (tap, Cout)
    w2_t = xavier(ks[1], (C2, C1, 2, 2), fan_in=C1 * 4, fan_out=C2 * 4)
    w2 = jnp.transpose(w2_t, (2, 3, 1, 0)).reshape(4, C1, C2)        # (tap, Cin, Cout)

    # General inference-mode BatchNorm (+ conv bias) fold:
    #   y = scale * conv_nobias(x) + bias
    #   scale = gamma / sqrt(var + eps); bias = beta + scale * (conv_bias - mean)
    def fold_bn(c, conv_bias):
        gamma = jnp.ones((c,), jnp.float32)
        beta = jnp.zeros((c,), jnp.float32)
        mean = jnp.zeros((c,), jnp.float32)
        var = jnp.ones((c,), jnp.float32)
        scale = gamma / jnp.sqrt(var + eps)
        bias = beta + scale * (conv_bias - mean)
        return scale.reshape(1, c), bias.reshape(1, c)

    s1, b1 = fold_bn(C1, jnp.zeros((C1,), jnp.float32))
    s2, b2 = fold_bn(C2, jnp.zeros((C2,), jnp.float32))

    w_fc0 = xavier(ks[2], (2 + num_action, 128), 2 + num_action, 128)
    b_fc0 = jnp.zeros((1, 128), jnp.float32)

    w_fc1 = xavier(ks[3], (feature_size + 128, num_hidden),
                   feature_size + 128, num_hidden)
    # Torch flattens NCHW: feature index = c*H2*H2 + h*H2 + w.  Permute the
    # conv part of fc1 ONCE here so the kernel consumes features in (h, w, c)
    # order with zero runtime transposes.
    w_fc1x = w_fc1[:feature_size].reshape(C2, H2, H2, num_hidden)
    w_fc1x = jnp.transpose(w_fc1x, (1, 2, 0, 3))                     # (H2,H2,C2,NH)
    w_fc1y = w_fc1[feature_size:]                                    # (128, NH)
    b_fc1 = jnp.zeros((1, num_hidden), jnp.float32)

    w_fc2 = xavier(ks[4], (num_hidden, 1), num_hidden, 1)
    b_fc2 = jnp.zeros((1, 1), jnp.float32)

    return dict(w1=w1, s1=s1, b1=b1, w2=w2, s2=s2, b2=b2,
                w_fc0=w_fc0, b_fc0=b_fc0,
                w_fc1x=w_fc1x, w_fc1y=w_fc1y, b_fc1=b_fc1,
                w_fc2=w_fc2, b_fc2=b_fc2)


if __name__ == "__main__":
    input_width, num_hidden, num_action = 16, 32, 4
    batch = 2

    key = jax.random.PRNGKey(0)
    k_params, k_sensor, k_target, k_action = jax.random.split(key, 4)

    params = init_params(k_params, input_width, num_hidden, num_action)
    sensor = jax.random.normal(k_sensor, (batch, 1, input_width, input_width),
                               jnp.float32)
    target = jax.random.normal(k_target, (batch, 2), jnp.float32)
    action = jax.random.normal(k_action, (batch, num_action), jnp.float32)

    forward = make_forward(input_width, num_hidden, num_action)
    out = jax.jit(forward)(params, sensor, target, action)
    out = jax.block_until_ready(out)
    assert out.shape == (batch, 1) and out.dtype == jnp.float32
    print("KERNEL_OK")
</pallas_src>

<mosaic_0001>
module attributes {stable_mosaic.version = 11 : i64} {
  func.func @_critic_kernel(%arg0: i32, %arg1: memref<1x16x16x1xf32, #tpu.memory_space<vmem>>, %arg2: memref<1x1x6xf32, #tpu.memory_space<vmem>>, %arg3: memref<4x32xf32, #tpu.memory_space<vmem>>, %arg4: memref<1x32xf32, #tpu.memory_space<vmem>>, %arg5: memref<1x32xf32, #tpu.memory_space<vmem>>, %arg6: memref<4x32x64xf32, #tpu.memory_space<vmem>>, %arg7: memref<1x64xf32, #tpu.memory_space<vmem>>, %arg8: memref<1x64xf32, #tpu.memory_space<vmem>>, %arg9: memref<6x128xf32, #tpu.memory_space<vmem>>, %arg10: memref<1x128xf32, #tpu.memory_space<vmem>>, %arg11: memref<4x4x64x32xf32, #tpu.memory_space<vmem>>, %arg12: memref<128x32xf32, #tpu.memory_space<vmem>>, %arg13: memref<1x32xf32, #tpu.memory_space<vmem>>, %arg14: memref<32x1xf32, #tpu.memory_space<vmem>>, %arg15: memref<1x1xf32, #tpu.memory_space<vmem>>, %arg16: memref<1x1x1xf32, #tpu.memory_space<vmem>>, %arg17: memref<18x18x1xf32, #tpu.memory_space<vmem>>, %arg18: memref<10x10x32xf32, #tpu.memory_space<vmem>>) attributes {dimension_semantics = [#tpu.dimension_semantics<parallel>], iteration_bounds = array<i64: 2>, scalar_prefetch = 0 : i64, scratch_operands = 2 : i64, tpu.core_type = #tpu.core_type<tc>, window_params = [{transform_indices = @transform_0, window_bounds = array<i64: 1, 16, 16, 1>}, {transform_indices = @transform_1, window_bounds = array<i64: 1, 1, 6>}, {pipeline_mode = #tpu.pipeline_mode<synchronous>, transform_indices = @transform_2, window_bounds = array<i64: 4, 32>}, {pipeline_mode = #tpu.pipeline_mode<synchronous>, transform_indices = @transform_3, window_bounds = array<i64: 1, 32>}, {pipeline_mode = #tpu.pipeline_mode<synchronous>, transform_indices = @transform_4, window_bounds = array<i64: 1, 32>}, {pipeline_mode = #tpu.pipeline_mode<synchronous>, transform_indices = @transform_5, window_bounds = array<i64: 4, 32, 64>}, {pipeline_mode = #tpu.pipeline_mode<synchronous>, transform_indices = @transform_6, window_bounds = array<i64: 1, 64>}, {pipeline_mode = #tpu.pipeline_mode<synchronous>, transform_indices = @transform_7, window_bounds = array<i64: 1, 64>}, {pipeline_mode = #tpu.pipeline_mode<synchronous>, transform_indices = @transform_8, window_bounds = array<i64: 6, 128>}, {pipeline_mode = #tpu.pipeline_mode<synchronous>, transform_indices = @transform_9, window_bounds = array<i64: 1, 128>}, {pipeline_mode = #tpu.pipeline_mode<synchronous>, transform_indices = @transform_10, window_bounds = array<i64: 4, 4, 64, 32>}, {pipeline_mode = #tpu.pipeline_mode<synchronous>, transform_indices = @transform_11, window_bounds = array<i64: 128, 32>}, {pipeline_mode = #tpu.pipeline_mode<synchronous>, transform_indices = @transform_12, window_bounds = array<i64: 1, 32>}, {pipeline_mode = #tpu.pipeline_mode<synchronous>, transform_indices = @transform_13, window_bounds = array<i64: 32, 1>}, {pipeline_mode = #tpu.pipeline_mode<synchronous>, transform_indices = @transform_14, window_bounds = array<i64: 1, 1>}, {transform_indices = @transform_15, window_bounds = array<i64: 1, 1, 1>}]} {
    %cst = arith.constant 0.000000e+00 : f32
    %0 = vector.broadcast %cst : f32 to vector<18x18x1xf32>
    %c0 = arith.constant 0 : index
    %c0_0 = arith.constant 0 : index
    %c0_1 = arith.constant 0 : index
    %1 = vector.load %arg17[%c0, %c0_0, %c0_1] : memref<18x18x1xf32, #tpu.memory_space<vmem>>, vector<18x18x1xf32>
    tpu.vector_store %arg17[%c0, %c0_0, %c0_1], %0 {strides = array<i32>} : memref<18x18x1xf32, #tpu.memory_space<vmem>>, vector<18x18x1xf32>,
    %c0_2 = arith.constant 0 : index
    %c0_3 = arith.constant 0 : index
    %c0_4 = arith.constant 0 : index
    %c0_5 = arith.constant 0 : index
    %2 = vector.load %arg1[%c0_2, %c0_3, %c0_4, %c0_5] : memref<1x16x16x1xf32, #tpu.memory_space<vmem>>, vector<1x16x16x1xf32>
    %3 = vector.shape_cast %2 : vector<1x16x16x1xf32> to vector<16x16x1xf32>
    %c1 = arith.constant 1 : index
    %c1_6 = arith.constant 1 : index
    %c0_7 = arith.constant 0 : index
    %4 = vector.load %arg17[%c1, %c1_6, %c0_7] : memref<18x18x1xf32, #tpu.memory_space<vmem>>, vector<16x16x1xf32>
    tpu.vector_store %arg17[%c1, %c1_6, %c0_7], %3 {strides = array<i32>} : memref<18x18x1xf32, #tpu.memory_space<vmem>>, vector<16x16x1xf32>,
    %cst_8 = arith.constant 0.000000e+00 : f32
    %5 = vector.broadcast %cst_8 : f32 to vector<10x10x32xf32>
    %c0_9 = arith.constant 0 : index
    %c0_10 = arith.constant 0 : index
    %c0_11 = arith.constant 0 : index
    %6 = vector.load %arg18[%c0_9, %c0_10, %c0_11] : memref<10x10x32xf32, #tpu.memory_space<vmem>>, vector<10x10x32xf32>
    tpu.vector_store %arg18[%c0_9, %c0_10, %c0_11], %5 {strides = array<i32>} : memref<10x10x32xf32, #tpu.memory_space<vmem>>, vector<10x10x32xf32>,
    %c0_12 = arith.constant 0 : index
    %c0_13 = arith.constant 0 : index
    %7 = vector.load %arg3[%c0_12, %c0_13] : memref<4x32xf32, #tpu.memory_space<vmem>>, vector<4x32xf32>
    %c0_14 = arith.constant 0 : index
    %c0_15 = arith.constant 0 : index
    %8 = vector.load %arg4[%c0_14, %c0_15] : memref<1x32xf32, #tpu.memory_space<vmem>>, vector<1x32xf32>
    %c0_16 = arith.constant 0 : index
    %c0_17 = arith.constant 0 : index
    %9 = vector.load %arg5[%c0_16, %c0_17] : memref<1x32xf32, #tpu.memory_space<vmem>>, vector<1x32xf32>
    %c0_18 = arith.constant 0 : index
    %c0_19 = arith.constant 0 : index
    %10 = vector.load %arg7[%c0_18, %c0_19] : memref<1x64xf32, #tpu.memory_space<vmem>>, vector<1x64xf32>
    %c0_20 = arith.constant 0 : index
    %c0_21 = arith.constant 0 : index
    %11 = vector.load %arg8[%c0_20, %c0_21] : memref<1x64xf32, #tpu.memory_space<vmem>>, vector<1x64xf32>
    %12 = tpu.iota {dimensions = array<i32: 0>} : vector<8x16xi32>
    %13 = tpu.iota {dimensions = array<i32: 1>} : vector<8x16xi32>
    %c2_i32 = arith.constant 2 : i32
    %14 = vector.broadcast %c2_i32 : i32 to vector<8x16xi32>
    %15 = arith.muli %14, %12 : vector<8x16xi32>
    %16 = arith.cmpi eq, %13, %15 : vector<8x16xi32>
    %17 = arith.extui %16 : vector<8x16xi1> to vector<8x16xi32>
    %18 = arith.sitofp %17 : vector<8x16xi32> to vector<8x16xf32>
    %19 = tpu.iota {dimensions = array<i32: 0>} : vector<4x8xi32>
    %20 = tpu.iota {dimensions = array<i32: 1>} : vector<4x8xi32>
    %c2_i32_22 = arith.constant 2 : i32
    %21 = vector.broadcast %c2_i32_22 : i32 to vector<4x8xi32>
    %22 = arith.muli %21, %19 : vector<4x8xi32>
    %23 = arith.cmpi eq, %20, %22 : vector<4x8xi32>
    %24 = arith.extui %23 : vector<4x8xi1> to vector<4x8xi32>
    %25 = arith.sitofp %24 : vector<4x8xi32> to vector<4x8xf32>
    %c0_23 = arith.constant 0 : index
    %c0_24 = arith.constant 0 : index
    %c0_25 = arith.constant 0 : index
    %26 = vector.load %arg2[%c0_23, %c0_24, %c0_25] : memref<1x1x6xf32, #tpu.memory_space<vmem>>, vector<1x1x6xf32>
    %27 = vector.shape_cast %26 : vector<1x1x6xf32> to vector<1x6xf32>
    %c0_26 = arith.constant 0 : index
    %c0_27 = arith.constant 0 : index
    %28 = vector.load %arg9[%c0_26, %c0_27] : memref<6x128xf32, #tpu.memory_space<vmem>>, vector<6x128xf32>
    %cst_28 = arith.constant dense<0.000000e+00> : vector<1x128xf32>
    %29 = tpu.matmul %27, %28, %cst_28 {dimension_numbers = #tpu.dot_dimension_numbers<[1], [0], [0], [1], [0, 0, 1, 1], [], []>} : vector<1x6xf32>, vector<6x128xf32>, vector<1x128xf32> -> vector<1x128xf32>
    %c0_29 = arith.constant 0 : index
    %c0_30 = arith.constant 0 : index
    %30 = vector.load %arg10[%c0_29, %c0_30] : memref<1x128xf32, #tpu.memory_space<vmem>>, vector<1x128xf32>
    %31 = arith.addf %29, %30 : vector<1x128xf32>
    %cst_31 = arith.constant 0.000000e+00 : f32
    %32 = vector.broadcast %cst_31 : f32 to vector<1x128xf32>
    %33 = arith.maximumf %31, %32 : vector<1x128xf32>
    %c0_32 = arith.constant 0 : index
    %c0_33 = arith.constant 0 : index
    %34 = vector.load %arg12[%c0_32, %c0_33] : memref<128x32xf32, #tpu.memory_space<vmem>>, vector<128x32xf32>
    %cst_34 = arith.constant dense<0.000000e+00> : vector<1x32xf32>
    %35 = tpu.matmul %33, %34, %cst_34 {dimension_numbers = #tpu.dot_dimension_numbers<[1], [0], [0], [1], [0, 0, 1, 1], [], []>} : vector<1x128xf32>, vector<128x32xf32>, vector<1x32xf32> -> vector<1x32xf32>
    %cst_35 = arith.constant 0.000000e+00 : f32
    %36 = vector.broadcast %cst_35 : f32 to vector<17x32xf32>
    %c0_36 = arith.constant 0 : index
    %c0_37 = arith.constant 0 : index
    %c0_38 = arith.constant 0 : index
    %37 = vector.load %arg17[%c0_36, %c0_37, %c0_38] : memref<18x18x1xf32, #tpu.memory_space<vmem>>, vector<1x18x1xf32>
    %38 = vector.shape_cast %37 : vector<1x18x1xf32> to vector<18x1xf32>
    %39 = vector.extract_strided_slice %38 {offsets = [0, 0], sizes = [17, 1], strides = [1, 1]} : vector<18x1xf32> to vector<17x1xf32>
    %40 = vector.extract_strided_slice %7 {offsets = [0, 0], sizes = [1, 32], strides = [1, 1]} : vector<4x32xf32> to vector<1x32xf32>
    %41 = vector.broadcast %39 : vector<17x1xf32> to vector<17x32xf32>
    %42 = vector.broadcast %40 : vector<1x32xf32> to vector<17x32xf32>
    %43 = arith.mulf %41, %42 : vector<17x32xf32>
    %44 = arith.addf %36, %43 : vector<17x32xf32>
    %45 = vector.extract_strided_slice %38 {offsets = [1, 0], sizes = [17, 1], strides = [1, 1]} : vector<18x1xf32> to vector<17x1xf32>
    %46 = vector.extract_strided_slice %7 {offsets = [1, 0], sizes = [1, 32], strides = [1, 1]} : vector<4x32xf32> to vector<1x32xf32>
    %47 = vector.broadcast %45 : vector<17x1xf32> to vector<17x32xf32>
    %48 = vector.broadcast %46 : vector<1x32xf32> to vector<17x32xf32>
    %49 = arith.mulf %47, %48 : vector<17x32xf32>
    %50 = arith.addf %44, %49 : vector<17x32xf32>
    %c1_39 = arith.constant 1 : index
    %c0_40 = arith.constant 0 : index
    %c0_41 = arith.constant 0 : index
    %51 = vector.load %arg17[%c1_39, %c0_40, %c0_41] : memref<18x18x1xf32, #tpu.memory_space<vmem>>, vector<1x18x1xf32>
    %52 = vector.shape_cast %51 : vector<1x18x1xf32> to vector<18x1xf32>
    %53 = vector.extract_strided_slice %52 {offsets = [0, 0], sizes = [17, 1], strides = [1, 1]} : vector<18x1xf32> to vector<17x1xf32>
    %54 = vector.extract_strided_slice %7 {offsets = [2, 0], sizes = [1, 32], strides = [1, 1]} : vector<4x32xf32> to vector<1x32xf32>
    %55 = vector.broadcast %53 : vector<17x1xf32> to vector<17x32xf32>
    %56 = vector.broadcast %54 : vector<1x32xf32> to vector<17x32xf32>
    %57 = arith.mulf %55, %56 : vector<17x32xf32>
    %58 = arith.addf %50, %57 : vector<17x32xf32>
    %59 = vector.extract_strided_slice %52 {offsets = [1, 0], sizes = [17, 1], strides = [1, 1]} : vector<18x1xf32> to vector<17x1xf32>
    %60 = vector.extract_strided_slice %7 {offsets = [3, 0], sizes = [1, 32], strides = [1, 1]} : vector<4x32xf32> to vector<1x32xf32>
    %61 = vector.broadcast %59 : vector<17x1xf32> to vector<17x32xf32>
    %62 = vector.broadcast %60 : vector<1x32xf32> to vector<17x32xf32>
    %63 = arith.mulf %61, %62 : vector<17x32xf32>
    %64 = arith.addf %58, %63 : vector<17x32xf32>
    %65 = vector.broadcast %8 : vector<1x32xf32> to vector<17x32xf32>
    %66 = arith.mulf %64, %65 : vector<17x32xf32>
    %67 = vector.broadcast %9 : vector<1x32xf32> to vector<17x32xf32>
    %68 = arith.addf %66, %67 : vector<17x32xf32>
    %cst_42 = arith.constant 0.000000e+00 : f32
    %69 = vector.broadcast %cst_42 : f32 to vector<17x32xf32>
    %70 = arith.maximumf %68, %69 : vector<17x32xf32>
    %cst_43 = arith.constant 0.000000e+00 : f32
    %71 = vector.broadcast %cst_43 : f32 to vector<17x32xf32>
    %c1_44 = arith.constant 1 : index
    %c0_45 = arith.constant 0 : index
    %c0_46 = arith.constant 0 : index
    %72 = vector.load %arg17[%c1_44, %c0_45, %c0_46] : memref<18x18x1xf32, #tpu.memory_space<vmem>>, vector<1x18x1xf32>
    %73 = vector.shape_cast %72 : vector<1x18x1xf32> to vector<18x1xf32>
    %74 = vector.extract_strided_slice %73 {offsets = [0, 0], sizes = [17, 1], strides = [1, 1]} : vector<18x1xf32> to vector<17x1xf32>
    %75 = vector.extract_strided_slice %7 {offsets = [0, 0], sizes = [1, 32], strides = [1, 1]} : vector<4x32xf32> to vector<1x32xf32>
    %76 = vector.broadcast %74 : vector<17x1xf32> to vector<17x32xf32>
    %77 = vector.broadcast %75 : vector<1x32xf32> to vector<17x32xf32>
    %78 = arith.mulf %76, %77 : vector<17x32xf32>
    %79 = arith.addf %71, %78 : vector<17x32xf32>
    %80 = vector.extract_strided_slice %73 {offsets = [1, 0], sizes = [17, 1], strides = [1, 1]} : vector<18x1xf32> to vector<17x1xf32>
    %81 = vector.extract_strided_slice %7 {offsets = [1, 0], sizes = [1, 32], strides = [1, 1]} : vector<4x32xf32> to vector<1x32xf32>
    %82 = vector.broadcast %80 : vector<17x1xf32> to vector<17x32xf32>
    %83 = vector.broadcast %81 : vector<1x32xf32> to vector<17x32xf32>
    %84 = arith.mulf %82, %83 : vector<17x32xf32>
    %85 = arith.addf %79, %84 : vector<17x32xf32>
    %c2 = arith.constant 2 : index
    %c0_47 = arith.constant 0 : index
    %c0_48 = arith.constant 0 : index
    %86 = vector.load %arg17[%c2, %c0_47, %c0_48] : memref<18x18x1xf32, #tpu.memory_space<vmem>>, vector<1x18x1xf32>
    %87 = vector.shape_cast %86 : vector<1x18x1xf32> to vector<18x1xf32>
    %88 = vector.extract_strided_slice %87 {offsets = [0, 0], sizes = [17, 1], strides = [1, 1]} : vector<18x1xf32> to vector<17x1xf32>
    %89 = vector.extract_strided_slice %7 {offsets = [2, 0], sizes = [1, 32], strides = [1, 1]} : vector<4x32xf32> to vector<1x32xf32>
    %90 = vector.broadcast %88 : vector<17x1xf32> to vector<17x32xf32>
    %91 = vector.broadcast %89 : vector<1x32xf32> to vector<17x32xf32>
    %92 = arith.mulf %90, %91 : vector<17x32xf32>
    %93 = arith.addf %85, %92 : vector<17x32xf32>
    %94 = vector.extract_strided_slice %87 {offsets = [1, 0], sizes = [17, 1], strides = [1, 1]} : vector<18x1xf32> to vector<17x1xf32>
    %95 = vector.extract_strided_slice %7 {offsets = [3, 0], sizes = [1, 32], strides = [1, 1]} : vector<4x32xf32> to vector<1x32xf32>
    %96 = vector.broadcast %94 : vector<17x1xf32> to vector<17x32xf32>
    %97 = vector.broadcast %95 : vector<1x32xf32> to vector<17x32xf32>
    %98 = arith.mulf %96, %97 : vector<17x32xf32>
    %99 = arith.addf %93, %98 : vector<17x32xf32>
    %100 = vector.broadcast %8 : vector<1x32xf32> to vector<17x32xf32>
    %101 = arith.mulf %99, %100 : vector<17x32xf32>
    %102 = vector.broadcast %9 : vector<1x32xf32> to vector<17x32xf32>
    %103 = arith.addf %101, %102 : vector<17x32xf32>
    %cst_49 = arith.constant 0.000000e+00 : f32
    %104 = vector.broadcast %cst_49 : f32 to vector<17x32xf32>
    %105 = arith.maximumf %103, %104 : vector<17x32xf32>
    %106 = arith.maximumf %70, %105 : vector<17x32xf32>
    %107 = vector.extract_strided_slice %106 {offsets = [0, 0], sizes = [16, 32], strides = [1, 1]} : vector<17x32xf32> to vector<16x32xf32>
    %108 = vector.extract_strided_slice %106 {offsets = [1, 0], sizes = [16, 32], strides = [1, 1]} : vector<17x32xf32> to vector<16x32xf32>
    %109 = arith.maximumf %107, %108 : vector<16x32xf32>
    %cst_50 = arith.constant dense<0.000000e+00> : vector<8x32xf32>
    %110 = tpu.matmul %18, %109, %cst_50 {dimension_numbers = #tpu.dot_dimension_numbers<[1], [0], [0], [1], [0, 0, 1, 1], [], []>} : vector<8x16xf32>, vector<16x32xf32>, vector<8x32xf32> -> vector<8x32xf32>
    %c1_51 = arith.constant 1 : index
    %c1_52 = arith.constant 1 : index
    %c0_53 = arith.constant 0 : index
    %111 = vector.load %arg18[%c1_51, %c1_52, %c0_53] : memref<10x10x32xf32, #tpu.memory_space<vmem>>, vector<1x8x32xf32>
    %112 = vector.shape_cast %111 : vector<1x8x32xf32> to vector<8x32xf32>
    %113 = vector.shape_cast %110 : vector<8x32xf32> to vector<1x8x32xf32>
    tpu.vector_store %arg18[%c1_51, %c1_52, %c0_53], %113 {strides = array<i32>} : memref<10x10x32xf32, #tpu.memory_space<vmem>>, vector<1x8x32xf32>,
    %cst_54 = arith.constant 0.000000e+00 : f32
    %114 = vector.broadcast %cst_54 : f32 to vector<17x32xf32>
    %c2_55 = arith.constant 2 : index
    %c0_56 = arith.constant 0 : index
    %c0_57 = arith.constant 0 : index
    %115 = vector.load %arg17[%c2_55, %c0_56, %c0_57] : memref<18x18x1xf32, #tpu.memory_space<vmem>>, vector<1x18x1xf32>
    %116 = vector.shape_cast %115 : vector<1x18x1xf32> to vector<18x1xf32>
    %117 = vector.extract_strided_slice %116 {offsets = [0, 0], sizes = [17, 1], strides = [1, 1]} : vector<18x1xf32> to vector<17x1xf32>
    %118 = vector.extract_strided_slice %7 {offsets = [0, 0], sizes = [1, 32], strides = [1, 1]} : vector<4x32xf32> to vector<1x32xf32>
    %119 = vector.broadcast %117 : vector<17x1xf32> to vector<17x32xf32>
    %120 = vector.broadcast %118 : vector<1x32xf32> to vector<17x32xf32>
    %121 = arith.mulf %119, %120 : vector<17x32xf32>
    %122 = arith.addf %114, %121 : vector<17x32xf32>
    %123 = vector.extract_strided_slice %116 {offsets = [1, 0], sizes = [17, 1], strides = [1, 1]} : vector<18x1xf32> to vector<17x1xf32>
    %124 = vector.extract_strided_slice %7 {offsets = [1, 0], sizes = [1, 32], strides = [1, 1]} : vector<4x32xf32> to vector<1x32xf32>
    %125 = vector.broadcast %123 : vector<17x1xf32> to vector<17x32xf32>
    %126 = vector.broadcast %124 : vector<1x32xf32> to vector<17x32xf32>
    %127 = arith.mulf %125, %126 : vector<17x32xf32>
    %128 = arith.addf %122, %127 : vector<17x32xf32>
    %c3 = arith.constant 3 : index
    %c0_58 = arith.constant 0 : index
    %c0_59 = arith.constant 0 : index
    %129 = vector.load %arg17[%c3, %c0_58, %c0_59] : memref<18x18x1xf32, #tpu.memory_space<vmem>>, vector<1x18x1xf32>
    %130 = vector.shape_cast %129 : vector<1x18x1xf32> to vector<18x1xf32>
    %131 = vector.extract_strided_slice %130 {offsets = [0, 0], sizes = [17, 1], strides = [1, 1]} : vector<18x1xf32> to vector<17x1xf32>
    %132 = vector.extract_strided_slice %7 {offsets = [2, 0], sizes = [1, 32], strides = [1, 1]} : vector<4x32xf32> to vector<1x32xf32>
    %133 = vector.broadcast %131 : vector<17x1xf32> to vector<17x32xf32>
    %134 = vector.broadcast %132 : vector<1x32xf32> to vector<17x32xf32>
    %135 = arith.mulf %133, %134 : vector<17x32xf32>
    %136 = arith.addf %128, %135 : vector<17x32xf32>
    %137 = vector.extract_strided_slice %130 {offsets = [1, 0], sizes = [17, 1], strides = [1, 1]} : vector<18x1xf32> to vector<17x1xf32>
    %138 = vector.extract_strided_slice %7 {offsets = [3, 0], sizes = [1, 32], strides = [1, 1]} : vector<4x32xf32> to vector<1x32xf32>
    %139 = vector.broadcast %137 : vector<17x1xf32> to vector<17x32xf32>
    %140 = vector.broadcast %138 : vector<1x32xf32> to vector<17x32xf32>
    %141 = arith.mulf %139, %140 : vector<17x32xf32>
    %142 = arith.addf %136, %141 : vector<17x32xf32>
    %143 = vector.broadcast %8 : vector<1x32xf32> to vector<17x32xf32>
    %144 = arith.mulf %142, %143 : vector<17x32xf32>
    %145 = vector.broadcast %9 : vector<1x32xf32> to vector<17x32xf32>
    %146 = arith.addf %144, %145 : vector<17x32xf32>
    %cst_60 = arith.constant 0.000000e+00 : f32
    %147 = vector.broadcast %cst_60 : f32 to vector<17x32xf32>
    %148 = arith.maximumf %146, %147 : vector<17x32xf32>
    %cst_61 = arith.constant 0.000000e+00 : f32
    %149 = vector.broadcast %cst_61 : f32 to vector<17x32xf32>
    %c3_62 = arith.constant 3 : index
    %c0_63 = arith.constant 0 : index
    %c0_64 = arith.constant 0 : index
    %150 = vector.load %arg17[%c3_62, %c0_63, %c0_64] : memref<18x18x1xf32, #tpu.memory_space<vmem>>, vector<1x18x1xf32>
    %151 = vector.shape_cast %150 : vector<1x18x1xf32> to vector<18x1xf32>
    %152 = vector.extract_strided_slice %151 {offsets = [0, 0], sizes = [17, 1], strides = [1, 1]} : vector<18x1xf32> to vector<17x1xf32>
    %153 = vector.extract_strided_slice %7 {offsets = [0, 0], sizes = [1, 32], strides = [1, 1]} : vector<4x32xf32> to vector<1x32xf32>
    %154 = vector.broadcast %152 : vector<17x1xf32> to vector<17x32xf32>
    %155 = vector.broadcast %153 : vector<1x32xf32> to vector<17x32xf32>
    %156 = arith.mulf %154, %155 : vector<17x32xf32>
    %157 = arith.addf %149, %156 : vector<17x32xf32>
    %158 = vector.extract_strided_slice %151 {offsets = [1, 0], sizes = [17, 1], strides = [1, 1]} : vector<18x1xf32> to vector<17x1xf32>
    %159 = vector.extract_strided_slice %7 {offsets = [1, 0], sizes = [1, 32], strides = [1, 1]} : vector<4x32xf32> to vector<1x32xf32>
    %160 = vector.broadcast %158 : vector<17x1xf32> to vector<17x32xf32>
    %161 = vector.broadcast %159 : vector<1x32xf32> to vector<17x32xf32>
    %162 = arith.mulf %160, %161 : vector<17x32xf32>
    %163 = arith.addf %157, %162 : vector<17x32xf32>
    %c4 = arith.constant 4 : index
    %c0_65 = arith.constant 0 : index
    %c0_66 = arith.constant 0 : index
    %164 = vector.load %arg17[%c4, %c0_65, %c0_66] : memref<18x18x1xf32, #tpu.memory_space<vmem>>, vector<1x18x1xf32>
    %165 = vector.shape_cast %164 : vector<1x18x1xf32> to vector<18x1xf32>
    %166 = vector.extract_strided_slice %165 {offsets = [0, 0], sizes = [17, 1], strides = [1, 1]} : vector<18x1xf32> to vector<17x1xf32>
    %167 = vector.extract_strided_slice %7 {offsets = [2, 0], sizes = [1, 32], strides = [1, 1]} : vector<4x32xf32> to vector<1x32xf32>
    %168 = vector.broadcast %166 : vector<17x1xf32> to vector<17x32xf32>
    %169 = vector.broadcast %167 : vector<1x32xf32> to vector<17x32xf32>
    %170 = arith.mulf %168, %169 : vector<17x32xf32>
    %171 = arith.addf %163, %170 : vector<17x32xf32>
    %172 = vector.extract_strided_slice %165 {offsets = [1, 0], sizes = [17, 1], strides = [1, 1]} : vector<18x1xf32> to vector<17x1xf32>
    %173 = vector.extract_strided_slice %7 {offsets = [3, 0], sizes = [1, 32], strides = [1, 1]} : vector<4x32xf32> to vector<1x32xf32>
    %174 = vector.broadcast %172 : vector<17x1xf32> to vector<17x32xf32>
    %175 = vector.broadcast %173 : vector<1x32xf32> to vector<17x32xf32>
    %176 = arith.mulf %174, %175 : vector<17x32xf32>
    %177 = arith.addf %171, %176 : vector<17x32xf32>
    %178 = vector.broadcast %8 : vector<1x32xf32> to vector<17x32xf32>
    %179 = arith.mulf %177, %178 : vector<17x32xf32>
    %180 = vector.broadcast %9 : vector<1x32xf32> to vector<17x32xf32>
    %181 = arith.addf %179, %180 : vector<17x32xf32>
    %cst_67 = arith.constant 0.000000e+00 : f32
    %182 = vector.broadcast %cst_67 : f32 to vector<17x32xf32>
    %183 = arith.maximumf %181, %182 : vector<17x32xf32>
    %184 = arith.maximumf %148, %183 : vector<17x32xf32>
    %185 = vector.extract_strided_slice %184 {offsets = [0, 0], sizes = [16, 32], strides = [1, 1]} : vector<17x32xf32> to vector<16x32xf32>
    %186 = vector.extract_strided_slice %184 {offsets = [1, 0], sizes = [16, 32], strides = [1, 1]} : vector<17x32xf32> to vector<16x32xf32>
    %187 = arith.maximumf %185, %186 : vector<16x32xf32>
    %cst_68 = arith.constant dense<0.000000e+00> : vector<8x32xf32>
    %188 = tpu.matmul %18, %187, %cst_68 {dimension_numbers = #tpu.dot_dimension_numbers<[1], [0], [0], [1], [0, 0, 1, 1], [], []>} : vector<8x16xf32>, vector<16x32xf32>, vector<8x32xf32> -> vector<8x32xf32>
    %c2_69 = arith.constant 2 : index
    %c1_70 = arith.constant 1 : index
    %c0_71 = arith.constant 0 : index
    %189 = vector.load %arg18[%c2_69, %c1_70, %c0_71] : memref<10x10x32xf32, #tpu.memory_space<vmem>>, vector<1x8x32xf32>
    %190 = vector.shape_cast %189 : vector<1x8x32xf32> to vector<8x32xf32>
    %191 = vector.shape_cast %188 : vector<8x32xf32> to vector<1x8x32xf32>
    tpu.vector_store %arg18[%c2_69, %c1_70, %c0_71], %191 {strides = array<i32>} : memref<10x10x32xf32, #tpu.memory_space<vmem>>, vector<1x8x32xf32>,
    %cst_72 = arith.constant 0.000000e+00 : f32
    %192 = vector.broadcast %cst_72 : f32 to vector<17x32xf32>
    %c4_73 = arith.constant 4 : index
    %c0_74 = arith.constant 0 : index
    %c0_75 = arith.constant 0 : index
    %193 = vector.load %arg17[%c4_73, %c0_74, %c0_75] : memref<18x18x1xf32, #tpu.memory_space<vmem>>, vector<1x18x1xf32>
    %194 = vector.shape_cast %193 : vector<1x18x1xf32> to vector<18x1xf32>
    %195 = vector.extract_strided_slice %194 {offsets = [0, 0], sizes = [17, 1], strides = [1, 1]} : vector<18x1xf32> to vector<17x1xf32>
    %196 = vector.extract_strided_slice %7 {offsets = [0, 0], sizes = [1, 32], strides = [1, 1]} : vector<4x32xf32> to vector<1x32xf32>
    %197 = vector.broadcast %195 : vector<17x1xf32> to vector<17x32xf32>
    %198 = vector.broadcast %196 : vector<1x32xf32> to vector<17x32xf32>
    %199 = arith.mulf %197, %198 : vector<17x32xf32>
    %200 = arith.addf %192, %199 : vector<17x32xf32>
    %201 = vector.extract_strided_slice %194 {offsets = [1, 0], sizes = [17, 1], strides = [1, 1]} : vector<18x1xf32> to vector<17x1xf32>
    %202 = vector.extract_strided_slice %7 {offsets = [1, 0], sizes = [1, 32], strides = [1, 1]} : vector<4x32xf32> to vector<1x32xf32>
    %203 = vector.broadcast %201 : vector<17x1xf32> to vector<17x32xf32>
    %204 = vector.broadcast %202 : vector<1x32xf32> to vector<17x32xf32>
    %205 = arith.mulf %203, %204 : vector<17x32xf32>
    %206 = arith.addf %200, %205 : vector<17x32xf32>
    %c5 = arith.constant 5 : index
    %c0_76 = arith.constant 0 : index
    %c0_77 = arith.constant 0 : index
    %207 = vector.load %arg17[%c5, %c0_76, %c0_77] : memref<18x18x1xf32, #tpu.memory_space<vmem>>, vector<1x18x1xf32>
    %208 = vector.shape_cast %207 : vector<1x18x1xf32> to vector<18x1xf32>
    %209 = vector.extract_strided_slice %208 {offsets = [0, 0], sizes = [17, 1], strides = [1, 1]} : vector<18x1xf32> to vector<17x1xf32>
    %210 = vector.extract_strided_slice %7 {offsets = [2, 0], sizes = [1, 32], strides = [1, 1]} : vector<4x32xf32> to vector<1x32xf32>
    %211 = vector.broadcast %209 : vector<17x1xf32> to vector<17x32xf32>
    %212 = vector.broadcast %210 : vector<1x32xf32> to vector<17x32xf32>
    %213 = arith.mulf %211, %212 : vector<17x32xf32>
    %214 = arith.addf %206, %213 : vector<17x32xf32>
    %215 = vector.extract_strided_slice %208 {offsets = [1, 0], sizes = [17, 1], strides = [1, 1]} : vector<18x1xf32> to vector<17x1xf32>
    %216 = vector.extract_strided_slice %7 {offsets = [3, 0], sizes = [1, 32], strides = [1, 1]} : vector<4x32xf32> to vector<1x32xf32>
    %217 = vector.broadcast %215 : vector<17x1xf32> to vector<17x32xf32>
    %218 = vector.broadcast %216 : vector<1x32xf32> to vector<17x32xf32>
    %219 = arith.mulf %217, %218 : vector<17x32xf32>
    %220 = arith.addf %214, %219 : vector<17x32xf32>
    %221 = vector.broadcast %8 : vector<1x32xf32> to vector<17x32xf32>
    %222 = arith.mulf %220, %221 : vector<17x32xf32>
    %223 = vector.broadcast %9 : vector<1x32xf32> to vector<17x32xf32>
    %224 = arith.addf %222, %223 : vector<17x32xf32>
    %cst_78 = arith.constant 0.000000e+00 : f32
    %225 = vector.broadcast %cst_78 : f32 to vector<17x32xf32>
    %226 = arith.maximumf %224, %225 : vector<17x32xf32>
    %cst_79 = arith.constant 0.000000e+00 : f32
    %227 = vector.broadcast %cst_79 : f32 to vector<17x32xf32>
    %c5_80 = arith.constant 5 : index
    %c0_81 = arith.constant 0 : index
    %c0_82 = arith.constant 0 : index
    %228 = vector.load %arg17[%c5_80, %c0_81, %c0_82] : memref<18x18x1xf32, #tpu.memory_space<vmem>>, vector<1x18x1xf32>
    %229 = vector.shape_cast %228 : vector<1x18x1xf32> to vector<18x1xf32>
    %230 = vector.extract_strided_slice %229 {offsets = [0, 0], sizes = [17, 1], strides = [1, 1]} : vector<18x1xf32> to vector<17x1xf32>
    %231 = vector.extract_strided_slice %7 {offsets = [0, 0], sizes = [1, 32], strides = [1, 1]} : vector<4x32xf32> to vector<1x32xf32>
    %232 = vector.broadcast %230 : vector<17x1xf32> to vector<17x32xf32>
    %233 = vector.broadcast %231 : vector<1x32xf32> to vector<17x32xf32>
    %234 = arith.mulf %232, %233 : vector<17x32xf32>
    %235 = arith.addf %227, %234 : vector<17x32xf32>
    %236 = vector.extract_strided_slice %229 {offsets = [1, 0], sizes = [17, 1], strides = [1, 1]} : vector<18x1xf32> to vector<17x1xf32>
    %237 = vector.extract_strided_slice %7 {offsets = [1, 0], sizes = [1, 32], strides = [1, 1]} : vector<4x32xf32> to vector<1x32xf32>
    %238 = vector.broadcast %236 : vector<17x1xf32> to vector<17x32xf32>
    %239 = vector.broadcast %237 : vector<1x32xf32> to vector<17x32xf32>
    %240 = arith.mulf %238, %239 : vector<17x32xf32>
    %241 = arith.addf %235, %240 : vector<17x32xf32>
    %c6 = arith.constant 6 : index
    %c0_83 = arith.constant 0 : index
    %c0_84 = arith.constant 0 : index
    %242 = vector.load %arg17[%c6, %c0_83, %c0_84] : memref<18x18x1xf32, #tpu.memory_space<vmem>>, vector<1x18x1xf32>
    %243 = vector.shape_cast %242 : vector<1x18x1xf32> to vector<18x1xf32>
    %244 = vector.extract_strided_slice %243 {offsets = [0, 0], sizes = [17, 1], strides = [1, 1]} : vector<18x1xf32> to vector<17x1xf32>
    %245 = vector.extract_strided_slice %7 {offsets = [2, 0], sizes = [1, 32], strides = [1, 1]} : vector<4x32xf32> to vector<1x32xf32>
    %246 = vector.broadcast %244 : vector<17x1xf32> to vector<17x32xf32>
    %247 = vector.broadcast %245 : vector<1x32xf32> to vector<17x32xf32>
    %248 = arith.mulf %246, %247 : vector<17x32xf32>
    %249 = arith.addf %241, %248 : vector<17x32xf32>
    %250 = vector.extract_strided_slice %243 {offsets = [1, 0], sizes = [17, 1], strides = [1, 1]} : vector<18x1xf32> to vector<17x1xf32>
    %251 = vector.extract_strided_slice %7 {offsets = [3, 0], sizes = [1, 32], strides = [1, 1]} : vector<4x32xf32> to vector<1x32xf32>
    %252 = vector.broadcast %250 : vector<17x1xf32> to vector<17x32xf32>
    %253 = vector.broadcast %251 : vector<1x32xf32> to vector<17x32xf32>
    %254 = arith.mulf %252, %253 : vector<17x32xf32>
    %255 = arith.addf %249, %254 : vector<17x32xf32>
    %256 = vector.broadcast %8 : vector<1x32xf32> to vector<17x32xf32>
    %257 = arith.mulf %255, %256 : vector<17x32xf32>
    %258 = vector.broadcast %9 : vector<1x32xf32> to vector<17x32xf32>
    %259 = arith.addf %257, %258 : vector<17x32xf32>
    %cst_85 = arith.constant 0.000000e+00 : f32
    %260 = vector.broadcast %cst_85 : f32 to vector<17x32xf32>
    %261 = arith.maximumf %259, %260 : vector<17x32xf32>
    %262 = arith.maximumf %226, %261 : vector<17x32xf32>
    %263 = vector.extract_strided_slice %262 {offsets = [0, 0], sizes = [16, 32], strides = [1, 1]} : vector<17x32xf32> to vector<16x32xf32>
    %264 = vector.extract_strided_slice %262 {offsets = [1, 0], sizes = [16, 32], strides = [1, 1]} : vector<17x32xf32> to vector<16x32xf32>
    %265 = arith.maximumf %263, %264 : vector<16x32xf32>
    %cst_86 = arith.constant dense<0.000000e+00> : vector<8x32xf32>
    %266 = tpu.matmul %18, %265, %cst_86 {dimension_numbers = #tpu.dot_dimension_numbers<[1], [0], [0], [1], [0, 0, 1, 1], [], []>} : vector<8x16xf32>, vector<16x32xf32>, vector<8x32xf32> -> vector<8x32xf32>
    %c3_87 = arith.constant 3 : index
    %c1_88 = arith.constant 1 : index
    %c0_89 = arith.constant 0 : index
    %267 = vector.load %arg18[%c3_87, %c1_88, %c0_89] : memref<10x10x32xf32, #tpu.memory_space<vmem>>, vector<1x8x32xf32>
    %268 = vector.shape_cast %267 : vector<1x8x32xf32> to vector<8x32xf32>
    %269 = vector.shape_cast %266 : vector<8x32xf32> to vector<1x8x32xf32>
    tpu.vector_store %arg18[%c3_87, %c1_88, %c0_89], %269 {strides = array<i32>} : memref<10x10x32xf32, #tpu.memory_space<vmem>>, vector<1x8x32xf32>,
    %cst_90 = arith.constant 0.000000e+00 : f32
    %270 = vector.broadcast %cst_90 : f32 to vector<17x32xf32>
    %c6_91 = arith.constant 6 : index
    %c0_92 = arith.constant 0 : index
    %c0_93 = arith.constant 0 : index
    %271 = vector.load %arg17[%c6_91, %c0_92, %c0_93] : memref<18x18x1xf32, #tpu.memory_space<vmem>>, vector<1x18x1xf32>
    %272 = vector.shape_cast %271 : vector<1x18x1xf32> to vector<18x1xf32>
    %273 = vector.extract_strided_slice %272 {offsets = [0, 0], sizes = [17, 1], strides = [1, 1]} : vector<18x1xf32> to vector<17x1xf32>
    %274 = vector.extract_strided_slice %7 {offsets = [0, 0], sizes = [1, 32], strides = [1, 1]} : vector<4x32xf32> to vector<1x32xf32>
    %275 = vector.broadcast %273 : vector<17x1xf32> to vector<17x32xf32>
    %276 = vector.broadcast %274 : vector<1x32xf32> to vector<17x32xf32>
    %277 = arith.mulf %275, %276 : vector<17x32xf32>
    %278 = arith.addf %270, %277 : vector<17x32xf32>
    %279 = vector.extract_strided_slice %272 {offsets = [1, 0], sizes = [17, 1], strides = [1, 1]} : vector<18x1xf32> to vector<17x1xf32>
    %280 = vector.extract_strided_slice %7 {offsets = [1, 0], sizes = [1, 32], strides = [1, 1]} : vector<4x32xf32> to vector<1x32xf32>
    %281 = vector.broadcast %279 : vector<17x1xf32> to vector<17x32xf32>
    %282 = vector.broadcast %280 : vector<1x32xf32> to vector<17x32xf32>
    %283 = arith.mulf %281, %282 : vector<17x32xf32>
    %284 = arith.addf %278, %283 : vector<17x32xf32>
    %c7 = arith.constant 7 : index
    %c0_94 = arith.constant 0 : index
    %c0_95 = arith.constant 0 : index
    %285 = vector.load %arg17[%c7, %c0_94, %c0_95] : memref<18x18x1xf32, #tpu.memory_space<vmem>>, vector<1x18x1xf32>
    %286 = vector.shape_cast %285 : vector<1x18x1xf32> to vector<18x1xf32>
    %287 = vector.extract_strided_slice %286 {offsets = [0, 0], sizes = [17, 1], strides = [1, 1]} : vector<18x1xf32> to vector<17x1xf32>
    %288 = vector.extract_strided_slice %7 {offsets = [2, 0], sizes = [1, 32], strides = [1, 1]} : vector<4x32xf32> to vector<1x32xf32>
    %289 = vector.broadcast %287 : vector<17x1xf32> to vector<17x32xf32>
    %290 = vector.broadcast %288 : vector<1x32xf32> to vector<17x32xf32>
    %291 = arith.mulf %289, %290 : vector<17x32xf32>
    %292 = arith.addf %284, %291 : vector<17x32xf32>
    %293 = vector.extract_strided_slice %286 {offsets = [1, 0], sizes = [17, 1], strides = [1, 1]} : vector<18x1xf32> to vector<17x1xf32>
    %294 = vector.extract_strided_slice %7 {offsets = [3, 0], sizes = [1, 32], strides = [1, 1]} : vector<4x32xf32> to vector<1x32xf32>
    %295 = vector.broadcast %293 : vector<17x1xf32> to vector<17x32xf32>
    %296 = vector.broadcast %294 : vector<1x32xf32> to vector<17x32xf32>
    %297 = arith.mulf %295, %296 : vector<17x32xf32>
    %298 = arith.addf %292, %297 : vector<17x32xf32>
    %299 = vector.broadcast %8 : vector<1x32xf32> to vector<17x32xf32>
    %300 = arith.mulf %298, %299 : vector<17x32xf32>
    %301 = vector.broadcast %9 : vector<1x32xf32> to vector<17x32xf32>
    %302 = arith.addf %300, %301 : vector<17x32xf32>
    %cst_96 = arith.constant 0.000000e+00 : f32
    %303 = vector.broadcast %cst_96 : f32 to vector<17x32xf32>
    %304 = arith.maximumf %302, %303 : vector<17x32xf32>
    %cst_97 = arith.constant 0.000000e+00 : f32
    %305 = vector.broadcast %cst_97 : f32 to vector<17x32xf32>
    %c7_98 = arith.constant 7 : index
    %c0_99 = arith.constant 0 : index
    %c0_100 = arith.constant 0 : index
    %306 = vector.load %arg17[%c7_98, %c0_99, %c0_100] : memref<18x18x1xf32, #tpu.memory_space<vmem>>, vector<1x18x1xf32>
    %307 = vector.shape_cast %306 : vector<1x18x1xf32> to vector<18x1xf32>
    %308 = vector.extract_strided_slice %307 {offsets = [0, 0], sizes = [17, 1], strides = [1, 1]} : vector<18x1xf32> to vector<17x1xf32>
    %309 = vector.extract_strided_slice %7 {offsets = [0, 0], sizes = [1, 32], strides = [1, 1]} : vector<4x32xf32> to vector<1x32xf32>
    %310 = vector.broadcast %308 : vector<17x1xf32> to vector<17x32xf32>
    %311 = vector.broadcast %309 : vector<1x32xf32> to vector<17x32xf32>
    %312 = arith.mulf %310, %311 : vector<17x32xf32>
    %313 = arith.addf %305, %312 : vector<17x32xf32>
    %314 = vector.extract_strided_slice %307 {offsets = [1, 0], sizes = [17, 1], strides = [1, 1]} : vector<18x1xf32> to vector<17x1xf32>
    %315 = vector.extract_strided_slice %7 {offsets = [1, 0], sizes = [1, 32], strides = [1, 1]} : vector<4x32xf32> to vector<1x32xf32>
    %316 = vector.broadcast %314 : vector<17x1xf32> to vector<17x32xf32>
    %317 = vector.broadcast %315 : vector<1x32xf32> to vector<17x32xf32>
    %318 = arith.mulf %316, %317 : vector<17x32xf32>
    %319 = arith.addf %313, %318 : vector<17x32xf32>
    %c8 = arith.constant 8 : index
    %c0_101 = arith.constant 0 : index
    %c0_102 = arith.constant 0 : index
    %320 = vector.load %arg17[%c8, %c0_101, %c0_102] : memref<18x18x1xf32, #tpu.memory_space<vmem>>, vector<1x18x1xf32>
    %321 = vector.shape_cast %320 : vector<1x18x1xf32> to vector<18x1xf32>
    %322 = vector.extract_strided_slice %321 {offsets = [0, 0], sizes = [17, 1], strides = [1, 1]} : vector<18x1xf32> to vector<17x1xf32>
    %323 = vector.extract_strided_slice %7 {offsets = [2, 0], sizes = [1, 32], strides = [1, 1]} : vector<4x32xf32> to vector<1x32xf32>
    %324 = vector.broadcast %322 : vector<17x1xf32> to vector<17x32xf32>
    %325 = vector.broadcast %323 : vector<1x32xf32> to vector<17x32xf32>
    %326 = arith.mulf %324, %325 : vector<17x32xf32>
    %327 = arith.addf %319, %326 : vector<17x32xf32>
    %328 = vector.extract_strided_slice %321 {offsets = [1, 0], sizes = [17, 1], strides = [1, 1]} : vector<18x1xf32> to vector<17x1xf32>
    %329 = vector.extract_strided_slice %7 {offsets = [3, 0], sizes = [1, 32], strides = [1, 1]} : vector<4x32xf32> to vector<1x32xf32>
    %330 = vector.broadcast %328 : vector<17x1xf32> to vector<17x32xf32>
    %331 = vector.broadcast %329 : vector<1x32xf32> to vector<17x32xf32>
    %332 = arith.mulf %330, %331 : vector<17x32xf32>
    %333 = arith.addf %327, %332 : vector<17x32xf32>
    %334 = vector.broadcast %8 : vector<1x32xf32> to vector<17x32xf32>
    %335 = arith.mulf %333, %334 : vector<17x32xf32>
    %336 = vector.broadcast %9 : vector<1x32xf32> to vector<17x32xf32>
    %337 = arith.addf %335, %336 : vector<17x32xf32>
    %cst_103 = arith.constant 0.000000e+00 : f32
    %338 = vector.broadcast %cst_103 : f32 to vector<17x32xf32>
    %339 = arith.maximumf %337, %338 : vector<17x32xf32>
    %340 = arith.maximumf %304, %339 : vector<17x32xf32>
    %341 = vector.extract_strided_slice %340 {offsets = [0, 0], sizes = [16, 32], strides = [1, 1]} : vector<17x32xf32> to vector<16x32xf32>
    %342 = vector.extract_strided_slice %340 {offsets = [1, 0], sizes = [16, 32], strides = [1, 1]} : vector<17x32xf32> to vector<16x32xf32>
    %343 = arith.maximumf %341, %342 : vector<16x32xf32>
    %cst_104 = arith.constant dense<0.000000e+00> : vector<8x32xf32>
    %344 = tpu.matmul %18, %343, %cst_104 {dimension_numbers = #tpu.dot_dimension_numbers<[1], [0], [0], [1], [0, 0, 1, 1], [], []>} : vector<8x16xf32>, vector<16x32xf32>, vector<8x32xf32> -> vector<8x32xf32>
    %c4_105 = arith.constant 4 : index
    %c1_106 = arith.constant 1 : index
    %c0_107 = arith.constant 0 : index
    %345 = vector.load %arg18[%c4_105, %c1_106, %c0_107] : memref<10x10x32xf32, #tpu.memory_space<vmem>>, vector<1x8x32xf32>
    %346 = vector.shape_cast %345 : vector<1x8x32xf32> to vector<8x32xf32>
    %347 = vector.shape_cast %344 : vector<8x32xf32> to vector<1x8x32xf32>
    tpu.vector_store %arg18[%c4_105, %c1_106, %c0_107], %347 {strides = array<i32>} : memref<10x10x32xf32, #tpu.memory_space<vmem>>, vector<1x8x32xf32>,
    %cst_108 = arith.constant 0.000000e+00 : f32
    %348 = vector.broadcast %cst_108 : f32 to vector<17x32xf32>
    %c8_109 = arith.constant 8 : index
    %c0_110 = arith.constant 0 : index
    %c0_111 = arith.constant 0 : index
    %349 = vector.load %arg17[%c8_109, %c0_110, %c0_111] : memref<18x18x1xf32, #tpu.memory_space<vmem>>, vector<1x18x1xf32>
    %350 = vector.shape_cast %349 : vector<1x18x1xf32> to vector<18x1xf32>
    %351 = vector.extract_strided_slice %350 {offsets = [0, 0], sizes = [17, 1], strides = [1, 1]} : vector<18x1xf32> to vector<17x1xf32>
    %352 = vector.extract_strided_slice %7 {offsets = [0, 0], sizes = [1, 32], strides = [1, 1]} : vector<4x32xf32> to vector<1x32xf32>
    %353 = vector.broadcast %351 : vector<17x1xf32> to vector<17x32xf32>
    %354 = vector.broadcast %352 : vector<1x32xf32> to vector<17x32xf32>
    %355 = arith.mulf %353, %354 : vector<17x32xf32>
    %356 = arith.addf %348, %355 : vector<17x32xf32>
    %357 = vector.extract_strided_slice %350 {offsets = [1, 0], sizes = [17, 1], strides = [1, 1]} : vector<18x1xf32> to vector<17x1xf32>
    %358 = vector.extract_strided_slice %7 {offsets = [1, 0], sizes = [1, 32], strides = [1, 1]} : vector<4x32xf32> to vector<1x32xf32>
    %359 = vector.broadcast %357 : vector<17x1xf32> to vector<17x32xf32>
    %360 = vector.broadcast %358 : vector<1x32xf32> to vector<17x32xf32>
    %361 = arith.mulf %359, %360 : vector<17x32xf32>
    %362 = arith.addf %356, %361 : vector<17x32xf32>
    %c9 = arith.constant 9 : index
    %c0_112 = arith.constant 0 : index
    %c0_113 = arith.constant 0 : index
    %363 = vector.load %arg17[%c9, %c0_112, %c0_113] : memref<18x18x1xf32, #tpu.memory_space<vmem>>, vector<1x18x1xf32>
    %364 = vector.shape_cast %363 : vector<1x18x1xf32> to vector<18x1xf32>
    %365 = vector.extract_strided_slice %364 {offsets = [0, 0], sizes = [17, 1], strides = [1, 1]} : vector<18x1xf32> to vector<17x1xf32>
    %366 = vector.extract_strided_slice %7 {offsets = [2, 0], sizes = [1, 32], strides = [1, 1]} : vector<4x32xf32> to vector<1x32xf32>
    %367 = vector.broadcast %365 : vector<17x1xf32> to vector<17x32xf32>
    %368 = vector.broadcast %366 : vector<1x32xf32> to vector<17x32xf32>
    %369 = arith.mulf %367, %368 : vector<17x32xf32>
    %370 = arith.addf %362, %369 : vector<17x32xf32>
    %371 = vector.extract_strided_slice %364 {offsets = [1, 0], sizes = [17, 1], strides = [1, 1]} : vector<18x1xf32> to vector<17x1xf32>
    %372 = vector.extract_strided_slice %7 {offsets = [3, 0], sizes = [1, 32], strides = [1, 1]} : vector<4x32xf32> to vector<1x32xf32>
    %373 = vector.broadcast %371 : vector<17x1xf32> to vector<17x32xf32>
    %374 = vector.broadcast %372 : vector<1x32xf32> to vector<17x32xf32>
    %375 = arith.mulf %373, %374 : vector<17x32xf32>
    %376 = arith.addf %370, %375 : vector<17x32xf32>
    %377 = vector.broadcast %8 : vector<1x32xf32> to vector<17x32xf32>
    %378 = arith.mulf %376, %377 : vector<17x32xf32>
    %379 = vector.broadcast %9 : vector<1x32xf32> to vector<17x32xf32>
    %380 = arith.addf %378, %379 : vector<17x32xf32>
    %cst_114 = arith.constant 0.000000e+00 : f32
    %381 = vector.broadcast %cst_114 : f32 to vector<17x32xf32>
    %382 = arith.maximumf %380, %381 : vector<17x32xf32>
    %cst_115 = arith.constant 0.000000e+00 : f32
    %383 = vector.broadcast %cst_115 : f32 to vector<17x32xf32>
    %c9_116 = arith.constant 9 : index
    %c0_117 = arith.constant 0 : index
    %c0_118 = arith.constant 0 : index
    %384 = vector.load %arg17[%c9_116, %c0_117, %c0_118] : memref<18x18x1xf32, #tpu.memory_space<vmem>>, vector<1x18x1xf32>
    %385 = vector.shape_cast %384 : vector<1x18x1xf32> to vector<18x1xf32>
    %386 = vector.extract_strided_slice %385 {offsets = [0, 0], sizes = [17, 1], strides = [1, 1]} : vector<18x1xf32> to vector<17x1xf32>
    %387 = vector.extract_strided_slice %7 {offsets = [0, 0], sizes = [1, 32], strides = [1, 1]} : vector<4x32xf32> to vector<1x32xf32>
    %388 = vector.broadcast %386 : vector<17x1xf32> to vector<17x32xf32>
    %389 = vector.broadcast %387 : vector<1x32xf32> to vector<17x32xf32>
    %390 = arith.mulf %388, %389 : vector<17x32xf32>
    %391 = arith.addf %383, %390 : vector<17x32xf32>
    %392 = vector.extract_strided_slice %385 {offsets = [1, 0], sizes = [17, 1], strides = [1, 1]} : vector<18x1xf32> to vector<17x1xf32>
    %393 = vector.extract_strided_slice %7 {offsets = [1, 0], sizes = [1, 32], strides = [1, 1]} : vector<4x32xf32> to vector<1x32xf32>
    %394 = vector.broadcast %392 : vector<17x1xf32> to vector<17x32xf32>
    %395 = vector.broadcast %393 : vector<1x32xf32> to vector<17x32xf32>
    %396 = arith.mulf %394, %395 : vector<17x32xf32>
    %397 = arith.addf %391, %396 : vector<17x32xf32>
    %c10 = arith.constant 10 : index
    %c0_119 = arith.constant 0 : index
    %c0_120 = arith.constant 0 : index
    %398 = vector.load %arg17[%c10, %c0_119, %c0_120] : memref<18x18x1xf32, #tpu.memory_space<vmem>>, vector<1x18x1xf32>
    %399 = vector.shape_cast %398 : vector<1x18x1xf32> to vector<18x1xf32>
    %400 = vector.extract_strided_slice %399 {offsets = [0, 0], sizes = [17, 1], strides = [1, 1]} : vector<18x1xf32> to vector<17x1xf32>
    %401 = vector.extract_strided_slice %7 {offsets = [2, 0], sizes = [1, 32], strides = [1, 1]} : vector<4x32xf32> to vector<1x32xf32>
    %402 = vector.broadcast %400 : vector<17x1xf32> to vector<17x32xf32>
    %403 = vector.broadcast %401 : vector<1x32xf32> to vector<17x32xf32>
    %404 = arith.mulf %402, %403 : vector<17x32xf32>
    %405 = arith.addf %397, %404 : vector<17x32xf32>
    %406 = vector.extract_strided_slice %399 {offsets = [1, 0], sizes = [17, 1], strides = [1, 1]} : vector<18x1xf32> to vector<17x1xf32>
    %407 = vector.extract_strided_slice %7 {offsets = [3, 0], sizes = [1, 32], strides = [1, 1]} : vector<4x32xf32> to vector<1x32xf32>
    %408 = vector.broadcast %406 : vector<17x1xf32> to vector<17x32xf32>
    %409 = vector.broadcast %407 : vector<1x32xf32> to vector<17x32xf32>
    %410 = arith.mulf %408, %409 : vector<17x32xf32>
    %411 = arith.addf %405, %410 : vector<17x32xf32>
    %412 = vector.broadcast %8 : vector<1x32xf32> to vector<17x32xf32>
    %413 = arith.mulf %411, %412 : vector<17x32xf32>
    %414 = vector.broadcast %9 : vector<1x32xf32> to vector<17x32xf32>
    %415 = arith.addf %413, %414 : vector<17x32xf32>
    %cst_121 = arith.constant 0.000000e+00 : f32
    %416 = vector.broadcast %cst_121 : f32 to vector<17x32xf32>
    %417 = arith.maximumf %415, %416 : vector<17x32xf32>
    %418 = arith.maximumf %382, %417 : vector<17x32xf32>
    %419 = vector.extract_strided_slice %418 {offsets = [0, 0], sizes = [16, 32], strides = [1, 1]} : vector<17x32xf32> to vector<16x32xf32>
    %420 = vector.extract_strided_slice %418 {offsets = [1, 0], sizes = [16, 32], strides = [1, 1]} : vector<17x32xf32> to vector<16x32xf32>
    %421 = arith.maximumf %419, %420 : vector<16x32xf32>
    %cst_122 = arith.constant dense<0.000000e+00> : vector<8x32xf32>
    %422 = tpu.matmul %18, %421, %cst_122 {dimension_numbers = #tpu.dot_dimension_numbers<[1], [0], [0], [1], [0, 0, 1, 1], [], []>} : vector<8x16xf32>, vector<16x32xf32>, vector<8x32xf32> -> vector<8x32xf32>
    %c5_123 = arith.constant 5 : index
    %c1_124 = arith.constant 1 : index
    %c0_125 = arith.constant 0 : index
    %423 = vector.load %arg18[%c5_123, %c1_124, %c0_125] : memref<10x10x32xf32, #tpu.memory_space<vmem>>, vector<1x8x32xf32>
    %424 = vector.shape_cast %423 : vector<1x8x32xf32> to vector<8x32xf32>
    %425 = vector.shape_cast %422 : vector<8x32xf32> to vector<1x8x32xf32>
    tpu.vector_store %arg18[%c5_123, %c1_124, %c0_125], %425 {strides = array<i32>} : memref<10x10x32xf32, #tpu.memory_space<vmem>>, vector<1x8x32xf32>,
    %cst_126 = arith.constant 0.000000e+00 : f32
    %426 = vector.broadcast %cst_126 : f32 to vector<17x32xf32>
    %c10_127 = arith.constant 10 : index
    %c0_128 = arith.constant 0 : index
    %c0_129 = arith.constant 0 : index
    %427 = vector.load %arg17[%c10_127, %c0_128, %c0_129] : memref<18x18x1xf32, #tpu.memory_space<vmem>>, vector<1x18x1xf32>
    %428 = vector.shape_cast %427 : vector<1x18x1xf32> to vector<18x1xf32>
    %429 = vector.extract_strided_slice %428 {offsets = [0, 0], sizes = [17, 1], strides = [1, 1]} : vector<18x1xf32> to vector<17x1xf32>
    %430 = vector.extract_strided_slice %7 {offsets = [0, 0], sizes = [1, 32], strides = [1, 1]} : vector<4x32xf32> to vector<1x32xf32>
    %431 = vector.broadcast %429 : vector<17x1xf32> to vector<17x32xf32>
    %432 = vector.broadcast %430 : vector<1x32xf32> to vector<17x32xf32>
    %433 = arith.mulf %431, %432 : vector<17x32xf32>
    %434 = arith.addf %426, %433 : vector<17x32xf32>
    %435 = vector.extract_strided_slice %428 {offsets = [1, 0], sizes = [17, 1], strides = [1, 1]} : vector<18x1xf32> to vector<17x1xf32>
    %436 = vector.extract_strided_slice %7 {offsets = [1, 0], sizes = [1, 32], strides = [1, 1]} : vector<4x32xf32> to vector<1x32xf32>
    %437 = vector.broadcast %435 : vector<17x1xf32> to vector<17x32xf32>
    %438 = vector.broadcast %436 : vector<1x32xf32> to vector<17x32xf32>
    %439 = arith.mulf %437, %438 : vector<17x32xf32>
    %440 = arith.addf %434, %439 : vector<17x32xf32>
    %c11 = arith.constant 11 : index
    %c0_130 = arith.constant 0 : index
    %c0_131 = arith.constant 0 : index
    %441 = vector.load %arg17[%c11, %c0_130, %c0_131] : memref<18x18x1xf32, #tpu.memory_space<vmem>>, vector<1x18x1xf32>
    %442 = vector.shape_cast %441 : vector<1x18x1xf32> to vector<18x1xf32>
    %443 = vector.extract_strided_slice %442 {offsets = [0, 0], sizes = [17, 1], strides = [1, 1]} : vector<18x1xf32> to vector<17x1xf32>
    %444 = vector.extract_strided_slice %7 {offsets = [2, 0], sizes = [1, 32], strides = [1, 1]} : vector<4x32xf32> to vector<1x32xf32>
    %445 = vector.broadcast %443 : vector<17x1xf32> to vector<17x32xf32>
    %446 = vector.broadcast %444 : vector<1x32xf32> to vector<17x32xf32>
    %447 = arith.mulf %445, %446 : vector<17x32xf32>
    %448 = arith.addf %440, %447 : vector<17x32xf32>
    %449 = vector.extract_strided_slice %442 {offsets = [1, 0], sizes = [17, 1], strides = [1, 1]} : vector<18x1xf32> to vector<17x1xf32>
    %450 = vector.extract_strided_slice %7 {offsets = [3, 0], sizes = [1, 32], strides = [1, 1]} : vector<4x32xf32> to vector<1x32xf32>
    %451 = vector.broadcast %449 : vector<17x1xf32> to vector<17x32xf32>
    %452 = vector.broadcast %450 : vector<1x32xf32> to vector<17x32xf32>
    %453 = arith.mulf %451, %452 : vector<17x32xf32>
    %454 = arith.addf %448, %453 : vector<17x32xf32>
    %455 = vector.broadcast %8 : vector<1x32xf32> to vector<17x32xf32>
    %456 = arith.mulf %454, %455 : vector<17x32xf32>
    %457 = vector.broadcast %9 : vector<1x32xf32> to vector<17x32xf32>
    %458 = arith.addf %456, %457 : vector<17x32xf32>
    %cst_132 = arith.constant 0.000000e+00 : f32
    %459 = vector.broadcast %cst_132 : f32 to vector<17x32xf32>
    %460 = arith.maximumf %458, %459 : vector<17x32xf32>
    %cst_133 = arith.constant 0.000000e+00 : f32
    %461 = vector.broadcast %cst_133 : f32 to vector<17x32xf32>
    %c11_134 = arith.constant 11 : index
    %c0_135 = arith.constant 0 : index
    %c0_136 = arith.constant 0 : index
    %462 = vector.load %arg17[%c11_134, %c0_135, %c0_136] : memref<18x18x1xf32, #tpu.memory_space<vmem>>, vector<1x18x1xf32>
    %463 = vector.shape_cast %462 : vector<1x18x1xf32> to vector<18x1xf32>
    %464 = vector.extract_strided_slice %463 {offsets = [0, 0], sizes = [17, 1], strides = [1, 1]} : vector<18x1xf32> to vector<17x1xf32>
    %465 = vector.extract_strided_slice %7 {offsets = [0, 0], sizes = [1, 32], strides = [1, 1]} : vector<4x32xf32> to vector<1x32xf32>
    %466 = vector.broadcast %464 : vector<17x1xf32> to vector<17x32xf32>
    %467 = vector.broadcast %465 : vector<1x32xf32> to vector<17x32xf32>
    %468 = arith.mulf %466, %467 : vector<17x32xf32>
    %469 = arith.addf %461, %468 : vector<17x32xf32>
    %470 = vector.extract_strided_slice %463 {offsets = [1, 0], sizes = [17, 1], strides = [1, 1]} : vector<18x1xf32> to vector<17x1xf32>
    %471 = vector.extract_strided_slice %7 {offsets = [1, 0], sizes = [1, 32], strides = [1, 1]} : vector<4x32xf32> to vector<1x32xf32>
    %472 = vector.broadcast %470 : vector<17x1xf32> to vector<17x32xf32>
    %473 = vector.broadcast %471 : vector<1x32xf32> to vector<17x32xf32>
    %474 = arith.mulf %472, %473 : vector<17x32xf32>
    %475 = arith.addf %469, %474 : vector<17x32xf32>
    %c12 = arith.constant 12 : index
    %c0_137 = arith.constant 0 : index
    %c0_138 = arith.constant 0 : index
    %476 = vector.load %arg17[%c12, %c0_137, %c0_138] : memref<18x18x1xf32, #tpu.memory_space<vmem>>, vector<1x18x1xf32>
    %477 = vector.shape_cast %476 : vector<1x18x1xf32> to vector<18x1xf32>
    %478 = vector.extract_strided_slice %477 {offsets = [0, 0], sizes = [17, 1], strides = [1, 1]} : vector<18x1xf32> to vector<17x1xf32>
    %479 = vector.extract_strided_slice %7 {offsets = [2, 0], sizes = [1, 32], strides = [1, 1]} : vector<4x32xf32> to vector<1x32xf32>
    %480 = vector.broadcast %478 : vector<17x1xf32> to vector<17x32xf32>
    %481 = vector.broadcast %479 : vector<1x32xf32> to vector<17x32xf32>
    %482 = arith.mulf %480, %481 : vector<17x32xf32>
    %483 = arith.addf %475, %482 : vector<17x32xf32>
    %484 = vector.extract_strided_slice %477 {offsets = [1, 0], sizes = [17, 1], strides = [1, 1]} : vector<18x1xf32> to vector<17x1xf32>
    %485 = vector.extract_strided_slice %7 {offsets = [3, 0], sizes = [1, 32], strides = [1, 1]} : vector<4x32xf32> to vector<1x32xf32>
    %486 = vector.broadcast %484 : vector<17x1xf32> to vector<17x32xf32>
    %487 = vector.broadcast %485 : vector<1x32xf32> to vector<17x32xf32>
    %488 = arith.mulf %486, %487 : vector<17x32xf32>
    %489 = arith.addf %483, %488 : vector<17x32xf32>
    %490 = vector.broadcast %8 : vector<1x32xf32> to vector<17x32xf32>
    %491 = arith.mulf %489, %490 : vector<17x32xf32>
    %492 = vector.broadcast %9 : vector<1x32xf32> to vector<17x32xf32>
    %493 = arith.addf %491, %492 : vector<17x32xf32>
    %cst_139 = arith.constant 0.000000e+00 : f32
    %494 = vector.broadcast %cst_139 : f32 to vector<17x32xf32>
    %495 = arith.maximumf %493, %494 : vector<17x32xf32>
    %496 = arith.maximumf %460, %495 : vector<17x32xf32>
    %497 = vector.extract_strided_slice %496 {offsets = [0, 0], sizes = [16, 32], strides = [1, 1]} : vector<17x32xf32> to vector<16x32xf32>
    %498 = vector.extract_strided_slice %496 {offsets = [1, 0], sizes = [16, 32], strides = [1, 1]} : vector<17x32xf32> to vector<16x32xf32>
    %499 = arith.maximumf %497, %498 : vector<16x32xf32>
    %cst_140 = arith.constant dense<0.000000e+00> : vector<8x32xf32>
    %500 = tpu.matmul %18, %499, %cst_140 {dimension_numbers = #tpu.dot_dimension_numbers<[1], [0], [0], [1], [0, 0, 1, 1], [], []>} : vector<8x16xf32>, vector<16x32xf32>, vector<8x32xf32> -> vector<8x32xf32>
    %c6_141 = arith.constant 6 : index
    %c1_142 = arith.constant 1 : index
    %c0_143 = arith.constant 0 : index
    %501 = vector.load %arg18[%c6_141, %c1_142, %c0_143] : memref<10x10x32xf32, #tpu.memory_space<vmem>>, vector<1x8x32xf32>
    %502 = vector.shape_cast %501 : vector<1x8x32xf32> to vector<8x32xf32>
    %503 = vector.shape_cast %500 : vector<8x32xf32> to vector<1x8x32xf32>
    tpu.vector_store %arg18[%c6_141, %c1_142, %c0_143], %503 {strides = array<i32>} : memref<10x10x32xf32, #tpu.memory_space<vmem>>, vector<1x8x32xf32>,
    %cst_144 = arith.constant 0.000000e+00 : f32
    %504 = vector.broadcast %cst_144 : f32 to vector<17x32xf32>
    %c12_145 = arith.constant 12 : index
    %c0_146 = arith.constant 0 : index
    %c0_147 = arith.constant 0 : index
    %505 = vector.load %arg17[%c12_145, %c0_146, %c0_147] : memref<18x18x1xf32, #tpu.memory_space<vmem>>, vector<1x18x1xf32>
    %506 = vector.shape_cast %505 : vector<1x18x1xf32> to vector<18x1xf32>
    %507 = vector.extract_strided_slice %506 {offsets = [0, 0], sizes = [17, 1], strides = [1, 1]} : vector<18x1xf32> to vector<17x1xf32>
    %508 = vector.extract_strided_slice %7 {offsets = [0, 0], sizes = [1, 32], strides = [1, 1]} : vector<4x32xf32> to vector<1x32xf32>
    %509 = vector.broadcast %507 : vector<17x1xf32> to vector<17x32xf32>
    %510 = vector.broadcast %508 : vector<1x32xf32> to vector<17x32xf32>
    %511 = arith.mulf %509, %510 : vector<17x32xf32>
    %512 = arith.addf %504, %511 : vector<17x32xf32>
    %513 = vector.extract_strided_slice %506 {offsets = [1, 0], sizes = [17, 1], strides = [1, 1]} : vector<18x1xf32> to vector<17x1xf32>
    %514 = vector.extract_strided_slice %7 {offsets = [1, 0], sizes = [1, 32], strides = [1, 1]} : vector<4x32xf32> to vector<1x32xf32>
    %515 = vector.broadcast %513 : vector<17x1xf32> to vector<17x32xf32>
    %516 = vector.broadcast %514 : vector<1x32xf32> to vector<17x32xf32>
    %517 = arith.mulf %515, %516 : vector<17x32xf32>
    %518 = arith.addf %512, %517 : vector<17x32xf32>
    %c13 = arith.constant 13 : index
    %c0_148 = arith.constant 0 : index
    %c0_149 = arith.constant 0 : index
    %519 = vector.load %arg17[%c13, %c0_148, %c0_149] : memref<18x18x1xf32, #tpu.memory_space<vmem>>, vector<1x18x1xf32>
    %520 = vector.shape_cast %519 : vector<1x18x1xf32> to vector<18x1xf32>
    %521 = vector.extract_strided_slice %520 {offsets = [0, 0], sizes = [17, 1], strides = [1, 1]} : vector<18x1xf32> to vector<17x1xf32>
    %522 = vector.extract_strided_slice %7 {offsets = [2, 0], sizes = [1, 32], strides = [1, 1]} : vector<4x32xf32> to vector<1x32xf32>
    %523 = vector.broadcast %521 : vector<17x1xf32> to vector<17x32xf32>
    %524 = vector.broadcast %522 : vector<1x32xf32> to vector<17x32xf32>
    %525 = arith.mulf %523, %524 : vector<17x32xf32>
    %526 = arith.addf %518, %525 : vector<17x32xf32>
    %527 = vector.extract_strided_slice %520 {offsets = [1, 0], sizes = [17, 1], strides = [1, 1]} : vector<18x1xf32> to vector<17x1xf32>
    %528 = vector.extract_strided_slice %7 {offsets = [3, 0], sizes = [1, 32], strides = [1, 1]} : vector<4x32xf32> to vector<1x32xf32>
    %529 = vector.broadcast %527 : vector<17x1xf32> to vector<17x32xf32>
    %530 = vector.broadcast %528 : vector<1x32xf32> to vector<17x32xf32>
    %531 = arith.mulf %529, %530 : vector<17x32xf32>
    %532 = arith.addf %526, %531 : vector<17x32xf32>
    %533 = vector.broadcast %8 : vector<1x32xf32> to vector<17x32xf32>
    %534 = arith.mulf %532, %533 : vector<17x32xf32>
    %535 = vector.broadcast %9 : vector<1x32xf32> to vector<17x32xf32>
    %536 = arith.addf %534, %535 : vector<17x32xf32>
    %cst_150 = arith.constant 0.000000e+00 : f32
    %537 = vector.broadcast %cst_150 : f32 to vector<17x32xf32>
    %538 = arith.maximumf %536, %537 : vector<17x32xf32>
    %cst_151 = arith.constant 0.000000e+00 : f32
    %539 = vector.broadcast %cst_151 : f32 to vector<17x32xf32>
    %c13_152 = arith.constant 13 : index
    %c0_153 = arith.constant 0 : index
    %c0_154 = arith.constant 0 : index
    %540 = vector.load %arg17[%c13_152, %c0_153, %c0_154] : memref<18x18x1xf32, #tpu.memory_space<vmem>>, vector<1x18x1xf32>
    %541 = vector.shape_cast %540 : vector<1x18x1xf32> to vector<18x1xf32>
    %542 = vector.extract_strided_slice %541 {offsets = [0, 0], sizes = [17, 1], strides = [1, 1]} : vector<18x1xf32> to vector<17x1xf32>
    %543 = vector.extract_strided_slice %7 {offsets = [0, 0], sizes = [1, 32], strides = [1, 1]} : vector<4x32xf32> to vector<1x32xf32>
    %544 = vector.broadcast %542 : vector<17x1xf32> to vector<17x32xf32>
    %545 = vector.broadcast %543 : vector<1x32xf32> to vector<17x32xf32>
    %546 = arith.mulf %544, %545 : vector<17x32xf32>
    %547 = arith.addf %539, %546 : vector<17x32xf32>
    %548 = vector.extract_strided_slice %541 {offsets = [1, 0], sizes = [17, 1], strides = [1, 1]} : vector<18x1xf32> to vector<17x1xf32>
    %549 = vector.extract_strided_slice %7 {offsets = [1, 0], sizes = [1, 32], strides = [1, 1]} : vector<4x32xf32> to vector<1x32xf32>
    %550 = vector.broadcast %548 : vector<17x1xf32> to vector<17x32xf32>
    %551 = vector.broadcast %549 : vector<1x32xf32> to vector<17x32xf32>
    %552 = arith.mulf %550, %551 : vector<17x32xf32>
    %553 = arith.addf %547, %552 : vector<17x32xf32>
    %c14 = arith.constant 14 : index
    %c0_155 = arith.constant 0 : index
    %c0_156 = arith.constant 0 : index
    %554 = vector.load %arg17[%c14, %c0_155, %c0_156] : memref<18x18x1xf32, #tpu.memory_space<vmem>>, vector<1x18x1xf32>
    %555 = vector.shape_cast %554 : vector<1x18x1xf32> to vector<18x1xf32>
    %556 = vector.extract_strided_slice %555 {offsets = [0, 0], sizes = [17, 1], strides = [1, 1]} : vector<18x1xf32> to vector<17x1xf32>
    %557 = vector.extract_strided_slice %7 {offsets = [2, 0], sizes = [1, 32], strides = [1, 1]} : vector<4x32xf32> to vector<1x32xf32>
    %558 = vector.broadcast %556 : vector<17x1xf32> to vector<17x32xf32>
    %559 = vector.broadcast %557 : vector<1x32xf32> to vector<17x32xf32>
    %560 = arith.mulf %558, %559 : vector<17x32xf32>
    %561 = arith.addf %553, %560 : vector<17x32xf32>
    %562 = vector.extract_strided_slice %555 {offsets = [1, 0], sizes = [17, 1], strides = [1, 1]} : vector<18x1xf32> to vector<17x1xf32>
    %563 = vector.extract_strided_slice %7 {offsets = [3, 0], sizes = [1, 32], strides = [1, 1]} : vector<4x32xf32> to vector<1x32xf32>
    %564 = vector.broadcast %562 : vector<17x1xf32> to vector<17x32xf32>
    %565 = vector.broadcast %563 : vector<1x32xf32> to vector<17x32xf32>
    %566 = arith.mulf %564, %565 : vector<17x32xf32>
    %567 = arith.addf %561, %566 : vector<17x32xf32>
    %568 = vector.broadcast %8 : vector<1x32xf32> to vector<17x32xf32>
    %569 = arith.mulf %567, %568 : vector<17x32xf32>
    %570 = vector.broadcast %9 : vector<1x32xf32> to vector<17x32xf32>
    %571 = arith.addf %569, %570 : vector<17x32xf32>
    %cst_157 = arith.constant 0.000000e+00 : f32
    %572 = vector.broadcast %cst_157 : f32 to vector<17x32xf32>
    %573 = arith.maximumf %571, %572 : vector<17x32xf32>
    %574 = arith.maximumf %538, %573 : vector<17x32xf32>
    %575 = vector.extract_strided_slice %574 {offsets = [0, 0], sizes = [16, 32], strides = [1, 1]} : vector<17x32xf32> to vector<16x32xf32>
    %576 = vector.extract_strided_slice %574 {offsets = [1, 0], sizes = [16, 32], strides = [1, 1]} : vector<17x32xf32> to vector<16x32xf32>
    %577 = arith.maximumf %575, %576 : vector<16x32xf32>
    %cst_158 = arith.constant dense<0.000000e+00> : vector<8x32xf32>
    %578 = tpu.matmul %18, %577, %cst_158 {dimension_numbers = #tpu.dot_dimension_numbers<[1], [0], [0], [1], [0, 0, 1, 1], [], []>} : vector<8x16xf32>, vector<16x32xf32>, vector<8x32xf32> -> vector<8x32xf32>
    %c7_159 = arith.constant 7 : index
    %c1_160 = arith.constant 1 : index
    %c0_161 = arith.constant 0 : index
    %579 = vector.load %arg18[%c7_159, %c1_160, %c0_161] : memref<10x10x32xf32, #tpu.memory_space<vmem>>, vector<1x8x32xf32>
    %580 = vector.shape_cast %579 : vector<1x8x32xf32> to vector<8x32xf32>
    %581 = vector.shape_cast %578 : vector<8x32xf32> to vector<1x8x32xf32>
    tpu.vector_store %arg18[%c7_159, %c1_160, %c0_161], %581 {strides = array<i32>} : memref<10x10x32xf32, #tpu.memory_space<vmem>>, vector<1x8x32xf32>,
    %cst_162 = arith.constant 0.000000e+00 : f32
    %582 = vector.broadcast %cst_162 : f32 to vector<17x32xf32>
    %c14_163 = arith.constant 14 : index
    %c0_164 = arith.constant 0 : index
    %c0_165 = arith.constant 0 : index
    %583 = vector.load %arg17[%c14_163, %c0_164, %c0_165] : memref<18x18x1xf32, #tpu.memory_space<vmem>>, vector<1x18x1xf32>
    %584 = vector.shape_cast %583 : vector<1x18x1xf32> to vector<18x1xf32>
    %585 = vector.extract_strided_slice %584 {offsets = [0, 0], sizes = [17, 1], strides = [1, 1]} : vector<18x1xf32> to vector<17x1xf32>
    %586 = vector.extract_strided_slice %7 {offsets = [0, 0], sizes = [1, 32], strides = [1, 1]} : vector<4x32xf32> to vector<1x32xf32>
    %587 = vector.broadcast %585 : vector<17x1xf32> to vector<17x32xf32>
    %588 = vector.broadcast %586 : vector<1x32xf32> to vector<17x32xf32>
    %589 = arith.mulf %587, %588 : vector<17x32xf32>
    %590 = arith.addf %582, %589 : vector<17x32xf32>
    %591 = vector.extract_strided_slice %584 {offsets = [1, 0], sizes = [17, 1], strides = [1, 1]} : vector<18x1xf32> to vector<17x1xf32>
    %592 = vector.extract_strided_slice %7 {offsets = [1, 0], sizes = [1, 32], strides = [1, 1]} : vector<4x32xf32> to vector<1x32xf32>
    %593 = vector.broadcast %591 : vector<17x1xf32> to vector<17x32xf32>
    %594 = vector.broadcast %592 : vector<1x32xf32> to vector<17x32xf32>
    %595 = arith.mulf %593, %594 : vector<17x32xf32>
    %596 = arith.addf %590, %595 : vector<17x32xf32>
    %c15 = arith.constant 15 : index
    %c0_166 = arith.constant 0 : index
    %c0_167 = arith.constant 0 : index
    %597 = vector.load %arg17[%c15, %c0_166, %c0_167] : memref<18x18x1xf32, #tpu.memory_space<vmem>>, vector<1x18x1xf32>
    %598 = vector.shape_cast %597 : vector<1x18x1xf32> to vector<18x1xf32>
    %599 = vector.extract_strided_slice %598 {offsets = [0, 0], sizes = [17, 1], strides = [1, 1]} : vector<18x1xf32> to vector<17x1xf32>
    %600 = vector.extract_strided_slice %7 {offsets = [2, 0], sizes = [1, 32], strides = [1, 1]} : vector<4x32xf32> to vector<1x32xf32>
    %601 = vector.broadcast %599 : vector<17x1xf32> to vector<17x32xf32>
    %602 = vector.broadcast %600 : vector<1x32xf32> to vector<17x32xf32>
    %603 = arith.mulf %601, %602 : vector<17x32xf32>
    %604 = arith.addf %596, %603 : vector<17x32xf32>
    %605 = vector.extract_strided_slice %598 {offsets = [1, 0], sizes = [17, 1], strides = [1, 1]} : vector<18x1xf32> to vector<17x1xf32>
    %606 = vector.extract_strided_slice %7 {offsets = [3, 0], sizes = [1, 32], strides = [1, 1]} : vector<4x32xf32> to vector<1x32xf32>
    %607 = vector.broadcast %605 : vector<17x1xf32> to vector<17x32xf32>
    %608 = vector.broadcast %606 : vector<1x32xf32> to vector<17x32xf32>
    %609 = arith.mulf %607, %608 : vector<17x32xf32>
    %610 = arith.addf %604, %609 : vector<17x32xf32>
    %611 = vector.broadcast %8 : vector<1x32xf32> to vector<17x32xf32>
    %612 = arith.mulf %610, %611 : vector<17x32xf32>
    %613 = vector.broadcast %9 : vector<1x32xf32> to vector<17x32xf32>
    %614 = arith.addf %612, %613 : vector<17x32xf32>
    %cst_168 = arith.constant 0.000000e+00 : f32
    %615 = vector.broadcast %cst_168 : f32 to vector<17x32xf32>
    %616 = arith.maximumf %614, %615 : vector<17x32xf32>
    %cst_169 = arith.constant 0.000000e+00 : f32
    %617 = vector.broadcast %cst_169 : f32 to vector<17x32xf32>
    %c15_170 = arith.constant 15 : index
    %c0_171 = arith.constant 0 : index
    %c0_172 = arith.constant 0 : index
    %618 = vector.load %arg17[%c15_170, %c0_171, %c0_172] : memref<18x18x1xf32, #tpu.memory_space<vmem>>, vector<1x18x1xf32>
    %619 = vector.shape_cast %618 : vector<1x18x1xf32> to vector<18x1xf32>
    %620 = vector.extract_strided_slice %619 {offsets = [0, 0], sizes = [17, 1], strides = [1, 1]} : vector<18x1xf32> to vector<17x1xf32>
    %621 = vector.extract_strided_slice %7 {offsets = [0, 0], sizes = [1, 32], strides = [1, 1]} : vector<4x32xf32> to vector<1x32xf32>
    %622 = vector.broadcast %620 : vector<17x1xf32> to vector<17x32xf32>
    %623 = vector.broadcast %621 : vector<1x32xf32> to vector<17x32xf32>
    %624 = arith.mulf %622, %623 : vector<17x32xf32>
    %625 = arith.addf %617, %624 : vector<17x32xf32>
    %626 = vector.extract_strided_slice %619 {offsets = [1, 0], sizes = [17, 1], strides = [1, 1]} : vector<18x1xf32> to vector<17x1xf32>
    %627 = vector.extract_strided_slice %7 {offsets = [1, 0], sizes = [1, 32], strides = [1, 1]} : vector<4x32xf32> to vector<1x32xf32>
    %628 = vector.broadcast %626 : vector<17x1xf32> to vector<17x32xf32>
    %629 = vector.broadcast %627 : vector<1x32xf32> to vector<17x32xf32>
    %630 = arith.mulf %628, %629 : vector<17x32xf32>
    %631 = arith.addf %625, %630 : vector<17x32xf32>
    %c16 = arith.constant 16 : index
    %c0_173 = arith.constant 0 : index
    %c0_174 = arith.constant 0 : index
    %632 = vector.load %arg17[%c16, %c0_173, %c0_174] : memref<18x18x1xf32, #tpu.memory_space<vmem>>, vector<1x18x1xf32>
    %633 = vector.shape_cast %632 : vector<1x18x1xf32> to vector<18x1xf32>
    %634 = vector.extract_strided_slice %633 {offsets = [0, 0], sizes = [17, 1], strides = [1, 1]} : vector<18x1xf32> to vector<17x1xf32>
    %635 = vector.extract_strided_slice %7 {offsets = [2, 0], sizes = [1, 32], strides = [1, 1]} : vector<4x32xf32> to vector<1x32xf32>
    %636 = vector.broadcast %634 : vector<17x1xf32> to vector<17x32xf32>
    %637 = vector.broadcast %635 : vector<1x32xf32> to vector<17x32xf32>
    %638 = arith.mulf %636, %637 : vector<17x32xf32>
    %639 = arith.addf %631, %638 : vector<17x32xf32>
    %640 = vector.extract_strided_slice %633 {offsets = [1, 0], sizes = [17, 1], strides = [1, 1]} : vector<18x1xf32> to vector<17x1xf32>
    %641 = vector.extract_strided_slice %7 {offsets = [3, 0], sizes = [1, 32], strides = [1, 1]} : vector<4x32xf32> to vector<1x32xf32>
    %642 = vector.broadcast %640 : vector<17x1xf32> to vector<17x32xf32>
    %643 = vector.broadcast %641 : vector<1x32xf32> to vector<17x32xf32>
    %644 = arith.mulf %642, %643 : vector<17x32xf32>
    %645 = arith.addf %639, %644 : vector<17x32xf32>
    %646 = vector.broadcast %8 : vector<1x32xf32> to vector<17x32xf32>
    %647 = arith.mulf %645, %646 : vector<17x32xf32>
    %648 = vector.broadcast %9 : vector<1x32xf32> to vector<17x32xf32>
    %649 = arith.addf %647, %648 : vector<17x32xf32>
    %cst_175 = arith.constant 0.000000e+00 : f32
    %650 = vector.broadcast %cst_175 : f32 to vector<17x32xf32>
    %651 = arith.maximumf %649, %650 : vector<17x32xf32>
    %652 = arith.maximumf %616, %651 : vector<17x32xf32>
    %653 = vector.extract_strided_slice %652 {offsets = [0, 0], sizes = [16, 32], strides = [1, 1]} : vector<17x32xf32> to vector<16x32xf32>
    %654 = vector.extract_strided_slice %652 {offsets = [1, 0], sizes = [16, 32], strides = [1, 1]} : vector<17x32xf32> to vector<16x32xf32>
    %655 = arith.maximumf %653, %654 : vector<16x32xf32>
    %cst_176 = arith.constant dense<0.000000e+00> : vector<8x32xf32>
    %656 = tpu.matmul %18, %655, %cst_176 {dimension_numbers = #tpu.dot_dimension_numbers<[1], [0], [0], [1], [0, 0, 1, 1], [], []>} : vector<8x16xf32>, vector<16x32xf32>, vector<8x32xf32> -> vector<8x32xf32>
    %c8_177 = arith.constant 8 : index
    %c1_178 = arith.constant 1 : index
    %c0_179 = arith.constant 0 : index
    %657 = vector.load %arg18[%c8_177, %c1_178, %c0_179] : memref<10x10x32xf32, #tpu.memory_space<vmem>>, vector<1x8x32xf32>
    %658 = vector.shape_cast %657 : vector<1x8x32xf32> to vector<8x32xf32>
    %659 = vector.shape_cast %656 : vector<8x32xf32> to vector<1x8x32xf32>
    tpu.vector_store %arg18[%c8_177, %c1_178, %c0_179], %659 {strides = array<i32>} : memref<10x10x32xf32, #tpu.memory_space<vmem>>, vector<1x8x32xf32>,
    %cst_180 = arith.constant 0.000000e+00 : f32
    %660 = vector.broadcast %cst_180 : f32 to vector<9x64xf32>
    %c0_181 = arith.constant 0 : index
    %c0_182 = arith.constant 0 : index
    %c0_183 = arith.constant 0 : index
    %661 = vector.load %arg18[%c0_181, %c0_182, %c0_183] : memref<10x10x32xf32, #tpu.memory_space<vmem>>, vector<1x10x32xf32>
    %662 = vector.shape_cast %661 : vector<1x10x32xf32> to vector<10x32xf32>
    %663 = vector.extract_strided_slice %662 {offsets = [0, 0], sizes = [9, 32], strides = [1, 1]} : vector<10x32xf32> to vector<9x32xf32>
    %c0_184 = arith.constant 0 : index
    %c0_185 = arith.constant 0 : index
    %c0_186 = arith.constant 0 : index
    %664 = vector.load %arg6[%c0_184, %c0_185, %c0_186] : memref<4x32x64xf32, #tpu.memory_space<vmem>>, vector<1x32x64xf32>
    %665 = vector.shape_cast %664 : vector<1x32x64xf32> to vector<32x64xf32>
    %cst_187 = arith.constant dense<0.000000e+00> : vector<9x64xf32>
    %666 = tpu.matmul %663, %665, %cst_187 {dimension_numbers = #tpu.dot_dimension_numbers<[1], [0], [0], [1], [0, 0, 1, 1], [], []>} : vector<9x32xf32>, vector<32x64xf32>, vector<9x64xf32> -> vector<9x64xf32>
    %667 = arith.addf %660, %666 : vector<9x64xf32>
    %668 = vector.extract_strided_slice %662 {offsets = [1, 0], sizes = [9, 32], strides = [1, 1]} : vector<10x32xf32> to vector<9x32xf32>
    %c1_188 = arith.constant 1 : index
    %c0_189 = arith.constant 0 : index
    %c0_190 = arith.constant 0 : index
    %669 = vector.load %arg6[%c1_188, %c0_189, %c0_190] : memref<4x32x64xf32, #tpu.memory_space<vmem>>, vector<1x32x64xf32>
    %670 = vector.shape_cast %669 : vector<1x32x64xf32> to vector<32x64xf32>
    %cst_191 = arith.constant dense<0.000000e+00> : vector<9x64xf32>
    %671 = tpu.matmul %668, %670, %cst_191 {dimension_numbers = #tpu.dot_dimension_numbers<[1], [0], [0], [1], [0, 0, 1, 1], [], []>} : vector<9x32xf32>, vector<32x64xf32>, vector<9x64xf32> -> vector<9x64xf32>
    %672 = arith.addf %667, %671 : vector<9x64xf32>
    %c1_192 = arith.constant 1 : index
    %c0_193 = arith.constant 0 : index
    %c0_194 = arith.constant 0 : index
    %673 = vector.load %arg18[%c1_192, %c0_193, %c0_194] : memref<10x10x32xf32, #tpu.memory_space<vmem>>, vector<1x10x32xf32>
    %674 = vector.shape_cast %673 : vector<1x10x32xf32> to vector<10x32xf32>
    %675 = vector.extract_strided_slice %674 {offsets = [0, 0], sizes = [9, 32], strides = [1, 1]} : vector<10x32xf32> to vector<9x32xf32>
    %c2_195 = arith.constant 2 : index
    %c0_196 = arith.constant 0 : index
    %c0_197 = arith.constant 0 : index
    %676 = vector.load %arg6[%c2_195, %c0_196, %c0_197] : memref<4x32x64xf32, #tpu.memory_space<vmem>>, vector<1x32x64xf32>
    %677 = vector.shape_cast %676 : vector<1x32x64xf32> to vector<32x64xf32>
    %cst_198 = arith.constant dense<0.000000e+00> : vector<9x64xf32>
    %678 = tpu.matmul %675, %677, %cst_198 {dimension_numbers = #tpu.dot_dimension_numbers<[1], [0], [0], [1], [0, 0, 1, 1], [], []>} : vector<9x32xf32>, vector<32x64xf32>, vector<9x64xf32> -> vector<9x64xf32>
    %679 = arith.addf %672, %678 : vector<9x64xf32>
    %680 = vector.extract_strided_slice %674 {offsets = [1, 0], sizes = [9, 32], strides = [1, 1]} : vector<10x32xf32> to vector<9x32xf32>
    %c3_199 = arith.constant 3 : index
    %c0_200 = arith.constant 0 : index
    %c0_201 = arith.constant 0 : index
    %681 = vector.load %arg6[%c3_199, %c0_200, %c0_201] : memref<4x32x64xf32, #tpu.memory_space<vmem>>, vector<1x32x64xf32>
    %682 = vector.shape_cast %681 : vector<1x32x64xf32> to vector<32x64xf32>
    %cst_202 = arith.constant dense<0.000000e+00> : vector<9x64xf32>
    %683 = tpu.matmul %680, %682, %cst_202 {dimension_numbers = #tpu.dot_dimension_numbers<[1], [0], [0], [1], [0, 0, 1, 1], [], []>} : vector<9x32xf32>, vector<32x64xf32>, vector<9x64xf32> -> vector<9x64xf32>
    %684 = arith.addf %679, %683 : vector<9x64xf32>
    %685 = vector.broadcast %10 : vector<1x64xf32> to vector<9x64xf32>
    %686 = arith.mulf %684, %685 : vector<9x64xf32>
    %687 = vector.broadcast %11 : vector<1x64xf32> to vector<9x64xf32>
    %688 = arith.addf %686, %687 : vector<9x64xf32>
    %cst_203 = arith.constant 0.000000e+00 : f32
    %689 = vector.broadcast %cst_203 : f32 to vector<9x64xf32>
    %690 = arith.maximumf %688, %689 : vector<9x64xf32>
    %cst_204 = arith.constant 0.000000e+00 : f32
    %691 = vector.broadcast %cst_204 : f32 to vector<9x64xf32>
    %c1_205 = arith.constant 1 : index
    %c0_206 = arith.constant 0 : index
    %c0_207 = arith.constant 0 : index
    %692 = vector.load %arg18[%c1_205, %c0_206, %c0_207] : memref<10x10x32xf32, #tpu.memory_space<vmem>>, vector<1x10x32xf32>
    %693 = vector.shape_cast %692 : vector<1x10x32xf32> to vector<10x32xf32>
    %694 = vector.extract_strided_slice %693 {offsets = [0, 0], sizes = [9, 32], strides = [1, 1]} : vector<10x32xf32> to vector<9x32xf32>
    %c0_208 = arith.constant 0 : index
    %c0_209 = arith.constant 0 : index
    %c0_210 = arith.constant 0 : index
    %695 = vector.load %arg6[%c0_208, %c0_209, %c0_210] : memref<4x32x64xf32, #tpu.memory_space<vmem>>, vector<1x32x64xf32>
    %696 = vector.shape_cast %695 : vector<1x32x64xf32> to vector<32x64xf32>
    %cst_211 = arith.constant dense<0.000000e+00> : vector<9x64xf32>
    %697 = tpu.matmul %694, %696, %cst_211 {dimension_numbers = #tpu.dot_dimension_numbers<[1], [0], [0], [1], [0, 0, 1, 1], [], []>} : vector<9x32xf32>, vector<32x64xf32>, vector<9x64xf32> -> vector<9x64xf32>
    %698 = arith.addf %691, %697 : vector<9x64xf32>
    %699 = vector.extract_strided_slice %693 {offsets = [1, 0], sizes = [9, 32], strides = [1, 1]} : vector<10x32xf32> to vector<9x32xf32>
    %c1_212 = arith.constant 1 : index
    %c0_213 = arith.constant 0 : index
    %c0_214 = arith.constant 0 : index
    %700 = vector.load %arg6[%c1_212, %c0_213, %c0_214] : memref<4x32x64xf32, #tpu.memory_space<vmem>>, vector<1x32x64xf32>
    %701 = vector.shape_cast %700 : vector<1x32x64xf32> to vector<32x64xf32>
    %cst_215 = arith.constant dense<0.000000e+00> : vector<9x64xf32>
    %702 = tpu.matmul %699, %701, %cst_215 {dimension_numbers = #tpu.dot_dimension_numbers<[1], [0], [0], [1], [0, 0, 1, 1], [], []>} : vector<9x32xf32>, vector<32x64xf32>, vector<9x64xf32> -> vector<9x64xf32>
    %703 = arith.addf %698, %702 : vector<9x64xf32>
    %c2_216 = arith.constant 2 : index
    %c0_217 = arith.constant 0 : index
    %c0_218 = arith.constant 0 : index
    %704 = vector.load %arg18[%c2_216, %c0_217, %c0_218] : memref<10x10x32xf32, #tpu.memory_space<vmem>>, vector<1x10x32xf32>
    %705 = vector.shape_cast %704 : vector<1x10x32xf32> to vector<10x32xf32>
    %706 = vector.extract_strided_slice %705 {offsets = [0, 0], sizes = [9, 32], strides = [1, 1]} : vector<10x32xf32> to vector<9x32xf32>
    %c2_219 = arith.constant 2 : index
    %c0_220 = arith.constant 0 : index
    %c0_221 = arith.constant 0 : index
    %707 = vector.load %arg6[%c2_219, %c0_220, %c0_221] : memref<4x32x64xf32, #tpu.memory_space<vmem>>, vector<1x32x64xf32>
    %708 = vector.shape_cast %707 : vector<1x32x64xf32> to vector<32x64xf32>
    %cst_222 = arith.constant dense<0.000000e+00> : vector<9x64xf32>
    %709 = tpu.matmul %706, %708, %cst_222 {dimension_numbers = #tpu.dot_dimension_numbers<[1], [0], [0], [1], [0, 0, 1, 1], [], []>} : vector<9x32xf32>, vector<32x64xf32>, vector<9x64xf32> -> vector<9x64xf32>
    %710 = arith.addf %703, %709 : vector<9x64xf32>
    %711 = vector.extract_strided_slice %705 {offsets = [1, 0], sizes = [9, 32], strides = [1, 1]} : vector<10x32xf32> to vector<9x32xf32>
    %c3_223 = arith.constant 3 : index
    %c0_224 = arith.constant 0 : index
    %c0_225 = arith.constant 0 : index
    %712 = vector.load %arg6[%c3_223, %c0_224, %c0_225] : memref<4x32x64xf32, #tpu.memory_space<vmem>>, vector<1x32x64xf32>
    %713 = vector.shape_cast %712 : vector<1x32x64xf32> to vector<32x64xf32>
    %cst_226 = arith.constant dense<0.000000e+00> : vector<9x64xf32>
    %714 = tpu.matmul %711, %713, %cst_226 {dimension_numbers = #tpu.dot_dimension_numbers<[1], [0], [0], [1], [0, 0, 1, 1], [], []>} : vector<9x32xf32>, vector<32x64xf32>, vector<9x64xf32> -> vector<9x64xf32>
    %715 = arith.addf %710, %714 : vector<9x64xf32>
    %716 = vector.broadcast %10 : vector<1x64xf32> to vector<9x64xf32>
    %717 = arith.mulf %715, %716 : vector<9x64xf32>
    %718 = vector.broadcast %11 : vector<1x64xf32> to vector<9x64xf32>
    %719 = arith.addf %717, %718 : vector<9x64xf32>
    %cst_227 = arith.constant 0.000000e+00 : f32
    %720 = vector.broadcast %cst_227 : f32 to vector<9x64xf32>
    %721 = arith.maximumf %719, %720 : vector<9x64xf32>
    %722 = arith.maximumf %690, %721 : vector<9x64xf32>
    %723 = vector.extract_strided_slice %722 {offsets = [0, 0], sizes = [8, 64], strides = [1, 1]} : vector<9x64xf32> to vector<8x64xf32>
    %724 = vector.extract_strided_slice %722 {offsets = [1, 0], sizes = [8, 64], strides = [1, 1]} : vector<9x64xf32> to vector<8x64xf32>
    %725 = arith.maximumf %723, %724 : vector<8x64xf32>
    %cst_228 = arith.constant dense<0.000000e+00> : vector<4x64xf32>
    %726 = tpu.matmul %25, %725, %cst_228 {dimension_numbers = #tpu.dot_dimension_numbers<[1], [0], [0], [1], [0, 0, 1, 1], [], []>} : vector<4x8xf32>, vector<8x64xf32>, vector<4x64xf32> -> vector<4x64xf32>
    %727 = vector.extract_strided_slice %726 {offsets = [0, 0], sizes = [1, 64], strides = [1, 1]} : vector<4x64xf32> to vector<1x64xf32>
    %c0_229 = arith.constant 0 : index
    %c0_230 = arith.constant 0 : index
    %c0_231 = arith.constant 0 : index
    %c0_232 = arith.constant 0 : index
    %728 = vector.load %arg11[%c0_229, %c0_230, %c0_231, %c0_232] : memref<4x4x64x32xf32, #tpu.memory_space<vmem>>, vector<1x1x64x32xf32>
    %729 = vector.shape_cast %728 : vector<1x1x64x32xf32> to vector<64x32xf32>
    %cst_233 = arith.constant dense<0.000000e+00> : vector<1x32xf32>
    %730 = tpu.matmul %727, %729, %cst_233 {dimension_numbers = #tpu.dot_dimension_numbers<[1], [0], [0], [1], [0, 0, 1, 1], [], []>} : vector<1x64xf32>, vector<64x32xf32>, vector<1x32xf32> -> vector<1x32xf32>
    %731 = arith.addf %35, %730 : vector<1x32xf32>
    %732 = vector.extract_strided_slice %726 {offsets = [1, 0], sizes = [1, 64], strides = [1, 1]} : vector<4x64xf32> to vector<1x64xf32>
    %c0_234 = arith.constant 0 : index
    %c1_235 = arith.constant 1 : index
    %c0_236 = arith.constant 0 : index
    %c0_237 = arith.constant 0 : index
    %733 = vector.load %arg11[%c0_234, %c1_235, %c0_236, %c0_237] : memref<4x4x64x32xf32, #tpu.memory_space<vmem>>, vector<1x1x64x32xf32>
    %734 = vector.shape_cast %733 : vector<1x1x64x32xf32> to vector<64x32xf32>
    %cst_238 = arith.constant dense<0.000000e+00> : vector<1x32xf32>
    %735 = tpu.matmul %732, %734, %cst_238 {dimension_numbers = #tpu.dot_dimension_numbers<[1], [0], [0], [1], [0, 0, 1, 1], [], []>} : vector<1x64xf32>, vector<64x32xf32>, vector<1x32xf32> -> vector<1x32xf32>
    %736 = arith.addf %731, %735 : vector<1x32xf32>
    %737 = vector.extract_strided_slice %726 {offsets = [2, 0], sizes = [1, 64], strides = [1, 1]} : vector<4x64xf32> to vector<1x64xf32>
    %c0_239 = arith.constant 0 : index
    %c2_240 = arith.constant 2 : index
    %c0_241 = arith.constant 0 : index
    %c0_242 = arith.constant 0 : index
    %738 = vector.load %arg11[%c0_239, %c2_240, %c0_241, %c0_242] : memref<4x4x64x32xf32, #tpu.memory_space<vmem>>, vector<1x1x64x32xf32>
    %739 = vector.shape_cast %738 : vector<1x1x64x32xf32> to vector<64x32xf32>
    %cst_243 = arith.constant dense<0.000000e+00> : vector<1x32xf32>
    %740 = tpu.matmul %737, %739, %cst_243 {dimension_numbers = #tpu.dot_dimension_numbers<[1], [0], [0], [1], [0, 0, 1, 1], [], []>} : vector<1x64xf32>, vector<64x32xf32>, vector<1x32xf32> -> vector<1x32xf32>
    %741 = arith.addf %736, %740 : vector<1x32xf32>
    %742 = vector.extract_strided_slice %726 {offsets = [3, 0], sizes = [1, 64], strides = [1, 1]} : vector<4x64xf32> to vector<1x64xf32>
    %c0_244 = arith.constant 0 : index
    %c3_245 = arith.constant 3 : index
    %c0_246 = arith.constant 0 : index
    %c0_247 = arith.constant 0 : index
    %743 = vector.load %arg11[%c0_244, %c3_245, %c0_246, %c0_247] : memref<4x4x64x32xf32, #tpu.memory_space<vmem>>, vector<1x1x64x32xf32>
    %744 = vector.shape_cast %743 : vector<1x1x64x32xf32> to vector<64x32xf32>
    %cst_248 = arith.constant dense<0.000000e+00> : vector<1x32xf32>
    %745 = tpu.matmul %742, %744, %cst_248 {dimension_numbers = #tpu.dot_dimension_numbers<[1], [0], [0], [1], [0, 0, 1, 1], [], []>} : vector<1x64xf32>, vector<64x32xf32>, vector<1x32xf32> -> vector<1x32xf32>
    %746 = arith.addf %741, %745 : vector<1x32xf32>
    %cst_249 = arith.constant 0.000000e+00 : f32
    %747 = vector.broadcast %cst_249 : f32 to vector<9x64xf32>
    %c2_250 = arith.constant 2 : index
    %c0_251 = arith.constant 0 : index
    %c0_252 = arith.constant 0 : index
    %748 = vector.load %arg18[%c2_250, %c0_251, %c0_252] : memref<10x10x32xf32, #tpu.memory_space<vmem>>, vector<1x10x32xf32>
    %749 = vector.shape_cast %748 : vector<1x10x32xf32> to vector<10x32xf32>
    %750 = vector.extract_strided_slice %749 {offsets = [0, 0], sizes = [9, 32], strides = [1, 1]} : vector<10x32xf32> to vector<9x32xf32>
    %c0_253 = arith.constant 0 : index
    %c0_254 = arith.constant 0 : index
    %c0_255 = arith.constant 0 : index
    %751 = vector.load %arg6[%c0_253, %c0_254, %c0_255] : memref<4x32x64xf32, #tpu.memory_space<vmem>>, vector<1x32x64xf32>
    %752 = vector.shape_cast %751 : vector<1x32x64xf32> to vector<32x64xf32>
    %cst_256 = arith.constant dense<0.000000e+00> : vector<9x64xf32>
    %753 = tpu.matmul %750, %752, %cst_256 {dimension_numbers = #tpu.dot_dimension_numbers<[1], [0], [0], [1], [0, 0, 1, 1], [], []>} : vector<9x32xf32>, vector<32x64xf32>, vector<9x64xf32> -> vector<9x64xf32>
    %754 = arith.addf %747, %753 : vector<9x64xf32>
    %755 = vector.extract_strided_slice %749 {offsets = [1, 0], sizes = [9, 32], strides = [1, 1]} : vector<10x32xf32> to vector<9x32xf32>
    %c1_257 = arith.constant 1 : index
    %c0_258 = arith.constant 0 : index
    %c0_259 = arith.constant 0 : index
    %756 = vector.load %arg6[%c1_257, %c0_258, %c0_259] : memref<4x32x64xf32, #tpu.memory_space<vmem>>, vector<1x32x64xf32>
    %757 = vector.shape_cast %756 : vector<1x32x64xf32> to vector<32x64xf32>
    %cst_260 = arith.constant dense<0.000000e+00> : vector<9x64xf32>
    %758 = tpu.matmul %755, %757, %cst_260 {dimension_numbers = #tpu.dot_dimension_numbers<[1], [0], [0], [1], [0, 0, 1, 1], [], []>} : vector<9x32xf32>, vector<32x64xf32>, vector<9x64xf32> -> vector<9x64xf32>
    %759 = arith.addf %754, %758 : vector<9x64xf32>
    %c3_261 = arith.constant 3 : index
    %c0_262 = arith.constant 0 : index
    %c0_263 = arith.constant 0 : index
    %760 = vector.load %arg18[%c3_261, %c0_262, %c0_263] : memref<10x10x32xf32, #tpu.memory_space<vmem>>, vector<1x10x32xf32>
    %761 = vector.shape_cast %760 : vector<1x10x32xf32> to vector<10x32xf32>
    %762 = vector.extract_strided_slice %761 {offsets = [0, 0], sizes = [9, 32], strides = [1, 1]} : vector<10x32xf32> to vector<9x32xf32>
    %c2_264 = arith.constant 2 : index
    %c0_265 = arith.constant 0 : index
    %c0_266 = arith.constant 0 : index
    %763 = vector.load %arg6[%c2_264, %c0_265, %c0_266] : memref<4x32x64xf32, #tpu.memory_space<vmem>>, vector<1x32x64xf32>
    %764 = vector.shape_cast %763 : vector<1x32x64xf32> to vector<32x64xf32>
    %cst_267 = arith.constant dense<0.000000e+00> : vector<9x64xf32>
    %765 = tpu.matmul %762, %764, %cst_267 {dimension_numbers = #tpu.dot_dimension_numbers<[1], [0], [0], [1], [0, 0, 1, 1], [], []>} : vector<9x32xf32>, vector<32x64xf32>, vector<9x64xf32> -> vector<9x64xf32>
    %766 = arith.addf %759, %765 : vector<9x64xf32>
    %767 = vector.extract_strided_slice %761 {offsets = [1, 0], sizes = [9, 32], strides = [1, 1]} : vector<10x32xf32> to vector<9x32xf32>
    %c3_268 = arith.constant 3 : index
    %c0_269 = arith.constant 0 : index
    %c0_270 = arith.constant 0 : index
    %768 = vector.load %arg6[%c3_268, %c0_269, %c0_270] : memref<4x32x64xf32, #tpu.memory_space<vmem>>, vector<1x32x64xf32>
    %769 = vector.shape_cast %768 : vector<1x32x64xf32> to vector<32x64xf32>
    %cst_271 = arith.constant dense<0.000000e+00> : vector<9x64xf32>
    %770 = tpu.matmul %767, %769, %cst_271 {dimension_numbers = #tpu.dot_dimension_numbers<[1], [0], [0], [1], [0, 0, 1, 1], [], []>} : vector<9x32xf32>, vector<32x64xf32>, vector<9x64xf32> -> vector<9x64xf32>
    %771 = arith.addf %766, %770 : vector<9x64xf32>
    %772 = vector.broadcast %10 : vector<1x64xf32> to vector<9x64xf32>
    %773 = arith.mulf %771, %772 : vector<9x64xf32>
    %774 = vector.broadcast %11 : vector<1x64xf32> to vector<9x64xf32>
    %775 = arith.addf %773, %774 : vector<9x64xf32>
    %cst_272 = arith.constant 0.000000e+00 : f32
    %776 = vector.broadcast %cst_272 : f32 to vector<9x64xf32>
    %777 = arith.maximumf %775, %776 : vector<9x64xf32>
    %cst_273 = arith.constant 0.000000e+00 : f32
    %778 = vector.broadcast %cst_273 : f32 to vector<9x64xf32>
    %c3_274 = arith.constant 3 : index
    %c0_275 = arith.constant 0 : index
    %c0_276 = arith.constant 0 : index
    %779 = vector.load %arg18[%c3_274, %c0_275, %c0_276] : memref<10x10x32xf32, #tpu.memory_space<vmem>>, vector<1x10x32xf32>
    %780 = vector.shape_cast %779 : vector<1x10x32xf32> to vector<10x32xf32>
    %781 = vector.extract_strided_slice %780 {offsets = [0, 0], sizes = [9, 32], strides = [1, 1]} : vector<10x32xf32> to vector<9x32xf32>
    %c0_277 = arith.constant 0 : index
    %c0_278 = arith.constant 0 : index
    %c0_279 = arith.constant 0 : index
    %782 = vector.load %arg6[%c0_277, %c0_278, %c0_279] : memref<4x32x64xf32, #tpu.memory_space<vmem>>, vector<1x32x64xf32>
    %783 = vector.shape_cast %782 : vector<1x32x64xf32> to vector<32x64xf32>
    %cst_280 = arith.constant dense<0.000000e+00> : vector<9x64xf32>
    %784 = tpu.matmul %781, %783, %cst_280 {dimension_numbers = #tpu.dot_dimension_numbers<[1], [0], [0], [1], [0, 0, 1, 1], [], []>} : vector<9x32xf32>, vector<32x64xf32>, vector<9x64xf32> -> vector<9x64xf32>
    %785 = arith.addf %778, %784 : vector<9x64xf32>
    %786 = vector.extract_strided_slice %780 {offsets = [1, 0], sizes = [9, 32], strides = [1, 1]} : vector<10x32xf32> to vector<9x32xf32>
    %c1_281 = arith.constant 1 : index
    %c0_282 = arith.constant 0 : index
    %c0_283 = arith.constant 0 : index
    %787 = vector.load %arg6[%c1_281, %c0_282, %c0_283] : memref<4x32x64xf32, #tpu.memory_space<vmem>>, vector<1x32x64xf32>
    %788 = vector.shape_cast %787 : vector<1x32x64xf32> to vector<32x64xf32>
    %cst_284 = arith.constant dense<0.000000e+00> : vector<9x64xf32>
    %789 = tpu.matmul %786, %788, %cst_284 {dimension_numbers = #tpu.dot_dimension_numbers<[1], [0], [0], [1], [0, 0, 1, 1], [], []>} : vector<9x32xf32>, vector<32x64xf32>, vector<9x64xf32> -> vector<9x64xf32>
    %790 = arith.addf %785, %789 : vector<9x64xf32>
    %c4_285 = arith.constant 4 : index
    %c0_286 = arith.constant 0 : index
    %c0_287 = arith.constant 0 : index
    %791 = vector.load %arg18[%c4_285, %c0_286, %c0_287] : memref<10x10x32xf32, #tpu.memory_space<vmem>>, vector<1x10x32xf32>
    %792 = vector.shape_cast %791 : vector<1x10x32xf32> to vector<10x32xf32>
    %793 = vector.extract_strided_slice %792 {offsets = [0, 0], sizes = [9, 32], strides = [1, 1]} : vector<10x32xf32> to vector<9x32xf32>
    %c2_288 = arith.constant 2 : index
    %c0_289 = arith.constant 0 : index
    %c0_290 = arith.constant 0 : index
    %794 = vector.load %arg6[%c2_288, %c0_289, %c0_290] : memref<4x32x64xf32, #tpu.memory_space<vmem>>, vector<1x32x64xf32>
    %795 = vector.shape_cast %794 : vector<1x32x64xf32> to vector<32x64xf32>
    %cst_291 = arith.constant dense<0.000000e+00> : vector<9x64xf32>
    %796 = tpu.matmul %793, %795, %cst_291 {dimension_numbers = #tpu.dot_dimension_numbers<[1], [0], [0], [1], [0, 0, 1, 1], [], []>} : vector<9x32xf32>, vector<32x64xf32>, vector<9x64xf32> -> vector<9x64xf32>
    %797 = arith.addf %790, %796 : vector<9x64xf32>
    %798 = vector.extract_strided_slice %792 {offsets = [1, 0], sizes = [9, 32], strides = [1, 1]} : vector<10x32xf32> to vector<9x32xf32>
    %c3_292 = arith.constant 3 : index
    %c0_293 = arith.constant 0 : index
    %c0_294 = arith.constant 0 : index
    %799 = vector.load %arg6[%c3_292, %c0_293, %c0_294] : memref<4x32x64xf32, #tpu.memory_space<vmem>>, vector<1x32x64xf32>
    %800 = vector.shape_cast %799 : vector<1x32x64xf32> to vector<32x64xf32>
    %cst_295 = arith.constant dense<0.000000e+00> : vector<9x64xf32>
    %801 = tpu.matmul %798, %800, %cst_295 {dimension_numbers = #tpu.dot_dimension_numbers<[1], [0], [0], [1], [0, 0, 1, 1], [], []>} : vector<9x32xf32>, vector<32x64xf32>, vector<9x64xf32> -> vector<9x64xf32>
    %802 = arith.addf %797, %801 : vector<9x64xf32>
    %803 = vector.broadcast %10 : vector<1x64xf32> to vector<9x64xf32>
    %804 = arith.mulf %802, %803 : vector<9x64xf32>
    %805 = vector.broadcast %11 : vector<1x64xf32> to vector<9x64xf32>
    %806 = arith.addf %804, %805 : vector<9x64xf32>
    %cst_296 = arith.constant 0.000000e+00 : f32
    %807 = vector.broadcast %cst_296 : f32 to vector<9x64xf32>
    %808 = arith.maximumf %806, %807 : vector<9x64xf32>
    %809 = arith.maximumf %777, %808 : vector<9x64xf32>
    %810 = vector.extract_strided_slice %809 {offsets = [0, 0], sizes = [8, 64], strides = [1, 1]} : vector<9x64xf32> to vector<8x64xf32>
    %811 = vector.extract_strided_slice %809 {offsets = [1, 0], sizes = [8, 64], strides = [1, 1]} : vector<9x64xf32> to vector<8x64xf32>
    %812 = arith.maximumf %810, %811 : vector<8x64xf32>
    %cst_297 = arith.constant dense<0.000000e+00> : vector<4x64xf32>
    %813 = tpu.matmul %25, %812, %cst_297 {dimension_numbers = #tpu.dot_dimension_numbers<[1], [0], [0], [1], [0, 0, 1, 1], [], []>} : vector<4x8xf32>, vector<8x64xf32>, vector<4x64xf32> -> vector<4x64xf32>
    %814 = vector.extract_strided_slice %813 {offsets = [0, 0], sizes = [1, 64], strides = [1, 1]} : vector<4x64xf32> to vector<1x64xf32>
    %c1_298 = arith.constant 1 : index
    %c0_299 = arith.constant 0 : index
    %c0_300 = arith.constant 0 : index
    %c0_301 = arith.constant 0 : index
    %815 = vector.load %arg11[%c1_298, %c0_299, %c0_300, %c0_301] : memref<4x4x64x32xf32, #tpu.memory_space<vmem>>, vector<1x1x64x32xf32>
    %816 = vector.shape_cast %815 : vector<1x1x64x32xf32> to vector<64x32xf32>
    %cst_302 = arith.constant dense<0.000000e+00> : vector<1x32xf32>
    %817 = tpu.matmul %814, %816, %cst_302 {dimension_numbers = #tpu.dot_dimension_numbers<[1], [0], [0], [1], [0, 0, 1, 1], [], []>} : vector<1x64xf32>, vector<64x32xf32>, vector<1x32xf32> -> vector<1x32xf32>
    %818 = arith.addf %746, %817 : vector<1x32xf32>
    %819 = vector.extract_strided_slice %813 {offsets = [1, 0], sizes = [1, 64], strides = [1, 1]} : vector<4x64xf32> to vector<1x64xf32>
    %c1_303 = arith.constant 1 : index
    %c1_304 = arith.constant 1 : index
    %c0_305 = arith.constant 0 : index
    %c0_306 = arith.constant 0 : index
    %820 = vector.load %arg11[%c1_303, %c1_304, %c0_305, %c0_306] : memref<4x4x64x32xf32, #tpu.memory_space<vmem>>, vector<1x1x64x32xf32>
    %821 = vector.shape_cast %820 : vector<1x1x64x32xf32> to vector<64x32xf32>
    %cst_307 = arith.constant dense<0.000000e+00> : vector<1x32xf32>
    %822 = tpu.matmul %819, %821, %cst_307 {dimension_numbers = #tpu.dot_dimension_numbers<[1], [0], [0], [1], [0, 0, 1, 1], [], []>} : vector<1x64xf32>, vector<64x32xf32>, vector<1x32xf32> -> vector<1x32xf32>
    %823 = arith.addf %818, %822 : vector<1x32xf32>
    %824 = vector.extract_strided_slice %813 {offsets = [2, 0], sizes = [1, 64], strides = [1, 1]} : vector<4x64xf32> to vector<1x64xf32>
    %c1_308 = arith.constant 1 : index
    %c2_309 = arith.constant 2 : index
    %c0_310 = arith.constant 0 : index
    %c0_311 = arith.constant 0 : index
    %825 = vector.load %arg11[%c1_308, %c2_309, %c0_310, %c0_311] : memref<4x4x64x32xf32, #tpu.memory_space<vmem>>, vector<1x1x64x32xf32>
    %826 = vector.shape_cast %825 : vector<1x1x64x32xf32> to vector<64x32xf32>
    %cst_312 = arith.constant dense<0.000000e+00> : vector<1x32xf32>
    %827 = tpu.matmul %824, %826, %cst_312 {dimension_numbers = #tpu.dot_dimension_numbers<[1], [0], [0], [1], [0, 0, 1, 1], [], []>} : vector<1x64xf32>, vector<64x32xf32>, vector<1x32xf32> -> vector<1x32xf32>
    %828 = arith.addf %823, %827 : vector<1x32xf32>
    %829 = vector.extract_strided_slice %813 {offsets = [3, 0], sizes = [1, 64], strides = [1, 1]} : vector<4x64xf32> to vector<1x64xf32>
    %c1_313 = arith.constant 1 : index
    %c3_314 = arith.constant 3 : index
    %c0_315 = arith.constant 0 : index
    %c0_316 = arith.constant 0 : index
    %830 = vector.load %arg11[%c1_313, %c3_314, %c0_315, %c0_316] : memref<4x4x64x32xf32, #tpu.memory_space<vmem>>, vector<1x1x64x32xf32>
    %831 = vector.shape_cast %830 : vector<1x1x64x32xf32> to vector<64x32xf32>
    %cst_317 = arith.constant dense<0.000000e+00> : vector<1x32xf32>
    %832 = tpu.matmul %829, %831, %cst_317 {dimension_numbers = #tpu.dot_dimension_numbers<[1], [0], [0], [1], [0, 0, 1, 1], [], []>} : vector<1x64xf32>, vector<64x32xf32>, vector<1x32xf32> -> vector<1x32xf32>
    %833 = arith.addf %828, %832 : vector<1x32xf32>
    %cst_318 = arith.constant 0.000000e+00 : f32
    %834 = vector.broadcast %cst_318 : f32 to vector<9x64xf32>
    %c4_319 = arith.constant 4 : index
    %c0_320 = arith.constant 0 : index
    %c0_321 = arith.constant 0 : index
    %835 = vector.load %arg18[%c4_319, %c0_320, %c0_321] : memref<10x10x32xf32, #tpu.memory_space<vmem>>, vector<1x10x32xf32>
    %836 = vector.shape_cast %835 : vector<1x10x32xf32> to vector<10x32xf32>
    %837 = vector.extract_strided_slice %836 {offsets = [0, 0], sizes = [9, 32], strides = [1, 1]} : vector<10x32xf32> to vector<9x32xf32>
    %c0_322 = arith.constant 0 : index
    %c0_323 = arith.constant 0 : index
    %c0_324 = arith.constant 0 : index
    %838 = vector.load %arg6[%c0_322, %c0_323, %c0_324] : memref<4x32x64xf32, #tpu.memory_space<vmem>>, vector<1x32x64xf32>
    %839 = vector.shape_cast %838 : vector<1x32x64xf32> to vector<32x64xf32>
    %cst_325 = arith.constant dense<0.000000e+00> : vector<9x64xf32>
    %840 = tpu.matmul %837, %839, %cst_325 {dimension_numbers = #tpu.dot_dimension_numbers<[1], [0], [0], [1], [0, 0, 1, 1], [], []>} : vector<9x32xf32>, vector<32x64xf32>, vector<9x64xf32> -> vector<9x64xf32>
    %841 = arith.addf %834, %840 : vector<9x64xf32>
    %842 = vector.extract_strided_slice %836 {offsets = [1, 0], sizes = [9, 32], strides = [1, 1]} : vector<10x32xf32> to vector<9x32xf32>
    %c1_326 = arith.constant 1 : index
    %c0_327 = arith.constant 0 : index
    %c0_328 = arith.constant 0 : index
    %843 = vector.load %arg6[%c1_326, %c0_327, %c0_328] : memref<4x32x64xf32, #tpu.memory_space<vmem>>, vector<1x32x64xf32>
    %844 = vector.shape_cast %843 : vector<1x32x64xf32> to vector<32x64xf32>
    %cst_329 = arith.constant dense<0.000000e+00> : vector<9x64xf32>
    %845 = tpu.matmul %842, %844, %cst_329 {dimension_numbers = #tpu.dot_dimension_numbers<[1], [0], [0], [1], [0, 0, 1, 1], [], []>} : vector<9x32xf32>, vector<32x64xf32>, vector<9x64xf32> -> vector<9x64xf32>
    %846 = arith.addf %841, %845 : vector<9x64xf32>
    %c5_330 = arith.constant 5 : index
    %c0_331 = arith.constant 0 : index
    %c0_332 = arith.constant 0 : index
    %847 = vector.load %arg18[%c5_330, %c0_331, %c0_332] : memref<10x10x32xf32, #tpu.memory_space<vmem>>, vector<1x10x32xf32>
    %848 = vector.shape_cast %847 : vector<1x10x32xf32> to vector<10x32xf32>
    %849 = vector.extract_strided_slice %848 {offsets = [0, 0], sizes = [9, 32], strides = [1, 1]} : vector<10x32xf32> to vector<9x32xf32>
    %c2_333 = arith.constant 2 : index
    %c0_334 = arith.constant 0 : index
    %c0_335 = arith.constant 0 : index
    %850 = vector.load %arg6[%c2_333, %c0_334, %c0_335] : memref<4x32x64xf32, #tpu.memory_space<vmem>>, vector<1x32x64xf32>
    %851 = vector.shape_cast %850 : vector<1x32x64xf32> to vector<32x64xf32>
    %cst_336 = arith.constant dense<0.000000e+00> : vector<9x64xf32>
    %852 = tpu.matmul %849, %851, %cst_336 {dimension_numbers = #tpu.dot_dimension_numbers<[1], [0], [0], [1], [0, 0, 1, 1], [], []>} : vector<9x32xf32>, vector<32x64xf32>, vector<9x64xf32> -> vector<9x64xf32>
    %853 = arith.addf %846, %852 : vector<9x64xf32>
    %854 = vector.extract_strided_slice %848 {offsets = [1, 0], sizes = [9, 32], strides = [1, 1]} : vector<10x32xf32> to vector<9x32xf32>
    %c3_337 = arith.constant 3 : index
    %c0_338 = arith.constant 0 : index
    %c0_339 = arith.constant 0 : index
    %855 = vector.load %arg6[%c3_337, %c0_338, %c0_339] : memref<4x32x64xf32, #tpu.memory_space<vmem>>, vector<1x32x64xf32>
    %856 = vector.shape_cast %855 : vector<1x32x64xf32> to vector<32x64xf32>
    %cst_340 = arith.constant dense<0.000000e+00> : vector<9x64xf32>
    %857 = tpu.matmul %854, %856, %cst_340 {dimension_numbers = #tpu.dot_dimension_numbers<[1], [0], [0], [1], [0, 0, 1, 1], [], []>} : vector<9x32xf32>, vector<32x64xf32>, vector<9x64xf32> -> vector<9x64xf32>
    %858 = arith.addf %853, %857 : vector<9x64xf32>
    %859 = vector.broadcast %10 : vector<1x64xf32> to vector<9x64xf32>
    %860 = arith.mulf %858, %859 : vector<9x64xf32>
    %861 = vector.broadcast %11 : vector<1x64xf32> to vector<9x64xf32>
    %862 = arith.addf %860, %861 : vector<9x64xf32>
    %cst_341 = arith.constant 0.000000e+00 : f32
    %863 = vector.broadcast %cst_341 : f32 to vector<9x64xf32>
    %864 = arith.maximumf %862, %863 : vector<9x64xf32>
    %cst_342 = arith.constant 0.000000e+00 : f32
    %865 = vector.broadcast %cst_342 : f32 to vector<9x64xf32>
    %c5_343 = arith.constant 5 : index
    %c0_344 = arith.constant 0 : index
    %c0_345 = arith.constant 0 : index
    %866 = vector.load %arg18[%c5_343, %c0_344, %c0_345] : memref<10x10x32xf32, #tpu.memory_space<vmem>>, vector<1x10x32xf32>
    %867 = vector.shape_cast %866 : vector<1x10x32xf32> to vector<10x32xf32>
    %868 = vector.extract_strided_slice %867 {offsets = [0, 0], sizes = [9, 32], strides = [1, 1]} : vector<10x32xf32> to vector<9x32xf32>
    %c0_346 = arith.constant 0 : index
    %c0_347 = arith.constant 0 : index
    %c0_348 = arith.constant 0 : index
    %869 = vector.load %arg6[%c0_346, %c0_347, %c0_348] : memref<4x32x64xf32, #tpu.memory_space<vmem>>, vector<1x32x64xf32>
    %870 = vector.shape_cast %869 : vector<1x32x64xf32> to vector<32x64xf32>
    %cst_349 = arith.constant dense<0.000000e+00> : vector<9x64xf32>
    %871 = tpu.matmul %868, %870, %cst_349 {dimension_numbers = #tpu.dot_dimension_numbers<[1], [0], [0], [1], [0, 0, 1, 1], [], []>} : vector<9x32xf32>, vector<32x64xf32>, vector<9x64xf32> -> vector<9x64xf32>
    %872 = arith.addf %865, %871 : vector<9x64xf32>
    %873 = vector.extract_strided_slice %867 {offsets = [1, 0], sizes = [9, 32], strides = [1, 1]} : vector<10x32xf32> to vector<9x32xf32>
    %c1_350 = arith.constant 1 : index
    %c0_351 = arith.constant 0 : index
    %c0_352 = arith.constant 0 : index
    %874 = vector.load %arg6[%c1_350, %c0_351, %c0_352] : memref<4x32x64xf32, #tpu.memory_space<vmem>>, vector<1x32x64xf32>
    %875 = vector.shape_cast %874 : vector<1x32x64xf32> to vector<32x64xf32>
    %cst_353 = arith.constant dense<0.000000e+00> : vector<9x64xf32>
    %876 = tpu.matmul %873, %875, %cst_353 {dimension_numbers = #tpu.dot_dimension_numbers<[1], [0], [0], [1], [0, 0, 1, 1], [], []>} : vector<9x32xf32>, vector<32x64xf32>, vector<9x64xf32> -> vector<9x64xf32>
    %877 = arith.addf %872, %876 : vector<9x64xf32>
    %c6_354 = arith.constant 6 : index
    %c0_355 = arith.constant 0 : index
    %c0_356 = arith.constant 0 : index
    %878 = vector.load %arg18[%c6_354, %c0_355, %c0_356] : memref<10x10x32xf32, #tpu.memory_space<vmem>>, vector<1x10x32xf32>
    %879 = vector.shape_cast %878 : vector<1x10x32xf32> to vector<10x32xf32>
    %880 = vector.extract_strided_slice %879 {offsets = [0, 0], sizes = [9, 32], strides = [1, 1]} : vector<10x32xf32> to vector<9x32xf32>
    %c2_357 = arith.constant 2 : index
    %c0_358 = arith.constant 0 : index
    %c0_359 = arith.constant 0 : index
    %881 = vector.load %arg6[%c2_357, %c0_358, %c0_359] : memref<4x32x64xf32, #tpu.memory_space<vmem>>, vector<1x32x64xf32>
    %882 = vector.shape_cast %881 : vector<1x32x64xf32> to vector<32x64xf32>
    %cst_360 = arith.constant dense<0.000000e+00> : vector<9x64xf32>
    %883 = tpu.matmul %880, %882, %cst_360 {dimension_numbers = #tpu.dot_dimension_numbers<[1], [0], [0], [1], [0, 0, 1, 1], [], []>} : vector<9x32xf32>, vector<32x64xf32>, vector<9x64xf32> -> vector<9x64xf32>
    %884 = arith.addf %877, %883 : vector<9x64xf32>
    %885 = vector.extract_strided_slice %879 {offsets = [1, 0], sizes = [9, 32], strides = [1, 1]} : vector<10x32xf32> to vector<9x32xf32>
    %c3_361 = arith.constant 3 : index
    %c0_362 = arith.constant 0 : index
    %c0_363 = arith.constant 0 : index
    %886 = vector.load %arg6[%c3_361, %c0_362, %c0_363] : memref<4x32x64xf32, #tpu.memory_space<vmem>>, vector<1x32x64xf32>
    %887 = vector.shape_cast %886 : vector<1x32x64xf32> to vector<32x64xf32>
    %cst_364 = arith.constant dense<0.000000e+00> : vector<9x64xf32>
    %888 = tpu.matmul %885, %887, %cst_364 {dimension_numbers = #tpu.dot_dimension_numbers<[1], [0], [0], [1], [0, 0, 1, 1], [], []>} : vector<9x32xf32>, vector<32x64xf32>, vector<9x64xf32> -> vector<9x64xf32>
    %889 = arith.addf %884, %888 : vector<9x64xf32>
    %890 = vector.broadcast %10 : vector<1x64xf32> to vector<9x64xf32>
    %891 = arith.mulf %889, %890 : vector<9x64xf32>
    %892 = vector.broadcast %11 : vector<1x64xf32> to vector<9x64xf32>
    %893 = arith.addf %891, %892 : vector<9x64xf32>
    %cst_365 = arith.constant 0.000000e+00 : f32
    %894 = vector.broadcast %cst_365 : f32 to vector<9x64xf32>
    %895 = arith.maximumf %893, %894 : vector<9x64xf32>
    %896 = arith.maximumf %864, %895 : vector<9x64xf32>
    %897 = vector.extract_strided_slice %896 {offsets = [0, 0], sizes = [8, 64], strides = [1, 1]} : vector<9x64xf32> to vector<8x64xf32>
    %898 = vector.extract_strided_slice %896 {offsets = [1, 0], sizes = [8, 64], strides = [1, 1]} : vector<9x64xf32> to vector<8x64xf32>
    %899 = arith.maximumf %897, %898 : vector<8x64xf32>
    %cst_366 = arith.constant dense<0.000000e+00> : vector<4x64xf32>
    %900 = tpu.matmul %25, %899, %cst_366 {dimension_numbers = #tpu.dot_dimension_numbers<[1], [0], [0], [1], [0, 0, 1, 1], [], []>} : vector<4x8xf32>, vector<8x64xf32>, vector<4x64xf32> -> vector<4x64xf32>
    %901 = vector.extract_strided_slice %900 {offsets = [0, 0], sizes = [1, 64], strides = [1, 1]} : vector<4x64xf32> to vector<1x64xf32>
    %c2_367 = arith.constant 2 : index
    %c0_368 = arith.constant 0 : index
    %c0_369 = arith.constant 0 : index
    %c0_370 = arith.constant 0 : index
    %902 = vector.load %arg11[%c2_367, %c0_368, %c0_369, %c0_370] : memref<4x4x64x32xf32, #tpu.memory_space<vmem>>, vector<1x1x64x32xf32>
    %903 = vector.shape_cast %902 : vector<1x1x64x32xf32> to vector<64x32xf32>
    %cst_371 = arith.constant dense<0.000000e+00> : vector<1x32xf32>
    %904 = tpu.matmul %901, %903, %cst_371 {dimension_numbers = #tpu.dot_dimension_numbers<[1], [0], [0], [1], [0, 0, 1, 1], [], []>} : vector<1x64xf32>, vector<64x32xf32>, vector<1x32xf32> -> vector<1x32xf32>
    %905 = arith.addf %833, %904 : vector<1x32xf32>
    %906 = vector.extract_strided_slice %900 {offsets = [1, 0], sizes = [1, 64], strides = [1, 1]} : vector<4x64xf32> to vector<1x64xf32>
    %c2_372 = arith.constant 2 : index
    %c1_373 = arith.constant 1 : index
    %c0_374 = arith.constant 0 : index
    %c0_375 = arith.constant 0 : index
    %907 = vector.load %arg11[%c2_372, %c1_373, %c0_374, %c0_375] : memref<4x4x64x32xf32, #tpu.memory_space<vmem>>, vector<1x1x64x32xf32>
    %908 = vector.shape_cast %907 : vector<1x1x64x32xf32> to vector<64x32xf32>
    %cst_376 = arith.constant dense<0.000000e+00> : vector<1x32xf32>
    %909 = tpu.matmul %906, %908, %cst_376 {dimension_numbers = #tpu.dot_dimension_numbers<[1], [0], [0], [1], [0, 0, 1, 1], [], []>} : vector<1x64xf32>, vector<64x32xf32>, vector<1x32xf32> -> vector<1x32xf32>
    %910 = arith.addf %905, %909 : vector<1x32xf32>
    %911 = vector.extract_strided_slice %900 {offsets = [2, 0], sizes = [1, 64], strides = [1, 1]} : vector<4x64xf32> to vector<1x64xf32>
    %c2_377 = arith.constant 2 : index
    %c2_378 = arith.constant 2 : index
    %c0_379 = arith.constant 0 : index
    %c0_380 = arith.constant 0 : index
    %912 = vector.load %arg11[%c2_377, %c2_378, %c0_379, %c0_380] : memref<4x4x64x32xf32, #tpu.memory_space<vmem>>, vector<1x1x64x32xf32>
    %913 = vector.shape_cast %912 : vector<1x1x64x32xf32> to vector<64x32xf32>
    %cst_381 = arith.constant dense<0.000000e+00> : vector<1x32xf32>
    %914 = tpu.matmul %911, %913, %cst_381 {dimension_numbers = #tpu.dot_dimension_numbers<[1], [0], [0], [1], [0, 0, 1, 1], [], []>} : vector<1x64xf32>, vector<64x32xf32>, vector<1x32xf32> -> vector<1x32xf32>
    %915 = arith.addf %910, %914 : vector<1x32xf32>
    %916 = vector.extract_strided_slice %900 {offsets = [3, 0], sizes = [1, 64], strides = [1, 1]} : vector<4x64xf32> to vector<1x64xf32>
    %c2_382 = arith.constant 2 : index
    %c3_383 = arith.constant 3 : index
    %c0_384 = arith.constant 0 : index
    %c0_385 = arith.constant 0 : index
    %917 = vector.load %arg11[%c2_382, %c3_383, %c0_384, %c0_385] : memref<4x4x64x32xf32, #tpu.memory_space<vmem>>, vector<1x1x64x32xf32>
    %918 = vector.shape_cast %917 : vector<1x1x64x32xf32> to vector<64x32xf32>
    %cst_386 = arith.constant dense<0.000000e+00> : vector<1x32xf32>
    %919 = tpu.matmul %916, %918, %cst_386 {dimension_numbers = #tpu.dot_dimension_numbers<[1], [0], [0], [1], [0, 0, 1, 1], [], []>} : vector<1x64xf32>, vector<64x32xf32>, vector<1x32xf32> -> vector<1x32xf32>
    %920 = arith.addf %915, %919 : vector<1x32xf32>
    %cst_387 = arith.constant 0.000000e+00 : f32
    %921 = vector.broadcast %cst_387 : f32 to vector<9x64xf32>
    %c6_388 = arith.constant 6 : index
    %c0_389 = arith.constant 0 : index
    %c0_390 = arith.constant 0 : index
    %922 = vector.load %arg18[%c6_388, %c0_389, %c0_390] : memref<10x10x32xf32, #tpu.memory_space<vmem>>, vector<1x10x32xf32>
    %923 = vector.shape_cast %922 : vector<1x10x32xf32> to vector<10x32xf32>
    %924 = vector.extract_strided_slice %923 {offsets = [0, 0], sizes = [9, 32], strides = [1, 1]} : vector<10x32xf32> to vector<9x32xf32>
    %c0_391 = arith.constant 0 : index
    %c0_392 = arith.constant 0 : index
    %c0_393 = arith.constant 0 : index
    %925 = vector.load %arg6[%c0_391, %c0_392, %c0_393] : memref<4x32x64xf32, #tpu.memory_space<vmem>>, vector<1x32x64xf32>
    %926 = vector.shape_cast %925 : vector<1x32x64xf32> to vector<32x64xf32>
    %cst_394 = arith.constant dense<0.000000e+00> : vector<9x64xf32>
    %927 = tpu.matmul %924, %926, %cst_394 {dimension_numbers = #tpu.dot_dimension_numbers<[1], [0], [0], [1], [0, 0, 1, 1], [], []>} : vector<9x32xf32>, vector<32x64xf32>, vector<9x64xf32> -> vector<9x64xf32>
    %928 = arith.addf %921, %927 : vector<9x64xf32>
    %929 = vector.extract_strided_slice %923 {offsets = [1, 0], sizes = [9, 32], strides = [1, 1]} : vector<10x32xf32> to vector<9x32xf32>
    %c1_395 = arith.constant 1 : index
    %c0_396 = arith.constant 0 : index
    %c0_397 = arith.constant 0 : index
    %930 = vector.load %arg6[%c1_395, %c0_396, %c0_397] : memref<4x32x64xf32, #tpu.memory_space<vmem>>, vector<1x32x64xf32>
    %931 = vector.shape_cast %930 : vector<1x32x64xf32> to vector<32x64xf32>
    %cst_398 = arith.constant dense<0.000000e+00> : vector<9x64xf32>
    %932 = tpu.matmul %929, %931, %cst_398 {dimension_numbers = #tpu.dot_dimension_numbers<[1], [0], [0], [1], [0, 0, 1, 1], [], []>} : vector<9x32xf32>, vector<32x64xf32>, vector<9x64xf32> -> vector<9x64xf32>
    %933 = arith.addf %928, %932 : vector<9x64xf32>
    %c7_399 = arith.constant 7 : index
    %c0_400 = arith.constant 0 : index
    %c0_401 = arith.constant 0 : index
    %934 = vector.load %arg18[%c7_399, %c0_400, %c0_401] : memref<10x10x32xf32, #tpu.memory_space<vmem>>, vector<1x10x32xf32>
    %935 = vector.shape_cast %934 : vector<1x10x32xf32> to vector<10x32xf32>
    %936 = vector.extract_strided_slice %935 {offsets = [0, 0], sizes = [9, 32], strides = [1, 1]} : vector<10x32xf32> to vector<9x32xf32>
    %c2_402 = arith.constant 2 : index
    %c0_403 = arith.constant 0 : index
    %c0_404 = arith.constant 0 : index
    %937 = vector.load %arg6[%c2_402, %c0_403, %c0_404] : memref<4x32x64xf32, #tpu.memory_space<vmem>>, vector<1x32x64xf32>
    %938 = vector.shape_cast %937 : vector<1x32x64xf32> to vector<32x64xf32>
    %cst_405 = arith.constant dense<0.000000e+00> : vector<9x64xf32>
    %939 = tpu.matmul %936, %938, %cst_405 {dimension_numbers = #tpu.dot_dimension_numbers<[1], [0], [0], [1], [0, 0, 1, 1], [], []>} : vector<9x32xf32>, vector<32x64xf32>, vector<9x64xf32> -> vector<9x64xf32>
    %940 = arith.addf %933, %939 : vector<9x64xf32>
    %941 = vector.extract_strided_slice %935 {offsets = [1, 0], sizes = [9, 32], strides = [1, 1]} : vector<10x32xf32> to vector<9x32xf32>
    %c3_406 = arith.constant 3 : index
    %c0_407 = arith.constant 0 : index
    %c0_408 = arith.constant 0 : index
    %942 = vector.load %arg6[%c3_406, %c0_407, %c0_408] : memref<4x32x64xf32, #tpu.memory_space<vmem>>, vector<1x32x64xf32>
    %943 = vector.shape_cast %942 : vector<1x32x64xf32> to vector<32x64xf32>
    %cst_409 = arith.constant dense<0.000000e+00> : vector<9x64xf32>
    %944 = tpu.matmul %941, %943, %cst_409 {dimension_numbers = #tpu.dot_dimension_numbers<[1], [0], [0], [1], [0, 0, 1, 1], [], []>} : vector<9x32xf32>, vector<32x64xf32>, vector<9x64xf32> -> vector<9x64xf32>
    %945 = arith.addf %940, %944 : vector<9x64xf32>
    %946 = vector.broadcast %10 : vector<1x64xf32> to vector<9x64xf32>
    %947 = arith.mulf %945, %946 : vector<9x64xf32>
    %948 = vector.broadcast %11 : vector<1x64xf32> to vector<9x64xf32>
    %949 = arith.addf %947, %948 : vector<9x64xf32>
    %cst_410 = arith.constant 0.000000e+00 : f32
    %950 = vector.broadcast %cst_410 : f32 to vector<9x64xf32>
    %951 = arith.maximumf %949, %950 : vector<9x64xf32>
    %cst_411 = arith.constant 0.000000e+00 : f32
    %952 = vector.broadcast %cst_411 : f32 to vector<9x64xf32>
    %c7_412 = arith.constant 7 : index
    %c0_413 = arith.constant 0 : index
    %c0_414 = arith.constant 0 : index
    %953 = vector.load %arg18[%c7_412, %c0_413, %c0_414] : memref<10x10x32xf32, #tpu.memory_space<vmem>>, vector<1x10x32xf32>
    %954 = vector.shape_cast %953 : vector<1x10x32xf32> to vector<10x32xf32>
    %955 = vector.extract_strided_slice %954 {offsets = [0, 0], sizes = [9, 32], strides = [1, 1]} : vector<10x32xf32> to vector<9x32xf32>
    %c0_415 = arith.constant 0 : index
    %c0_416 = arith.constant 0 : index
    %c0_417 = arith.constant 0 : index
    %956 = vector.load %arg6[%c0_415, %c0_416, %c0_417] : memref<4x32x64xf32, #tpu.memory_space<vmem>>, vector<1x32x64xf32>
    %957 = vector.shape_cast %956 : vector<1x32x64xf32> to vector<32x64xf32>
    %cst_418 = arith.constant dense<0.000000e+00> : vector<9x64xf32>
    %958 = tpu.matmul %955, %957, %cst_418 {dimension_numbers = #tpu.dot_dimension_numbers<[1], [0], [0], [1], [0, 0, 1, 1], [], []>} : vector<9x32xf32>, vector<32x64xf32>, vector<9x64xf32> -> vector<9x64xf32>
    %959 = arith.addf %952, %958 : vector<9x64xf32>
    %960 = vector.extract_strided_slice %954 {offsets = [1, 0], sizes = [9, 32], strides = [1, 1]} : vector<10x32xf32> to vector<9x32xf32>
    %c1_419 = arith.constant 1 : index
    %c0_420 = arith.constant 0 : index
    %c0_421 = arith.constant 0 : index
    %961 = vector.load %arg6[%c1_419, %c0_420, %c0_421] : memref<4x32x64xf32, #tpu.memory_space<vmem>>, vector<1x32x64xf32>
    %962 = vector.shape_cast %961 : vector<1x32x64xf32> to vector<32x64xf32>
    %cst_422 = arith.constant dense<0.000000e+00> : vector<9x64xf32>
    %963 = tpu.matmul %960, %962, %cst_422 {dimension_numbers = #tpu.dot_dimension_numbers<[1], [0], [0], [1], [0, 0, 1, 1], [], []>} : vector<9x32xf32>, vector<32x64xf32>, vector<9x64xf32> -> vector<9x64xf32>
    %964 = arith.addf %959, %963 : vector<9x64xf32>
    %c8_423 = arith.constant 8 : index
    %c0_424 = arith.constant 0 : index
    %c0_425 = arith.constant 0 : index
    %965 = vector.load %arg18[%c8_423, %c0_424, %c0_425] : memref<10x10x32xf32, #tpu.memory_space<vmem>>, vector<1x10x32xf32>
    %966 = vector.shape_cast %965 : vector<1x10x32xf32> to vector<10x32xf32>
    %967 = vector.extract_strided_slice %966 {offsets = [0, 0], sizes = [9, 32], strides = [1, 1]} : vector<10x32xf32> to vector<9x32xf32>
    %c2_426 = arith.constant 2 : index
    %c0_427 = arith.constant 0 : index
    %c0_428 = arith.constant 0 : index
    %968 = vector.load %arg6[%c2_426, %c0_427, %c0_428] : memref<4x32x64xf32, #tpu.memory_space<vmem>>, vector<1x32x64xf32>
    %969 = vector.shape_cast %968 : vector<1x32x64xf32> to vector<32x64xf32>
    %cst_429 = arith.constant dense<0.000000e+00> : vector<9x64xf32>
    %970 = tpu.matmul %967, %969, %cst_429 {dimension_numbers = #tpu.dot_dimension_numbers<[1], [0], [0], [1], [0, 0, 1, 1], [], []>} : vector<9x32xf32>, vector<32x64xf32>, vector<9x64xf32> -> vector<9x64xf32>
    %971 = arith.addf %964, %970 : vector<9x64xf32>
    %972 = vector.extract_strided_slice %966 {offsets = [1, 0], sizes = [9, 32], strides = [1, 1]} : vector<10x32xf32> to vector<9x32xf32>
    %c3_430 = arith.constant 3 : index
    %c0_431 = arith.constant 0 : index
    %c0_432 = arith.constant 0 : index
    %973 = vector.load %arg6[%c3_430, %c0_431, %c0_432] : memref<4x32x64xf32, #tpu.memory_space<vmem>>, vector<1x32x64xf32>
    %974 = vector.shape_cast %973 : vector<1x32x64xf32> to vector<32x64xf32>
    %cst_433 = arith.constant dense<0.000000e+00> : vector<9x64xf32>
    %975 = tpu.matmul %972, %974, %cst_433 {dimension_numbers = #tpu.dot_dimension_numbers<[1], [0], [0], [1], [0, 0, 1, 1], [], []>} : vector<9x32xf32>, vector<32x64xf32>, vector<9x64xf32> -> vector<9x64xf32>
    %976 = arith.addf %971, %975 : vector<9x64xf32>
    %977 = vector.broadcast %10 : vector<1x64xf32> to vector<9x64xf32>
    %978 = arith.mulf %976, %977 : vector<9x64xf32>
    %979 = vector.broadcast %11 : vector<1x64xf32> to vector<9x64xf32>
    %980 = arith.addf %978, %979 : vector<9x64xf32>
    %cst_434 = arith.constant 0.000000e+00 : f32
    %981 = vector.broadcast %cst_434 : f32 to vector<9x64xf32>
    %982 = arith.maximumf %980, %981 : vector<9x64xf32>
    %983 = arith.maximumf %951, %982 : vector<9x64xf32>
    %984 = vector.extract_strided_slice %983 {offsets = [0, 0], sizes = [8, 64], strides = [1, 1]} : vector<9x64xf32> to vector<8x64xf32>
    %985 = vector.extract_strided_slice %983 {offsets = [1, 0], sizes = [8, 64], strides = [1, 1]} : vector<9x64xf32> to vector<8x64xf32>
    %986 = arith.maximumf %984, %985 : vector<8x64xf32>
    %cst_435 = arith.constant dense<0.000000e+00> : vector<4x64xf32>
    %987 = tpu.matmul %25, %986, %cst_435 {dimension_numbers = #tpu.dot_dimension_numbers<[1], [0], [0], [1], [0, 0, 1, 1], [], []>} : vector<4x8xf32>, vector<8x64xf32>, vector<4x64xf32> -> vector<4x64xf32>
    %988 = vector.extract_strided_slice %987 {offsets = [0, 0], sizes = [1, 64], strides = [1, 1]} : vector<4x64xf32> to vector<1x64xf32>
    %c3_436 = arith.constant 3 : index
    %c0_437 = arith.constant 0 : index
    %c0_438 = arith.constant 0 : index
    %c0_439 = arith.constant 0 : index
    %989 = vector.load %arg11[%c3_436, %c0_437, %c0_438, %c0_439] : memref<4x4x64x32xf32, #tpu.memory_space<vmem>>, vector<1x1x64x32xf32>
    %990 = vector.shape_cast %989 : vector<1x1x64x32xf32> to vector<64x32xf32>
    %cst_440 = arith.constant dense<0.000000e+00> : vector<1x32xf32>
    %991 = tpu.matmul %988, %990, %cst_440 {dimension_numbers = #tpu.dot_dimension_numbers<[1], [0], [0], [1], [0, 0, 1, 1], [], []>} : vector<1x64xf32>, vector<64x32xf32>, vector<1x32xf32> -> vector<1x32xf32>
    %992 = arith.addf %920, %991 : vector<1x32xf32>
    %993 = vector.extract_strided_slice %987 {offsets = [1, 0], sizes = [1, 64], strides = [1, 1]} : vector<4x64xf32> to vector<1x64xf32>
    %c3_441 = arith.constant 3 : index
    %c1_442 = arith.constant 1 : index
    %c0_443 = arith.constant 0 : index
    %c0_444 = arith.constant 0 : index
    %994 = vector.load %arg11[%c3_441, %c1_442, %c0_443, %c0_444] : memref<4x4x64x32xf32, #tpu.memory_space<vmem>>, vector<1x1x64x32xf32>
    %995 = vector.shape_cast %994 : vector<1x1x64x32xf32> to vector<64x32xf32>
    %cst_445 = arith.constant dense<0.000000e+00> : vector<1x32xf32>
    %996 = tpu.matmul %993, %995, %cst_445 {dimension_numbers = #tpu.dot_dimension_numbers<[1], [0], [0], [1], [0, 0, 1, 1], [], []>} : vector<1x64xf32>, vector<64x32xf32>, vector<1x32xf32> -> vector<1x32xf32>
    %997 = arith.addf %992, %996 : vector<1x32xf32>
    %998 = vector.extract_strided_slice %987 {offsets = [2, 0], sizes = [1, 64], strides = [1, 1]} : vector<4x64xf32> to vector<1x64xf32>
    %c3_446 = arith.constant 3 : index
    %c2_447 = arith.constant 2 : index
    %c0_448 = arith.constant 0 : index
    %c0_449 = arith.constant 0 : index
    %999 = vector.load %arg11[%c3_446, %c2_447, %c0_448, %c0_449] : memref<4x4x64x32xf32, #tpu.memory_space<vmem>>, vector<1x1x64x32xf32>
    %1000 = vector.shape_cast %999 : vector<1x1x64x32xf32> to vector<64x32xf32>
    %cst_450 = arith.constant dense<0.000000e+00> : vector<1x32xf32>
    %1001 = tpu.matmul %998, %1000, %cst_450 {dimension_numbers = #tpu.dot_dimension_numbers<[1], [0], [0], [1], [0, 0, 1, 1], [], []>} : vector<1x64xf32>, vector<64x32xf32>, vector<1x32xf32> -> vector<1x32xf32>
    %1002 = arith.addf %997, %1001 : vector<1x32xf32>
    %1003 = vector.extract_strided_slice %987 {offsets = [3, 0], sizes = [1, 64], strides = [1, 1]} : vector<4x64xf32> to vector<1x64xf32>
    %c3_451 = arith.constant 3 : index
    %c3_452 = arith.constant 3 : index
    %c0_453 = arith.constant 0 : index
    %c0_454 = arith.constant 0 : index
    %1004 = vector.load %arg11[%c3_451, %c3_452, %c0_453, %c0_454] : memref<4x4x64x32xf32, #tpu.memory_space<vmem>>, vector<1x1x64x32xf32>
    %1005 = vector.shape_cast %1004 : vector<1x1x64x32xf32> to vector<64x32xf32>
    %cst_455 = arith.constant dense<0.000000e+00> : vector<1x32xf32>
    %1006 = tpu.matmul %1003, %1005, %cst_455 {dimension_numbers = #tpu.dot_dimension_numbers<[1], [0], [0], [1], [0, 0, 1, 1], [], []>} : vector<1x64xf32>, vector<64x32xf32>, vector<1x32xf32> -> vector<1x32xf32>
    %1007 = arith.addf %1002, %1006 : vector<1x32xf32>
    %c0_456 = arith.constant 0 : index
    %c0_457 = arith.constant 0 : index
    %1008 = vector.load %arg13[%c0_456, %c0_457] : memref<1x32xf32, #tpu.memory_space<vmem>>, vector<1x32xf32>
    %1009 = arith.addf %1007, %1008 : vector<1x32xf32>
    %cst_458 = arith.constant 0.000000e+00 : f32
    %1010 = vector.broadcast %cst_458 : f32 to vector<1x32xf32>
    %1011 = arith.maximumf %1009, %1010 : vector<1x32xf32>
    %c0_459 = arith.constant 0 : index
    %c0_460 = arith.constant 0 : index
    %1012 = vector.load %arg14[%c0_459, %c0_460] : memref<32x1xf32, #tpu.memory_space<vmem>>, vector<32x1xf32>
    %cst_461 = arith.constant dense<0.000000e+00> : vector<1x1xf32>
    %1013 = tpu.matmul %1011, %1012, %cst_461 {dimension_numbers = #tpu.dot_dimension_numbers<[1], [0], [0], [1], [0, 0, 1, 1], [], []>} : vector<1x32xf32>, vector<32x1xf32>, vector<1x1xf32> -> vector<1x1xf32>
    %c0_462 = arith.constant 0 : index
    %c0_463 = arith.constant 0 : index
    %1014 = vector.load %arg15[%c0_462, %c0_463] : memref<1x1xf32, #tpu.memory_space<vmem>>, vector<1x1xf32>
    %1015 = arith.addf %1013, %1014 : vector<1x1xf32>
    %c0_464 = arith.constant 0 : index
    %c0_465 = arith.constant 0 : index
    %c0_466 = arith.constant 0 : index
    %1016 = vector.load %arg16[%c0_464, %c0_465, %c0_466] : memref<1x1x1xf32, #tpu.memory_space<vmem>>, vector<1x1x1xf32>
    %1017 = vector.shape_cast %1016 : vector<1x1x1xf32> to vector<1x1xf32>
    %1018 = vector.shape_cast %1015 : vector<1x1xf32> to vector<1x1x1xf32>
    tpu.vector_store %arg16[%c0_464, %c0_465, %c0_466], %1018 {strides = array<i32>} : memref<1x1x1xf32, #tpu.memory_space<vmem>>, vector<1x1x1xf32>,
    return
  }
  func.func @transform_0(%arg0: i32) -> (i32, i32, i32, i32) {
    %c0_i32 = arith.constant 0 : i32
    %c0_i32_0 = arith.constant 0 : i32
    %c0_i32_1 = arith.constant 0 : i32
    %c0_i32_2 = arith.constant 0 : i32
    return %arg0, %c0_i32, %c0_i32_0, %c0_i32_1 : i32, i32, i32, i32
  }
  func.func @transform_1(%arg0: i32) -> (i32, i32, i32) {
    %c0_i32 = arith.constant 0 : i32
    %c0_i32_0 = arith.constant 0 : i32
    %c0_i32_1 = arith.constant 0 : i32
    return %arg0, %c0_i32, %c0_i32_0 : i32, i32, i32
  }
  func.func @transform_2(%arg0: i32) -> (i32, i32) {
    %c0_i32 = arith.constant 0 : i32
    %c0_i32_0 = arith.constant 0 : i32
    %c0_i32_1 = arith.constant 0 : i32
    return %c0_i32, %c0_i32_0 : i32, i32
  }
  func.func @transform_3(%arg0: i32) -> (i32, i32) {
    %c0_i32 = arith.constant 0 : i32
    %c0_i32_0 = arith.constant 0 : i32
    %c0_i32_1 = arith.constant 0 : i32
    return %c0_i32, %c0_i32_0 : i32, i32
  }
  func.func @transform_4(%arg0: i32) -> (i32, i32) {
    %c0_i32 = arith.constant 0 : i32
    %c0_i32_0 = arith.constant 0 : i32
    %c0_i32_1 = arith.constant 0 : i32
    return %c0_i32, %c0_i32_0 : i32, i32
  }
  func.func @transform_5(%arg0: i32) -> (i32, i32, i32) {
    %c0_i32 = arith.constant 0 : i32
    %c0_i32_0 = arith.constant 0 : i32
    %c0_i32_1 = arith.constant 0 : i32
    %c0_i32_2 = arith.constant 0 : i32
    return %c0_i32, %c0_i32_0, %c0_i32_1 : i32, i32, i32
  }
  func.func @transform_6(%arg0: i32) -> (i32, i32) {
    %c0_i32 = arith.constant 0 : i32
    %c0_i32_0 = arith.constant 0 : i32
    %c0_i32_1 = arith.constant 0 : i32
    return %c0_i32, %c0_i32_0 : i32, i32
  }
  func.func @transform_7(%arg0: i32) -> (i32, i32) {
    %c0_i32 = arith.constant 0 : i32
    %c0_i32_0 = arith.constant 0 : i32
    %c0_i32_1 = arith.constant 0 : i32
    return %c0_i32, %c0_i32_0 : i32, i32
  }
  func.func @transform_8(%arg0: i32) -> (i32, i32) {
    %c0_i32 = arith.constant 0 : i32
    %c0_i32_0 = arith.constant 0 : i32
    %c0_i32_1 = arith.constant 0 : i32
    return %c0_i32, %c0_i32_0 : i32, i32
  }
  func.func @transform_9(%arg0: i32) -> (i32, i32) {
    %c0_i32 = arith.constant 0 : i32
    %c0_i32_0 = arith.constant 0 : i32
    %c0_i32_1 = arith.constant 0 : i32
    return %c0_i32, %c0_i32_0 : i32, i32
  }
  func.func @transform_10(%arg0: i32) -> (i32, i32, i32, i32) {
    %c0_i32 = arith.constant 0 : i32
    %c0_i32_0 = arith.constant 0 : i32
    %c0_i32_1 = arith.constant 0 : i32
    %c0_i32_2 = arith.constant 0 : i32
    %c0_i32_3 = arith.constant 0 : i32
    return %c0_i32, %c0_i32_0, %c0_i32_1, %c0_i32_2 : i32, i32, i32, i32
  }
  func.func @transform_11(%arg0: i32) -> (i32, i32) {
    %c0_i32 = arith.constant 0 : i32
    %c0_i32_0 = arith.constant 0 : i32
    %c0_i32_1 = arith.constant 0 : i32
    return %c0_i32, %c0_i32_0 : i32, i32
  }
  func.func @transform_12(%arg0: i32) -> (i32, i32) {
    %c0_i32 = arith.constant 0 : i32
    %c0_i32_0 = arith.constant 0 : i32
    %c0_i32_1 = arith.constant 0 : i32
    return %c0_i32, %c0_i32_0 : i32, i32
  }
  func.func @transform_13(%arg0: i32) -> (i32, i32) {
    %c0_i32 = arith.constant 0 : i32
    %c0_i32_0 = arith.constant 0 : i32
    %c0_i32_1 = arith.constant 0 : i32
    return %c0_i32, %c0_i32_0 : i32, i32
  }
  func.func @transform_14(%arg0: i32) -> (i32, i32) {
    %c0_i32 = arith.constant 0 : i32
    %c0_i32_0 = arith.constant 0 : i32
    %c0_i32_1 = arith.constant 0 : i32
    return %c0_i32, %c0_i32_0 : i32, i32
  }
  func.func @transform_15(%arg0: i32) -> (i32, i32, i32) {
    %c0_i32 = arith.constant 0 : i32
    %c0_i32_0 = arith.constant 0 : i32
    %c0_i32_1 = arith.constant 0 : i32
    return %arg0, %c0_i32, %c0_i32_0 : i32, i32, i32
  }
}

</mosaic_0001>

<bundles_post_ra>
// kernel: forward.1
= control target key start
LH: loop header
LB: loop body
LE: loop exit
PB: predicated region body
PF: predicated region fallthrough
CT: control target
= control target key end

     0   :  { %s9398_s20 = smov 0   ;;  %s11415_s0 = inlined_call_operand.vmem [shape: f32[2,16,16,1], index: 0, kind: input, shape index: {}]   ;;  %s11416_s1 = inlined_call_operand.vmem [shape: f32[2,1,6], index: 1, kind: input, shape index: {}]   ;;  %s11417_s2 = inlined_call_operand.vmem [shape: f32[4,32], index: 2, kind: input, shape index: {}]   ;;  %s11418_s3 = inlined_call_operand.vmem [shape: f32[1,32], index: 3, kind: input, shape index: {}]   ;;  %s11419_s4 = inlined_call_operand.vmem [shape: f32[1,32], index: 4, kind: input, shape index: {}]   ;;  %s11420_s5 = inlined_call_operand.vmem [shape: f32[4,32,64], index: 5, kind: input, shape index: {}]   ;;  %s11421_s6 = inlined_call_operand.vmem [shape: f32[1,64], index: 6, kind: input, shape index: {}]   ;;  %s11422_s7 = inlined_call_operand.vmem [shape: f32[1,64], index: 7, kind: input, shape index: {}]   ;;  %s11423_s8 = inlined_call_operand.vmem [shape: f32[6,128], index: 8, kind: input, shape index: {}]   ;;  %s11424_s9 = inlined_call_operand.vmem [shape: f32[1,128], index: 9, kind: input, shape index: {}]   ;;  %s11425_s10 = inlined_call_operand.vmem [shape: f32[4,4,64,32], index: 10, kind: input, shape index: {}]   ;;  %s11426_s11 = inlined_call_operand.vmem [shape: f32[128,32], index: 11, kind: input, shape index: {}]   ;;  %s11427_s12 = inlined_call_operand.vmem [shape: f32[1,32], index: 12, kind: input, shape index: {}]   ;;  %s11428_s13 = inlined_call_operand.vmem [shape: f32[32,1], index: 13, kind: input, shape index: {}]   ;;  %s11429_s14 = inlined_call_operand.<no memory space> [shape: f32[1,1], index: 14, kind: input, shape index: {}]   ;;  %s11430_s15 = inlined_call_operand.vmem [shape: f32[2,1,1], index: 15, kind: output, shape index: {}]  }
   0x1   :  { %v20_v0 = vstv %s11429_s14 }
   0x2   :  { %21 = vst [vmem:[#allocation4] sm:$0x1] %v20_v0 }
   0x3 LB: > { %s7318_s21 = sadd.s32 4294967295, %s9309_s20   ;;  %p7322_p0 = scmp.ge.s32.totalorder %s9309_s20, 1  ;;  %s9309_s20 = sphi %s9398_s20, %s27_s20  }
   0x4   : > { %p447_p1 = scmp.lt.s32.totalorder %s9309_s20, 3 }
   0x6   : > { %p448_p2 = pnand %p7322_p0, %p447_p1 }
   0x7   : > { %vm507_vm0 = vcmask (!%p448_p2), 7168   ;;  %vm510_vm1 = vcmask (!%p448_p2), 1024   ;;  %p9408_p3 = scmp.lt.s32.totalorder (!%p448_p2), %s7318_s21, 1  ;;  %v9311_v1 = vmov (!%p448_p2), 0   ;;  %v9312_v2 = vmov (!%p448_p2), 0.0  }
   0x8   : > { %451 = sbr.rel (%p448_p2) target bundleno = 2842 (0xb1a), region = 80  ;;  %9297 = vset.pattern.permute.xlu0 (!%p448_p2), %v9311_v1  ;;  %9298 = vset.pattern.permute.xlu1 (!%p448_p2), %v9311_v1  ;;  %508 = vst.msk [vmem:[#allocation2] sm:$0xff] (!%p448_p2), %vm507_vm0, %v9312_v2  ;;  %509 = vst.msk [vmem:[#allocation2 + $0x8] sm:$0xff] (!%p448_p2), %vm507_vm0, %v9312_v2  ;;  %v664_v53 = vld [vmem:[%s11423_s8] sm:$0x3f] (!%p448_p2)  ;;  %vm670_vm2 = vcmask (!%p448_p2), 1045504  }
   0x9   : > { %512 = vst.msk [vmem:[#allocation2 + $0x18] sm:$0xff] (!%p448_p2), %vm507_vm0, %v9312_v2  ;;  %513 = vst.msk [vmem:[#allocation2 + $0x20] sm:$0xff] (!%p448_p2), %vm507_vm0, %v9312_v2  ;;  %7952 = vmatprep.subr.mxu0 (!%p448_p2), %v9312_v2  ;;  %vm666_vm3 = vcmask (!%p448_p2), 48128   ;;  %vm9313_vm4 = vmmov (!%p448_p2), 0   ;;  %v9314_v57 = vmov (!%p448_p2), 0.0|0.0   ;;  %vm799_vm6 = vcmask (!%p448_p2), 1046528  }
   0xa   : > { %515 = vst.msk [vmem:[#allocation2 + $0x30] sm:$0xff] (!%p448_p2), %vm507_vm0, %v9312_v2  ;;  %516 = vst.msk [vmem:[#allocation2 + $0x38] sm:$0xff] (!%p448_p2), %vm507_vm0, %v9312_v2  ;;  %7953 = vmatpush3.msk.msra.mxu0 (!%p448_p2), %vm670_vm2, %v664_v53  ;;  %7954 = vmatprep.mubr.msk.f32.mxu0 (!%p448_p2), %vm9313_vm4, %v9312_v2  ;;  %vm970_vm7 = vcmask (!%p448_p2), 130048   ;;  %vm628_vm8 = vcmask (!%p448_p2), 261120   ;;  %vm630_vm9 = vcmask (!%p448_p2), 254976   ;;  %vm3522_vm10 = vcmask (!%p448_p2), 64512  }
   0xb   : > { %518 = vst.msk [vmem:[#allocation2 + $0x48] sm:$0xff] (!%p448_p2), %vm507_vm0, %v9312_v2  ;;  %519 = vst.msk [vmem:[#allocation2 + $0x50] sm:$0xff] (!%p448_p2), %vm507_vm0, %v9312_v2  ;;  %7975 = vmatprep.mubr.msk.f32.mxu1 (!%p448_p2), %vm9313_vm4, %v9312_v2  ;;  %8735 = vmatprep.subr.bf16.mxu0 (!%p448_p2), %v9314_v57  ;;  %vm3603_vm11 = vcmask (!%p448_p2), 523264   ;;  %vm7260_vm12 = vcmask (!%p448_p2), 0  }
   0xc   : > { %521 = vst.msk [vmem:[#allocation2 + $0x60] sm:$0xff] (!%p448_p2), %vm507_vm0, %v9312_v2  ;;  %522 = vst.msk [vmem:[#allocation2 + $0x68] sm:$0xff] (!%p448_p2), %vm507_vm0, %v9312_v2  ;;  %8741 = vmatprep.subr.bf16.mxu1 (!%p448_p2), %v9314_v57 }
   0xd   : > { %524 = vst.msk [vmem:[#allocation2 + $0x78] sm:$0xff] (!%p448_p2), %vm507_vm0, %v9312_v2  ;;  %525 = vst.msk [vmem:[#allocation2 + $0x80] sm:$0xff] (!%p448_p2), %vm507_vm0, %v9312_v2 }
   0xe   : > { %527 = vst.msk [vmem:[#allocation2 + $0x90] sm:$0xff] (!%p448_p2), %vm507_vm0, %v9312_v2  ;;  %528 = vst.msk [vmem:[#allocation2 + $0x98] sm:$0xff] (!%p448_p2), %vm507_vm0, %v9312_v2 }
   0xf   : > { %530 = vst.msk [vmem:[#allocation2 + $0xa8] sm:$0xff] %vm507_vm0, %v9312_v2  ;;  %531 = vst.msk [vmem:[#allocation2 + $0xb0] sm:$0xff] %vm507_vm0, %v9312_v2  ;;  %s11433_s21 = smov (!%p9408_p3, %s7318_s21), 1  ;;  %v761_v9 = vld [vmem:[#allocation2] sm:$0xff]  ;;  %v762_v11 = vld [vmem:[#allocation2 + $0x8] sm:$0xff] }
  0x10   : > { %533 = vst.msk [vmem:[#allocation2 + $0xc0] sm:$0xff] %vm507_vm0, %v9312_v2  ;;  %534 = vst.msk [vmem:[#allocation2 + $0xc8] sm:$0xff] %vm507_vm0, %v9312_v2  ;;  %s7559_s22 = sshll.u32 %s11433_s21, 8  ;;  %766 = vperm.xlu0 %9297, %v761_v9   ;;  %s503_s30 = scalar_lea.vmem %s11416_s1, %s11433_s21 }
  0x11   : > { %536 = vst.msk [vmem:[#allocation2 + $0xd8] sm:$0xff] %vm507_vm0, %v9312_v2  ;;  %537 = vst.msk [vmem:[#allocation2 + $0xe0] sm:$0xff] %vm507_vm0, %v9312_v2  ;;  %s9525_s25 = scalar_lea.vmem %s11415_s0, %s7559_s22  ;;  %v663_v54 = vld [vmem:[%s503_s30] sm:$0x1]  ;;  %s506_s18 = scalar_lea.vmem %s11430_s15, %s11433_s21 }
  0x12   : > { %539 = vst.msk [vmem:[#allocation2 + $0xf0] sm:$0xff] %vm507_vm0, %v9312_v2  ;;  %540 = vst.msk [vmem:[#allocation2 + $0xf8] sm:$0xff] %vm507_vm0, %v9312_v2  ;;  %v563_v3 = vld [vmem:[%s9525_s25] sm:$0xff]  ;;  %v564_v4 = vld [vmem:[%s9525_s25 + $0x8] sm:$0xff]  ;;  %7955 = vmatmul.mubr.msk.f32.vlgmr.msra.gmra.mrb[0].mxu0 %vm666_vm3, %v663_v54 }
  0x13   : > { %542 = vst.msk [vmem:[#allocation2 + $0x108] sm:$0xff] %vm507_vm0, %v9312_v2  ;;  %543 = vst.msk [vmem:[#allocation2 + $0x110] sm:$0xff] %vm507_vm0, %v9312_v2  ;;  %v565_v5 = vld [vmem:[%s9525_s25 + $0x10] sm:$0xff]  ;;  %v566_v6 = vld [vmem:[%s9525_s25 + $0x18] sm:$0xff]  ;;  %7961 = vmatprep.mubr.msk.f32.mxu0 %vm9313_vm4, %v9312_v2 }
  0x14   : > { %545 = vst.msk [vmem:[#allocation2 + $0x120] sm:$0xff] %vm507_vm0, %v9312_v2  ;;  %546 = vst.msk [vmem:[#allocation2 + $0x128] sm:$0xff] %vm507_vm0, %v9312_v2  ;;  %v567_v7 = vld [vmem:[%s9525_s25 + $0x20] sm:$0xff]  ;;  %v568_v8 = vld [vmem:[%s9525_s25 + $0x28] sm:$0xff]  ;;  %771 = vperm.xlu0 %9297, %v762_v11  }
  0x15   : > { %548 = vst.msk [vmem:[#allocation2 + $0x138] sm:$0xff] %vm507_vm0, %v9312_v2  ;;  %549 = vst.msk [vmem:[#allocation2 + $0x140] sm:$0xff] %vm507_vm0, %v9312_v2  ;;  %v569_v12 = vld [vmem:[%s9525_s25 + $0x30] sm:$0xff]  ;;  %v570_v13 = vld [vmem:[%s9525_s25 + $0x38] sm:$0xff] }
  0x16   : > { %551 = vst.msk [vmem:[#allocation2 + $0x150] sm:$0xff] %vm507_vm0, %v9312_v2  ;;  %552 = vst.msk [vmem:[#allocation2 + $0x158] sm:$0xff] %vm507_vm0, %v9312_v2  ;;  %v571_v14 = vld [vmem:[%s9525_s25 + $0x40] sm:$0xff]  ;;  %v572_v15 = vld [vmem:[%s9525_s25 + $0x48] sm:$0xff] }
  0x17   : > { %554 = vst.msk [vmem:[#allocation2 + $0x168] sm:$0xff] %vm507_vm0, %v9312_v2  ;;  %555 = vst.msk [vmem:[#allocation2 + $0x170] sm:$0xff] %vm507_vm0, %v9312_v2  ;;  %v573_v16 = vld [vmem:[%s9525_s25 + $0x50] sm:$0xff]  ;;  %v574_v17 = vld [vmem:[%s9525_s25 + $0x58] sm:$0xff] }
  0x18   : > { %557 = vst.msk [vmem:[#allocation2 + $0x180] sm:$0xff] %vm507_vm0, %v9312_v2  ;;  %558 = vst.msk [vmem:[#allocation2 + $0x188] sm:$0xff] %vm507_vm0, %v9312_v2  ;;  %v575_v18 = vld [vmem:[%s9525_s25 + $0x60] sm:$0xff]  ;;  %v576_v19 = vld [vmem:[%s9525_s25 + $0x68] sm:$0xff] }
  0x19   : > { %511 = vst.msk [vmem:[#allocation2 + $0x10] sm:$0x3] %vm510_vm1, %v9312_v2  ;;  %514 = vst.msk [vmem:[#allocation2 + $0x28] sm:$0x3] %vm510_vm1, %v9312_v2  ;;  %v577_v20 = vld [vmem:[%s9525_s25 + $0x70] sm:$0xff]  ;;  %v578_v21 = vld [vmem:[%s9525_s25 + $0x78] sm:$0xff] }
  0x1a   : > { %517 = vst.msk [vmem:[#allocation2 + $0x40] sm:$0x3] %vm510_vm1, %v9312_v2  ;;  %520 = vst.msk [vmem:[#allocation2 + $0x58] sm:$0x3] %vm510_vm1, %v9312_v2  ;;  %v579_v22 = vld [vmem:[%s9525_s25 + $0x80] sm:$0xff]  ;;  %v580_v23 = vld [vmem:[%s9525_s25 + $0x88] sm:$0xff] }
  0x1b   : > { %523 = vst.msk [vmem:[#allocation2 + $0x70] sm:$0x3] %vm510_vm1, %v9312_v2  ;;  %526 = vst.msk [vmem:[#allocation2 + $0x88] sm:$0x3] %vm510_vm1, %v9312_v2  ;;  %v581_v24 = vld [vmem:[%s9525_s25 + $0x90] sm:$0xff]  ;;  %v582_v25 = vld [vmem:[%s9525_s25 + $0x98] sm:$0xff] }
  0x1c   : > { %529 = vst.msk [vmem:[#allocation2 + $0xa0] sm:$0x3] %vm510_vm1, %v9312_v2  ;;  %532 = vst.msk [vmem:[#allocation2 + $0xb8] sm:$0x3] %vm510_vm1, %v9312_v2  ;;  %v583_v26 = vld [vmem:[%s9525_s25 + $0xa0] sm:$0xff]  ;;  %v584_v33 = vld [vmem:[%s9525_s25 + $0xa8] sm:$0xff] }
  0x1d   : > { %535 = vst.msk [vmem:[#allocation2 + $0xd0] sm:$0x3] %vm510_vm1, %v9312_v2  ;;  %538 = vst.msk [vmem:[#allocation2 + $0xe8] sm:$0x3] %vm510_vm1, %v9312_v2  ;;  %v585_v34 = vld [vmem:[%s9525_s25 + $0xb0] sm:$0xff]  ;;  %v586_v35 = vld [vmem:[%s9525_s25 + $0xb8] sm:$0xff] }
  0x1e   : > { %541 = vst.msk [vmem:[#allocation2 + $0x100] sm:$0x3] %vm510_vm1, %v9312_v2  ;;  %544 = vst.msk [vmem:[#allocation2 + $0x118] sm:$0x3] %vm510_vm1, %v9312_v2  ;;  %v587_v36 = vld [vmem:[%s9525_s25 + $0xc0] sm:$0xff]  ;;  %v588_v37 = vld [vmem:[%s9525_s25 + $0xc8] sm:$0xff] }
  0x1f   : > { %547 = vst.msk [vmem:[#allocation2 + $0x130] sm:$0x3] %vm510_vm1, %v9312_v2  ;;  %550 = vst.msk [vmem:[#allocation2 + $0x148] sm:$0x3] %vm510_vm1, %v9312_v2  ;;  %v589_v38 = vld [vmem:[%s9525_s25 + $0xd0] sm:$0xff]  ;;  %v590_v40 = vld [vmem:[%s9525_s25 + $0xd8] sm:$0xff] }
  0x20   : > { %553 = vst.msk [vmem:[#allocation2 + $0x160] sm:$0x3] %vm510_vm1, %v9312_v2  ;;  %556 = vst.msk [vmem:[#allocation2 + $0x178] sm:$0x3] %vm510_vm1, %v9312_v2  ;;  %v763_v10 = vld [vmem:[#allocation2 + $0x10] sm:$0x3] }
  0x21   : > { %559 = vst.msk [vmem:[#allocation2 + $0x190] sm:$0x3] %vm510_vm1, %v9312_v2  ;;  %776 = vperm.xlu1 %9298, %v763_v10   ;;  %v591_v41 = vld [vmem:[%s9525_s25 + $0xe0] sm:$0xff]  ;;  %v592_v42 = vld [vmem:[%s9525_s25 + $0xe8] sm:$0xff]  ;;  %v593_v44 = vld [vmem:[%s9525_s25 + $0xf0] sm:$0xff] }
  0x22   : > { %596 = vst.msk [vmem:[#allocation2 + $0x19] sm:$0xff] %vm507_vm0, %v563_v3  ;;  %597 = vst.msk [vmem:[#allocation2 + $0x21] sm:$0xff] %vm507_vm0, %v564_v4  ;;  %v594_v45 = vld [vmem:[%s9525_s25 + $0xf8] sm:$0xff] }
  0x23   : > { %598 = vst.msk [vmem:[#allocation2 + $0x31] sm:$0xff] %vm507_vm0, %v565_v5  ;;  %599 = vst.msk [vmem:[#allocation2 + $0x39] sm:$0xff] %vm507_vm0, %v566_v6 }
  0x24   : > { %600 = vst.msk [vmem:[#allocation2 + $0x49] sm:$0xff] %vm507_vm0, %v567_v7  ;;  %601 = vst.msk [vmem:[#allocation2 + $0x51] sm:$0xff] %vm507_vm0, %v568_v8 }
  0x25   : > { %602 = vst.msk [vmem:[#allocation2 + $0x61] sm:$0xff] %vm507_vm0, %v569_v12  ;;  %603 = vst.msk [vmem:[#allocation2 + $0x69] sm:$0xff] %vm507_vm0, %v570_v13 }
  0x26   : > { %604 = vst.msk [vmem:[#allocation2 + $0x79] sm:$0xff] %vm507_vm0, %v571_v14  ;;  %605 = vst.msk [vmem:[#allocation2 + $0x81] sm:$0xff] %vm507_vm0, %v572_v15 }
  0x27   : > { %606 = vst.msk [vmem:[#allocation2 + $0x91] sm:$0xff] %vm507_vm0, %v573_v16  ;;  %607 = vst.msk [vmem:[#allocation2 + $0x99] sm:$0xff] %vm507_vm0, %v574_v17 }
  0x28   : > { %608 = vst.msk [vmem:[#allocation2 + $0xa9] sm:$0xff] %vm507_vm0, %v575_v18  ;;  %609 = vst.msk [vmem:[#allocation2 + $0xb1] sm:$0xff] %vm507_vm0, %v576_v19 }
  0x29   : > { %610 = vst.msk [vmem:[#allocation2 + $0xc1] sm:$0xff] %vm507_vm0, %v577_v20  ;;  %611 = vst.msk [vmem:[#allocation2 + $0xc9] sm:$0xff] %vm507_vm0, %v578_v21  ;;  %v811_v27 = vld [vmem:[#allocation2 + $0x18] sm:$0xff]  ;;  %v812_v28 = vld [vmem:[#allocation2 + $0x20] sm:$0xff]  ;;  %v655_v21 = vlaneseq }
  0x2a   : > { %612 = vst.msk [vmem:[#allocation2 + $0xd9] sm:$0xff] %vm507_vm0, %v579_v22  ;;  %613 = vst.msk [vmem:[#allocation2 + $0xe1] sm:$0xff] %vm507_vm0, %v580_v23  ;;  %816 = vperm.xlu1 %9298, %v811_v27   ;;  %v813_v29 = vld [vmem:[#allocation2 + $0x28] sm:$0x3]  ;;  %821 = vperm.xlu0 %9297, %v812_v28   ;;  %v905_v30 = vld [vmem:[#allocation2 + $0x30] sm:$0xff] }
  0x2b   : > { %614 = vst.msk [vmem:[#allocation2 + $0xf1] sm:$0xff] %vm507_vm0, %v581_v24  ;;  %615 = vst.msk [vmem:[#allocation2 + $0xf9] sm:$0xff] %vm507_vm0, %v582_v25  ;;  %v906_v31 = vld [vmem:[#allocation2 + $0x38] sm:$0xff]  ;;  %v907_v32 = vld [vmem:[#allocation2 + $0x40] sm:$0x3]  ;;  %v656_v24 = vshrl.u32 %v655_v21, 7 }
  0x2c   : > { %616 = vst.msk [vmem:[#allocation2 + $0x109] sm:$0xff] %vm507_vm0, %v583_v26  ;;  %617 = vst.msk [vmem:[#allocation2 + $0x111] sm:$0xff] %vm507_vm0, %v584_v33  ;;  %v1048_v39 = vld [vmem:[#allocation2 + $0x40] sm:$0x3]  ;;  %v1088_v43 = vld [vmem:[#allocation2 + $0x48] sm:$0xff] }
  0x2d   : > { %618 = vst.msk [vmem:[#allocation2 + $0x121] sm:$0xff] %vm507_vm0, %v585_v34  ;;  %619 = vst.msk [vmem:[#allocation2 + $0x129] sm:$0xff] %vm507_vm0, %v586_v35  ;;  %v1089_v46 = vld [vmem:[#allocation2 + $0x50] sm:$0xff]  ;;  %v1090_v47 = vld [vmem:[#allocation2 + $0x58] sm:$0x3]  ;;  %v791_v27 = vsub.s32 1, %v656_v24 }
  0x2e   : > { %826 = vperm.xlu1 %9298, %v813_v29   ;;  %910 = vperm.xlu0 %9297, %v905_v30   ;;  %620 = vst.msk [vmem:[#allocation2 + $0x139] sm:$0xff] %vm507_vm0, %v587_v36  ;;  %621 = vst.msk [vmem:[#allocation2 + $0x141] sm:$0xff] %vm507_vm0, %v588_v37  ;;  %v1162_v48 = vld [vmem:[#allocation2 + $0x60] sm:$0xff]  ;;  %v1163_v49 = vld [vmem:[#allocation2 + $0x68] sm:$0xff]  ;;  %v781_v33 = vsub.s32 0, %v656_v24  ;;  %v841_v37 = vsub.s32 3, %v656_v24 }
  0x2f   : > { %622 = vst.msk [vmem:[#allocation2 + $0x151] sm:$0xff] %vm507_vm0, %v589_v38  ;;  %623 = vst.msk [vmem:[#allocation2 + $0x159] sm:$0xff] %vm507_vm0, %v590_v40  ;;  %v1164_v50 = vld [vmem:[#allocation2 + $0x70] sm:$0x3]  ;;  %v1341_v52 = vld [vmem:[#allocation2 + $0x78] sm:$0xff]  ;;  %v658_v38 = vand.u32 127, %v655_v21 }
  0x30   : > { %624 = vst.msk [vmem:[#allocation2 + $0x169] sm:$0xff] %vm507_vm0, %v591_v41  ;;  %625 = vst.msk [vmem:[#allocation2 + $0x171] sm:$0xff] %vm507_vm0, %v592_v42  ;;  %v1301_v51 = vld [vmem:[#allocation2 + $0x70] sm:$0x3]  ;;  %v1342_v55 = vld [vmem:[#allocation2 + $0x80] sm:$0xff]  ;;  %v831_v41 = vsub.s32 2, %v656_v24 }
  0x31   : > { %626 = vst.msk [vmem:[#allocation2 + $0x181] sm:$0xff] %vm507_vm0, %v593_v44  ;;  %627 = vst.msk [vmem:[#allocation2 + $0x189] sm:$0xff] %vm507_vm0, %v594_v45  ;;  %v1343_v56 = vld [vmem:[#allocation2 + $0x88] sm:$0x3]  ;;  %v1552_v58 = vld [vmem:[#allocation2 + $0x90] sm:$0xff] }
  0x32   : > { %915 = vperm.xlu1 %9298, %v906_v31   ;;  %920 = vperm.xlu0 %9297, %v907_v32   ;;  %v1553_v59 = vld [vmem:[#allocation2 + $0x98] sm:$0xff]  ;;  %v1554_v60 = vld [vmem:[#allocation2 + $0xa0] sm:$0x3]  ;;  %v1594_v61 = vld [vmem:[#allocation2 + $0xa8] sm:$0xff]  ;;  %629 = vst.msk [vmem:[#allocation3] sm:$0xff] %vm628_vm8, %v9312_v2 }
  0x33   : > { %v1595_v62 = vld [vmem:[#allocation2 + $0xb0] sm:$0xff]  ;;  %v1596_v63 = vld [vmem:[#allocation2 + $0xb8] sm:$0x3]  ;;  %v1417_v0 = vld [vmem:[#allocation2 + $0xa0] sm:$0x3]  ;;  %632 = vst.msk [vmem:[#allocation3 + $0x10] sm:$0xff] %vm628_vm8, %v9312_v2 }
  0x34   : > { %v1668_v1 = vld [vmem:[#allocation2 + $0xc0] sm:$0xff]  ;;  %v1669_v3 = vld [vmem:[#allocation2 + $0xc8] sm:$0xff]  ;;  %v1670_v4 = vld [vmem:[#allocation2 + $0xd0] sm:$0x3]  ;;  %634 = vst.msk [vmem:[#allocation3 + $0x20] sm:$0xff] %vm628_vm8, %v9312_v2 }
  0x35   : > { %v1807_v5 = vld [vmem:[#allocation2 + $0xd0] sm:$0x3]  ;;  %v1847_v6 = vld [vmem:[#allocation2 + $0xd8] sm:$0xff]  ;;  %v1848_v7 = vld [vmem:[#allocation2 + $0xe0] sm:$0xff]  ;;  %636 = vst.msk [vmem:[#allocation3 + $0x30] sm:$0xff] %vm628_vm8, %v9312_v2 }
  0x36   : > { %1051 = vperm.xlu1 %9298, %v905_v30   ;;  %1056 = vperm.xlu0 %9297, %v906_v31   ;;  %v1849_v8 = vld [vmem:[#allocation2 + $0xe8] sm:$0x3]  ;;  %v2058_v9 = vld [vmem:[#allocation2 + $0xf0] sm:$0xff]  ;;  %v2059_v10 = vld [vmem:[#allocation2 + $0xf8] sm:$0xff]  ;;  %638 = vst.msk [vmem:[#allocation3 + $0x40] sm:$0xff] %vm628_vm8, %v9312_v2 }
  0x37   : > { %v2060_v11 = vld [vmem:[#allocation2 + $0x100] sm:$0x3]  ;;  %v2100_v12 = vld [vmem:[#allocation2 + $0x108] sm:$0xff]  ;;  %v2101_v13 = vld [vmem:[#allocation2 + $0x110] sm:$0xff]  ;;  %640 = vst.msk [vmem:[#allocation3 + $0x50] sm:$0xff] %vm628_vm8, %v9312_v2 }
  0x38   : > { %v2102_v14 = vld [vmem:[#allocation2 + $0x118] sm:$0x3]  ;;  %v1923_v15 = vld [vmem:[#allocation2 + $0x100] sm:$0x3]  ;;  %v2175_v17 = vld [vmem:[#allocation2 + $0x128] sm:$0xff]  ;;  %642 = vst.msk [vmem:[#allocation3 + $0x60] sm:$0xff] %vm628_vm8, %v9312_v2 }
  0x39   : > { %v2174_v16 = vld [vmem:[#allocation2 + $0x120] sm:$0xff]  ;;  %v2176_v18 = vld [vmem:[#allocation2 + $0x130] sm:$0x3]  ;;  %v2353_v20 = vld [vmem:[#allocation2 + $0x138] sm:$0xff]  ;;  %644 = vst.msk [vmem:[#allocation3 + $0x70] sm:$0xff] %vm628_vm8, %v9312_v2 }
  0x3a   : > { %1061 = vperm.xlu1 %9298, %v1048_v39   ;;  %1093 = vperm.xlu0 %9297, %v1088_v43   ;;  %v2313_v19 = vld [vmem:[#allocation2 + $0x130] sm:$0x3]  ;;  %v2354_v22 = vld [vmem:[#allocation2 + $0x140] sm:$0xff]  ;;  %v2355_v23 = vld [vmem:[#allocation2 + $0x148] sm:$0x3]  ;;  %v659_v39 = vmul.u32 2, %v656_v24 }
  0x3b   : > { %v2564_v25 = vld [vmem:[#allocation2 + $0x150] sm:$0xff]  ;;  %v2565_v26 = vld [vmem:[#allocation2 + $0x158] sm:$0xff]  ;;  %v2566_v28 = vld [vmem:[#allocation2 + $0x160] sm:$0x3]  ;;  %646 = vst.msk [vmem:[#allocation3 + $0x80] sm:$0xff] %vm628_vm8, %v9312_v2 }
  0x3c   : > { %v650_v29 = vld [vmem:[%s11417_s2] sm:$0xf]  ;;  %v2606_v30 = vld [vmem:[#allocation2 + $0x168] sm:$0xff]  ;;  %v2607_v32 = vld [vmem:[#allocation2 + $0x170] sm:$0xff]  ;;  %vm660_vm5 = vcmp.eq.s32.totalorder %v658_v38, %v659_v39  ;;  %631 = vst.msk [vmem:[#allocation3 + $0x8] sm:$0x3] %vm630_vm9, %v9312_v2 }
  0x3d   : > { %v9609_v31 = vrot.slane %v650_v29, %v791_v27  ;;  %v2608_v36 = vld [vmem:[#allocation2 + $0x178] sm:$0x3]  ;;  %v9612_v42 = vrot.slane %v650_v29, %v781_v33  ;;  %v9615_v45 = vrot.slane %v650_v29, %v841_v37  ;;  %v9622_v54 = vsel %vm660_vm5, 1.0, %v9312_v2  ;;  %633 = vst.msk [vmem:[#allocation3 + $0x18] sm:$0x3] %vm630_vm9, %v9312_v2 }
  0x3e   : > { %1098 = vperm.xlu1 %9298, %v1089_v46   ;;  %1103 = vperm.xlu0 %9297, %v1090_v47   ;;  %635 = vst.msk [vmem:[#allocation3 + $0x28] sm:$0x3] %vm630_vm9, %v9312_v2  ;;  %637 = vst.msk [vmem:[#allocation3 + $0x38] sm:$0x3] %vm630_vm9, %v9312_v2 }
  0x3f   : > { %639 = vst.msk [vmem:[#allocation3 + $0x48] sm:$0x3] %vm630_vm9, %v9312_v2  ;;  %641 = vst.msk [vmem:[#allocation3 + $0x58] sm:$0x3] %vm630_vm9, %v9312_v2 }
  0x40   : > { %643 = vst.msk [vmem:[#allocation3 + $0x68] sm:$0x3] %vm630_vm9, %v9312_v2  ;;  %645 = vst.msk [vmem:[#allocation3 + $0x78] sm:$0x3] %vm630_vm9, %v9312_v2 }
  0x41   : > { %647 = vst.msk [vmem:[#allocation3 + $0x88] sm:$0x3] %vm630_vm9, %v9312_v2 }
  0x42   : > { %1167 = vperm.xlu1 %9298, %v1162_v48   ;;  %1172 = vperm.xlu0 %9297, %v1163_v49  }
  0x46   : > { %1177 = vperm.xlu1 %9298, %v1164_v50   ;;  %1304 = vperm.xlu0 %9297, %v1162_v48  }
  0x4a   : > { %1309 = vperm.xlu1 %9298, %v1163_v49   ;;  %1314 = vperm.xlu0 %9297, %v1301_v51   ;;  %v9619_v49 = vrot.slane %v650_v29, %v831_v41  ;;  %v2429_v51 = vld [vmem:[#allocation2 + $0x160] sm:$0x3] }
  0x4e   : > { %1346 = vperm.xlu1 %9298, %v1341_v52   ;;  %1351 = vperm.xlu0 %9297, %v1342_v55  }
  0x52   : > { %1356 = vperm.xlu1 %9298, %v1343_v56   ;;  %1557 = vperm.xlu0 %9297, %v1552_v58  }
  0x56   : > { %1562 = vperm.xlu1 %9298, %v1553_v59   ;;  %1567 = vperm.xlu0 %9297, %v1554_v60  }
  0x5a   : > { %1599 = vperm.xlu1 %9298, %v1594_v61   ;;  %1604 = vperm.xlu0 %9297, %v1595_v62   ;;  %v2680_v61 = vld [vmem:[#allocation2 + $0x180] sm:$0xff] }
  0x5e   : > { %1609 = vperm.xlu1 %9298, %v1596_v63   ;;  %1420 = vperm.xlu0 %9297, %v1552_v58  }
  0x62   : > { %1425 = vperm.xlu1 %9298, %v1553_v59   ;;  %1430 = vperm.xlu0 %9297, %v1417_v0  }
  0x66   : > { %1673 = vperm.xlu1 %9298, %v1668_v1   ;;  %1678 = vperm.xlu0 %9297, %v1669_v3  }
  0x6a   : > { %1683 = vperm.xlu1 %9298, %v1670_v4   ;;  %1810 = vperm.xlu0 %9297, %v1668_v1  }
  0x6e   : > { %1815 = vperm.xlu1 %9298, %v1669_v3   ;;  %1820 = vperm.xlu0 %9297, %v1807_v5  }
  0x72   : > { %1852 = vperm.xlu1 %9298, %v1847_v6   ;;  %1857 = vperm.xlu0 %9297, %v1848_v7  }
  0x76   : > { %1862 = vperm.xlu1 %9298, %v1849_v8   ;;  %2063 = vperm.xlu0 %9297, %v2058_v9   ;;  %v2681_v8 = vld [vmem:[#allocation2 + $0x188] sm:$0xff] }
  0x7a   : > { %2068 = vperm.xlu1 %9298, %v2059_v10   ;;  %2073 = vperm.xlu0 %9297, %v2060_v11  }
  0x7e   : > { %2105 = vperm.xlu1 %9298, %v2100_v12   ;;  %2110 = vperm.xlu0 %9297, %v2101_v13  }
  0x82   : > { %2115 = vperm.xlu1 %9298, %v2102_v14   ;;  %1926 = vperm.xlu0 %9297, %v2058_v9  }
  0x86   : > { %1931 = vperm.xlu1 %9298, %v2059_v10   ;;  %1936 = vperm.xlu0 %9297, %v1923_v15  }
  0x8a   : > { %2179 = vperm.xlu1 %9298, %v2174_v16   ;;  %2184 = vperm.xlu0 %9297, %v2175_v17  }
  0x8e   : > { %2189 = vperm.xlu1 %9298, %v2176_v18   ;;  %2316 = vperm.xlu0 %9297, %v2174_v16   ;;  %v2682_v18 = vld [vmem:[#allocation2 + $0x190] sm:$0x3] }
  0x8f   : > { %v767_v34 = vpop.permute.xlu0 %766 }
  0x90   : > { %v793_v43 = vmul.f32 %v9609_v31, %v767_v34  ;;  %v783_v55 = vmul.f32 %v9612_v42, %v767_v34  ;;  %v9650_v34 = vld [vmem:[%s11419_s4] ss:$0 sm:$0xff] }
  0x92   : > { %2321 = vperm.xlu1 %9298, %v2175_v17   ;;  %2326 = vperm.xlu0 %9297, %v2313_v19   ;;  %v800_v52 = vrot.slane %v793_v43, 1 }
  0x93   : > { %v772_v44 = vpop.permute.xlu0 %771 }
  0x94   : > { %v794_v48 = vmul.f32 %v9609_v31, %v772_v44  ;;  %v784_v56 = vmul.f32 %v9612_v42, %v772_v44 }
  0x96   : > { %2358 = vperm.xlu1 %9298, %v2353_v20   ;;  %2363 = vperm.xlu0 %9297, %v2354_v22   ;;  %v801_v53 = vrot.slane %v794_v48, 1 }
  0x98   : > { %v802_v63 = vsel %vm799_vm6, %v800_v52, %v801_v53 }
  0x99   : > { %v808_v3 = vadd.f32 %v802_v63, %v783_v55 }
  0x9a   : > { %2368 = vperm.xlu1 %9298, %v2355_v23   ;;  %2569 = vperm.xlu0 %9297, %v2564_v25   ;;  %v9641_v23 = vld [vmem:[%s11418_s3] ss:$0 sm:$0xff] }
  0x9e   : > { %2574 = vperm.xlu1 %9298, %v2565_v26   ;;  %2579 = vperm.xlu0 %9297, %v2566_v28  }
  0xa0   : > { %v777_v35 = vpop.permute.xlu1 %776 }
  0xa1   : > { %v795_v40 = vmul.f32 %v9609_v31, %v777_v35  ;;  %v785_v46 = vmul.f32 %v9612_v42, %v777_v35 }
  0xa2   : > { %2611 = vperm.xlu1 %9298, %v2606_v30   ;;  %2616 = vperm.xlu0 %9297, %v2607_v32  }
  0xa3   : > { %v803_v47 = vrot.slane %v795_v40, 1 }
  0xa5   : > { %v810_v62 = vadd.f32 %v803_v47, %v785_v46  ;;  %v804_v0 = vsel %vm799_vm6, %v801_v53, %v803_v47 }
  0xa6   : > { %2621 = vperm.xlu1 %9298, %v2608_v36   ;;  %2432 = vperm.xlu0 %9297, %v2564_v25   ;;  %v809_v4 = vadd.f32 %v804_v0, %v784_v56 }
  0xa9   : > { %v817_v50 = vpop.permute.xlu1 %816  ;;  %v822_v60 = vpop.permute.xlu0 %821 }
  0xaa   : > { %2437 = vperm.xlu1 %9298, %v2565_v26   ;;  %v843_v58 = vmul.f32 %v9615_v45, %v817_v50  ;;  %v887_v59 = vmul.f32 %v817_v50, %v9609_v31  ;;  %v833_v1 = vmul.f32 %v9619_v49, %v817_v50  ;;  %2442 = vperm.xlu0 %9297, %v2429_v51  }
  0xab   : > { %v834_v5 = vmul.f32 %v9619_v49, %v822_v60  ;;  %v844_v6 = vmul.f32 %v9615_v45, %v822_v60  ;;  %v881_v9 = vmul.f32 %v817_v50, %v9612_v42  ;;  %v888_v10 = vmul.f32 %v822_v60, %v9609_v31 }
  0xac   : > { %v836_v13 = vadd.f32 %v833_v1, %v808_v3  ;;  %v849_v14 = vrot.slane %v843_v58, 1  ;;  %v893_v15 = vrot.slane %v887_v59, 1  ;;  %v882_v26 = vmul.f32 %v822_v60, %v9612_v42 }
  0xad   : > { %v827_v7 = vpop.permute.xlu1 %826  ;;  %v850_v16 = vrot.slane %v844_v6, 1  ;;  %v911_v17 = vpop.permute.xlu0 %910  ;;  %v894_v19 = vrot.slane %v888_v10, 1  ;;  %v837_v24 = vadd.f32 %v834_v5, %v809_v4 }
  0xae   : > { %v835_v11 = vmul.f32 %v9619_v49, %v827_v7  ;;  %v845_v12 = vmul.f32 %v9615_v45, %v827_v7  ;;  %2685 = vperm.xlu1 %9298, %v2680_v61   ;;  %v889_v22 = vmul.f32 %v827_v7, %v9609_v31  ;;  %2690 = vperm.xlu0 %9297, %v2681_v8  }
  0xaf   : > { %v851_v25 = vsel %vm799_vm6, %v849_v14, %v850_v16  ;;  %v929_v27 = vmul.f32 %v911_v17, %v9615_v45  ;;  %v883_v36 = vmul.f32 %v827_v7, %v9612_v42  ;;  %v895_v37 = vsel %vm799_vm6, %v893_v15, %v894_v19 }
  0xb0   : > { %v838_v20 = vadd.f32 %v835_v11, %v810_v62  ;;  %v852_v21 = vrot.slane %v845_v12, 1  ;;  %v857_v29 = vadd.f32 %v851_v25, %v836_v13  ;;  %v896_v33 = vrot.slane %v889_v22, 1 }
  0xb1   : > { %v916_v28 = vpop.permute.xlu1 %915  ;;  %v923_v38 = vmul.f32 %v911_v17, %v9619_v49  ;;  %v921_v39 = vpop.permute.xlu0 %920  ;;  %v901_v41 = vadd.f32 %v895_v37, %v881_v9  ;;  %v935_v47 = vrot.slane %v929_v27, 1 }
  0xb2   : > { %v853_v30 = vsel %vm799_vm6, %v850_v16, %v852_v21  ;;  %v859_v32 = vadd.f32 %v852_v21, %v838_v20  ;;  %2695 = vperm.xlu1 %9298, %v2682_v18   ;;  %v897_v43 = vsel %vm799_vm6, %v894_v19, %v896_v33  ;;  %v924_v44 = vmul.f32 %v916_v28, %v9619_v49 }
  0xb3   : > { %v858_v35 = vadd.f32 %v853_v30, %v837_v24  ;;  %v866_v46 = vmul.f32 %v9641_v23, %v857_v29  ;;  %v902_v48 = vadd.f32 %v897_v43, %v882_v26  ;;  %v930_v50 = vmul.f32 %v916_v28, %v9615_v45 }
  0xb4   : > { %v868_v40 = vmul.f32 %v9641_v23, %v859_v32  ;;  %v903_v53 = vadd.f32 %v896_v33, %v883_v36  ;;  %v925_v55 = vmul.f32 %v921_v39, %v9619_v49  ;;  %v931_v56 = vmul.f32 %v921_v39, %v9615_v45 }
  0xb5   : > { %v1052_v51 = vpop.permute.xlu1 %1051  ;;  %v867_v58 = vmul.f32 %v9641_v23, %v858_v35  ;;  %v926_v59 = vadd.f32 %v923_v38, %v901_v41  ;;  %v936_v60 = vrot.slane %v930_v50, 1  ;;  %v1057_v62 = vpop.permute.xlu0 %1056  ;;  %v927_v63 = vadd.f32 %v924_v44, %v902_v48 }
  0xb6   : > { %v877_v52 = vadd.f32 %v9650_v34, %v868_v40  ;;  %v1070_v61 = vmul.f32 %v1052_v51, %v9609_v31  ;;  %v928_v0 = vadd.f32 %v925_v55, %v903_v53  ;;  %v938_v1 = vrot.slane %v931_v56, 1 }
  0xb7   : > { %v1064_v3 = vmul.f32 %v1052_v51, %v9612_v42  ;;  %v937_v4 = vsel %vm799_vm6, %v935_v47, %v936_v60  ;;  %v1065_v6 = vmul.f32 %v1057_v62, %v9612_v42  ;;  %v1071_v7 = vmul.f32 %v1057_v62, %v9609_v31 }
  0xb8   : > { %v880_v5 = vmax.f32 %v877_v52, 0.0  ;;  %v943_v9 = vadd.f32 %v937_v4, %v926_v59  ;;  %v939_v10 = vsel %vm799_vm6, %v936_v60, %v938_v1  ;;  %v945_v11 = vadd.f32 %v938_v1, %v928_v0 }
  0xb9   : > { %v1062_v8 = vpop.permute.xlu1 %1061  ;;  %v1076_v12 = vrot.slane %v1070_v61, 1  ;;  %v944_v13 = vadd.f32 %v939_v10, %v927_v63  ;;  %v1077_v14 = vrot.slane %v1071_v7, 1  ;;  %v1094_v16 = vpop.permute.xlu0 %1093  ;;  %v9672_v17 = vadd.f32 %v9650_v34, %v866_v46 }
  0xba   : > { %v1072_v15 = vmul.f32 %v1062_v8, %v9609_v31  ;;  %v946_v18 = vmul.f32 %v9641_v23, %v943_v9  ;;  %v948_v19 = vmul.f32 %v9641_v23, %v945_v11  ;;  %v1066_v20 = vmul.f32 %v1062_v8, %v9612_v42 }
  0xbb   : > { %v1112_v21 = vmul.f32 %v1094_v16, %v9615_v45  ;;  %v947_v22 = vmul.f32 %v9641_v23, %v944_v13  ;;  %v1078_v24 = vsel %vm799_vm6, %v1076_v12, %v1077_v14  ;;  %v1106_v26 = vmul.f32 %v1094_v16, %v9619_v49 }
  0xbc   : > { %v1079_v25 = vrot.slane %v1072_v15, 1  ;;  %v9682_v28 = vadd.f32 %v9650_v34, %v946_v18  ;;  %v951_v29 = vadd.f32 %v9650_v34, %v948_v19  ;;  %v1084_v30 = vadd.f32 %v1078_v24, %v1064_v3 }
  0xbd   : > { %v1099_v27 = vpop.permute.xlu1 %1098  ;;  %v9686_v32 = vadd.f32 %v9650_v34, %v867_v58  ;;  %v9689_v33 = vadd.f32 %v9650_v34, %v947_v22  ;;  %v1138_v36 = vmul.f32 %v1094_v16, %v9612_v42  ;;  %v1144_v37 = vmul.f32 %v1094_v16, %v9609_v31  ;;  %v1104_v38 = vpop.permute.xlu0 %1103 }
  0xbe   : > { %v1080_v35 = vsel %vm799_vm6, %v1077_v14, %v1079_v25  ;;  %v954_v39 = vmax.f32 %v951_v29, 0.0  ;;  %v1086_v41 = vadd.f32 %v1079_v25, %v1066_v20  ;;  %v1118_v43 = vrot.slane %v1112_v21, 1 }
  0xbf   : > { %v1085_v40 = vadd.f32 %v1080_v35, %v1065_v6  ;;  %v952_v44 = vmax.f32 %v9682_v28, 0.0  ;;  %v1109_v46 = vadd.f32 %v1106_v26, %v1084_v30  ;;  %v1107_v47 = vmul.f32 %v1099_v27, %v9619_v49 }
  0xc0   : > { %v1113_v48 = vmul.f32 %v1099_v27, %v9615_v45  ;;  %v953_v51 = vmax.f32 %v9689_v33, 0.0  ;;  %v9698_v52 = vmax.f32 %v880_v5, %v954_v39  ;;  %v1145_v53 = vmul.f32 %v1099_v27, %v9609_v31 }
  0xc1   : > { %v1168_v50 = vpop.permute.xlu1 %1167  ;;  %v1108_v55 = vmul.f32 %v1104_v38, %v9619_v49  ;;  %v1150_v56 = vrot.slane %v1144_v37, 1  ;;  %v1139_v59 = vmul.f32 %v1099_v27, %v9612_v42  ;;  %v1114_v60 = vmul.f32 %v1104_v38, %v9615_v45  ;;  %v1173_v61 = vpop.permute.xlu0 %1172 }
  0xc2   : > { %v1119_v58 = vrot.slane %v1113_v48, 1  ;;  %v1110_v62 = vadd.f32 %v1107_v47, %v1085_v40  ;;  %v1151_v63 = vrot.slane %v1145_v53, 1  ;;  %v1146_v1 = vmul.f32 %v1104_v38, %v9609_v31 }
  0xc3   : > { %v1111_v0 = vadd.f32 %v1108_v55, %v1086_v41  ;;  %v1121_v4 = vrot.slane %v1114_v60, 1  ;;  %v1140_v5 = vmul.f32 %v1104_v38, %v9612_v42  ;;  %v1186_v6 = vmul.f32 %v1168_v50, %v9615_v45 }
  0xc4   : > { %v1120_v3 = vsel %vm799_vm6, %v1118_v43, %v1119_v58  ;;  %v964_v8 = vrot.slane %v9698_v52, 1  ;;  %v1153_v10 = vrot.slane %v1146_v1, 1  ;;  %v1152_v11 = vsel %vm799_vm6, %v1150_v56, %v1151_v63 }
  0xc5   : > { %v1178_v7 = vpop.permute.xlu1 %1177  ;;  %v1126_v9 = vadd.f32 %v1120_v3, %v1109_v46  ;;  %v1122_v12 = vsel %vm799_vm6, %v1119_v58, %v1121_v4  ;;  %v1128_v13 = vadd.f32 %v1121_v4, %v1111_v0  ;;  %v1158_v14 = vadd.f32 %v1152_v11, %v1138_v36  ;;  %v1305_v16 = vpop.permute.xlu0 %1304 }
  0xc6   : > { %v1180_v15 = vmul.f32 %v1168_v50, %v9619_v49  ;;  %v1127_v18 = vadd.f32 %v1122_v12, %v1110_v62  ;;  %v1154_v19 = vsel %vm799_vm6, %v1151_v63, %v1153_v10  ;;  %v1181_v20 = vmul.f32 %v1173_v61, %v9619_v49 }
  0xc7   : > { %v1187_v21 = vmul.f32 %v1173_v61, %v9615_v45  ;;  %v9716_v22 = vmul.f32 %v9641_v23, %v1126_v9  ;;  %v1131_v24 = vmul.f32 %v9641_v23, %v1128_v13  ;;  %v1192_v25 = vrot.slane %v1186_v6, 1 }
  0xc8   : > { %v1159_v26 = vadd.f32 %v1154_v19, %v1139_v59  ;;  %v1160_v30 = vadd.f32 %v1153_v10, %v1140_v5  ;;  %v1182_v35 = vmul.f32 %v1178_v7, %v9619_v49  ;;  %v1188_v36 = vmul.f32 %v1178_v7, %v9615_v45 }
  0xc9   : > { %v1310_v27 = vpop.permute.xlu1 %1309  ;;  %v1193_v29 = vrot.slane %v1187_v21, 1  ;;  %v9722_v37 = vmul.f32 %v9641_v23, %v1127_v18  ;;  %v1134_v38 = vadd.f32 %v9650_v34, %v1131_v24  ;;  %v1183_v39 = vadd.f32 %v1180_v15, %v1158_v14  ;;  %v1315_v41 = vpop.permute.xlu0 %1314 }
  0xca   : > { %v1323_v40 = vmul.f32 %v1305_v16, %v9609_v31  ;;  %v1184_v43 = vadd.f32 %v1181_v20, %v1159_v26  ;;  %v1185_v47 = vadd.f32 %v1182_v35, %v1160_v30  ;;  %v1195_v48 = vrot.slane %v1188_v36, 1 }
  0xcb   : > { %v1194_v46 = vsel %vm799_vm6, %v1192_v25, %v1193_v29  ;;  %v1317_v53 = vmul.f32 %v1305_v16, %v9612_v42  ;;  %v1318_v55 = vmul.f32 %v1310_v27, %v9612_v42  ;;  %v1324_v56 = vmul.f32 %v1310_v27, %v9609_v31 }
  0xcc   : > { %v1200_v50 = vadd.f32 %v1194_v46, %v1183_v39  ;;  %v1196_v59 = vsel %vm799_vm6, %v1193_v29, %v1195_v48  ;;  %v1202_v60 = vadd.f32 %v1195_v48, %v1185_v47  ;;  %v878_v61 = vmax.f32 %v9672_v17, 0.0 }
  0xcd   : > { %v1347_v58 = vpop.permute.xlu1 %1346  ;;  %v879_v62 = vmax.f32 %v9686_v32, 0.0  ;;  %v1201_v0 = vadd.f32 %v1196_v59, %v1184_v43  ;;  %v1329_v1 = vrot.slane %v1323_v40, 1  ;;  %v1330_v3 = vrot.slane %v1324_v56, 1  ;;  %v1352_v4 = vpop.permute.xlu0 %1351 }
  0xce   : > { %v1203_v63 = vmul.f32 %v9641_v23, %v1200_v50  ;;  %v1205_v5 = vmul.f32 %v9641_v23, %v1202_v60  ;;  %v955_v6 = vmax.f32 %v878_v61, %v952_v44  ;;  %v1325_v9 = vmul.f32 %v1315_v41, %v9609_v31 }
  0xcf   : > { %v956_v7 = vmax.f32 %v879_v62, %v953_v51  ;;  %v1204_v32 = vmul.f32 %v9641_v23, %v1201_v0  ;;  %v1331_v10 = vsel %vm799_vm6, %v1329_v1, %v1330_v3  ;;  %v1359_v11 = vmul.f32 %v1347_v58, %v9619_v49 }
  0xd0   : > { %v9741_v17 = vadd.f32 %v9650_v34, %v1203_v63  ;;  %v1208_v13 = vadd.f32 %v9650_v34, %v1205_v5  ;;  %v1337_v28 = vadd.f32 %v1331_v10, %v1317_v53  ;;  %v961_v44 = vrot.slane %v955_v6, 1 }
  0xd1   : > { %v1357_v12 = vpop.permute.xlu1 %1356  ;;  %v962_v14 = vrot.slane %v956_v7, 1  ;;  %v1137_v33 = vmax.f32 %v1134_v38, 0.0  ;;  %v9748_v51 = vadd.f32 %v9650_v34, %v1204_v32  ;;  %v1319_v15 = vmul.f32 %v1315_v41, %v9612_v42  ;;  %v1558_v18 = vpop.permute.xlu0 %1557 }
  0xd2   : > { %v1332_v16 = vrot.slane %v1325_v9, 1  ;;  %v1211_v19 = vmax.f32 %v1208_v13, 0.0  ;;  %v1365_v24 = vmul.f32 %v1347_v58, %v9615_v45  ;;  %v1209_v25 = vmax.f32 %v9741_v17, 0.0 }
  0xd3   : > { %v963_v20 = vsel %vm799_vm6, %v961_v44, %v962_v14  ;;  %v965_v21 = vsel %vm799_vm6, %v962_v14, %v964_v8  ;;  %v1210_v35 = vmax.f32 %v9748_v51, 0.0  ;;  %v1362_v39 = vadd.f32 %v1359_v11, %v1337_v28 }
  0xd4   : > { %v968_v26 = vmax.f32 %v955_v6, %v963_v20  ;;  %v969_v27 = vmax.f32 %v956_v7, %v965_v21  ;;  %v1333_v29 = vsel %vm799_vm6, %v1330_v3, %v1332_v16  ;;  %v9759_v36 = vmax.f32 %v1137_v33, %v1211_v19 }
  0xd5   : > { %v1563_v30 = vpop.permute.xlu1 %1562  ;;  %v1338_v38 = vadd.f32 %v1333_v29, %v1318_v55  ;;  %v1339_v41 = vadd.f32 %v1332_v16, %v1319_v15  ;;  %v9762_v52 = vmul.f32 %v1347_v58, %v9609_v31  ;;  %v1360_v8 = vmul.f32 %v1352_v4, %v9619_v49  ;;  %v1568_v43 = vpop.permute.xlu0 %1567 }
  0xd6   : > { %v8736_v40 = vpack.c.bf16 %v969_v27, %v968_v26  ;;  %v1371_v46 = vrot.slane %v1365_v24, 1  ;;  %v9766_v47 = vmul.f32 %v1347_v58, %v9612_v42  ;;  %v1366_v48 = vmul.f32 %v1352_v4, %v9615_v45 }
  0xd7   : > { %v9770_v50 = vmul.f32 %v1352_v4, %v9609_v31  ;;  %v1221_v53 = vrot.slane %v9759_v36, 1  ;;  %v9774_v55 = vmul.f32 %v1352_v4, %v9612_v42  ;;  %v1361_v56 = vmul.f32 %v1357_v12, %v9619_v49 }
  0xd8   : > { %8737 = vmatpush3.bf16.msra.mxu0 %v8736_v40  ;;  %v1367_v59 = vmul.f32 %v1357_v12, %v9615_v45  ;;  %v1403_v61 = vrot.slane %v9762_v52, 1  ;;  %v1363_v58 = vadd.f32 %v1360_v8, %v1338_v38  ;;  %v1372_v62 = vrot.slane %v1366_v48, 1 }
  0xd9   : > { %v1600_v60 = vpop.permute.xlu1 %1599  ;;  %v9780_v63 = vmul.f32 %v1357_v12, %v9609_v31  ;;  %8738 = vmatprep.subr.bf16.mxu0 %v9314_v57  ;;  %v1404_v0 = vrot.slane %v9770_v50, 1  ;;  %v1364_v1 = vadd.f32 %v1361_v56, %v1339_v41  ;;  %v1576_v4 = vmul.f32 %v1558_v18, %v9609_v31  ;;  %v1605_v5 = vpop.permute.xlu0 %1604 }
  0xda   : > { %v1374_v3 = vrot.slane %v1367_v59, 1  ;;  %v1373_v6 = vsel %vm799_vm6, %v1371_v46, %v1372_v62  ;;  %v9789_v7 = vmul.f32 %v1357_v12, %v9612_v42  ;;  %v1570_v9 = vmul.f32 %v1558_v18, %v9612_v42 }
  0xdb   : > { %7962 = vmatmul.mubr.msk.f32.vlgmr.msra.gmra.mrb[2].mxu0 %vm970_vm7, %v9622_v54  ;;  %v1577_v32 = vmul.f32 %v1563_v30, %v9609_v31  ;;  %v1406_v13 = vrot.slane %v9780_v63, 1  ;;  %v1571_v28 = vmul.f32 %v1563_v30, %v9612_v42  ;;  %v9798_v14 = vadd.f32 %v1373_v6, %v1362_v39 }
  0xdc   : > { %v1375_v10 = vsel %vm799_vm6, %v1372_v62, %v1374_v3  ;;  %v1381_v11 = vadd.f32 %v1374_v3, %v1364_v1  ;;  %7968 = vmatprep.mubr.msk.f32.mxu0 %vm9313_vm4, %v9312_v2  ;;  %v1582_v33 = vrot.slane %v1576_v4, 1  ;;  %v1578_v15 = vmul.f32 %v1568_v43, %v9609_v31 }
  0xdd   : > { %v1610_v44 = vpop.permute.xlu1 %1609  ;;  %v1583_v12 = vrot.slane %v1577_v32, 1  ;;  %v9801_v16 = vadd.f32 %v1375_v10, %v1363_v58  ;;  %v1572_v19 = vmul.f32 %v1568_v43, %v9612_v42  ;;  %v1618_v20 = vmul.f32 %v1600_v60, %v9615_v45  ;;  %v1421_v21 = vpop.permute.xlu0 %1420 }
  0xde   : > { %v9804_v18 = vmul.f32 %v9641_v23, %v1381_v11  ;;  %v1585_v26 = vrot.slane %v1578_v15, 1  ;;  %v1612_v27 = vmul.f32 %v1600_v60, %v9619_v49  ;;  %v9811_v29 = vmul.f32 %v1600_v60, %v9612_v42 }
  0xdf   : > { %v1584_v24 = vsel %vm799_vm6, %v1582_v33, %v1583_v12  ;;  %v9814_v38 = vmul.f32 %v1600_v60, %v9609_v31  ;;  %v1613_v39 = vmul.f32 %v1605_v5, %v9619_v49  ;;  %v1619_v40 = vmul.f32 %v1605_v5, %v9615_v45 }
  0xe0   : > { %v1590_v30 = vadd.f32 %v1584_v24, %v1570_v9  ;;  %v1586_v8 = vsel %vm799_vm6, %v1583_v12, %v1585_v26  ;;  %v1592_v43 = vadd.f32 %v1585_v26, %v1572_v19  ;;  %v1624_v46 = vrot.slane %v1618_v20, 1 }
  0xe1   : > { %v1426_v41 = vpop.permute.xlu1 %1425  ;;  %v9820_v48 = vmul.f32 %v1605_v5, %v9612_v42  ;;  %v1591_v56 = vadd.f32 %v1586_v8, %v1571_v28  ;;  %v1625_v59 = vrot.slane %v1619_v40, 1  ;;  %v1651_v58 = vmul.f32 %v1605_v5, %v9609_v31  ;;  %v1431_v62 = vpop.permute.xlu0 %1430 }
  0xe2   : > { %v1132_v60 = vadd.f32 %v9650_v34, %v9716_v22  ;;  %v1615_v1 = vadd.f32 %v1612_v27, %v1590_v30  ;;  %v1133_v3 = vadd.f32 %v9650_v34, %v9722_v37  ;;  %v1614_v4 = vmul.f32 %v1610_v44, %v9619_v49 }
  0xe3   : > { %v1620_v6 = vmul.f32 %v1610_v44, %v9615_v45  ;;  %v1656_v9 = vrot.slane %v9814_v38, 1  ;;  %v1616_v32 = vadd.f32 %v1613_v39, %v1591_v56  ;;  %v1626_v10 = vsel %vm799_vm6, %v1624_v46, %v1625_v59 }
  0xe4   : > { %v1135_v11 = vmax.f32 %v1132_v60, 0.0  ;;  %v1632_v5 = vadd.f32 %v1626_v10, %v1615_v1  ;;  %v1136_v33 = vmax.f32 %v1133_v3, 0.0  ;;  %v1617_v12 = vadd.f32 %v1614_v4, %v1592_v43 }
  0xe5   : > { %v1674_v28 = vpop.permute.xlu1 %1673  ;;  %v1627_v22 = vrot.slane %v1620_v6, 1  ;;  %v9834_v37 = vmul.f32 %v1610_v44, %v9609_v31  ;;  %v1405_v19 = vsel %vm799_vm6, %v1403_v61, %v1404_v0  ;;  %v1433_v20 = vmul.f32 %v1421_v21, %v9619_v49  ;;  %v1679_v24 = vpop.permute.xlu0 %1678 }
  0xe6   : > { %v1212_v15 = vmax.f32 %v1135_v11, %v1209_v25  ;;  %v1657_v26 = vrot.slane %v1651_v58, 1  ;;  %v1213_v27 = vmax.f32 %v1136_v33, %v1210_v35  ;;  %v9846_v25 = vmul.f32 %v9641_v23, %v1632_v5 }
  0xe7   : > { %v1628_v30 = vsel %vm799_vm6, %v1625_v59, %v1627_v22  ;;  %v1634_v17 = vadd.f32 %v1627_v22, %v1617_v12  ;;  %v1646_v39 = vmul.f32 %v1610_v44, %v9612_v42  ;;  %v1411_v52 = vadd.f32 %v1405_v19, %v9766_v47 }
  0xe8   : > { %v1633_v38 = vadd.f32 %v1628_v30, %v1616_v32  ;;  %v1218_v61 = vrot.slane %v1212_v15, 1  ;;  %v1219_v8 = vrot.slane %v1213_v27, 1  ;;  %v1407_v51 = vsel %vm799_vm6, %v1404_v0, %v1406_v13 }
  0xe9   : > { %v1684_v40 = vpop.permute.xlu1 %1683  ;;  %v1637_v43 = vmul.f32 %v9641_v23, %v1634_v17  ;;  %v1659_v46 = vrot.slane %v9834_v37, 1  ;;  %v1436_v56 = vadd.f32 %v1433_v20, %v1411_v52  ;;  %v1439_v44 = vmul.f32 %v1421_v21, %v9615_v45  ;;  %v1811_v47 = vpop.permute.xlu0 %1810 }
  0xea   : > { %v9857_v35 = vmul.f32 %v9641_v23, %v1633_v38  ;;  %v1220_v59 = vsel %vm799_vm6, %v1218_v61, %v1219_v8  ;;  %v1222_v58 = vsel %vm799_vm6, %v1219_v8, %v1221_v53  ;;  %v1412_v60 = vadd.f32 %v1407_v51, %v9774_v55 }
  0xeb   : > { %v1434_v50 = vmul.f32 %v1426_v41, %v9619_v49  ;;  %v1225_v0 = vmax.f32 %v1212_v15, %v1220_v59  ;;  %v1226_v1 = vmax.f32 %v1213_v27, %v1222_v58  ;;  %v9868_v3 = vadd.f32 %v9650_v34, %v1637_v43 }
  0xec   : > { %v1440_v4 = vmul.f32 %v1426_v41, %v9615_v45  ;;  %v1413_v21 = vadd.f32 %v1406_v13, %v9789_v7  ;;  %v1435_v36 = vmul.f32 %v1431_v62, %v9619_v49  ;;  %v1441_v53 = vmul.f32 %v1431_v62, %v9615_v45 }
  0xed   : > { %v1816_v6 = vpop.permute.xlu1 %1815  ;;  %v1658_v55 = vsel %vm799_vm6, %v1656_v9, %v1657_v26  ;;  %v8739_v32 = vpack.c.bf16 %v1226_v1, %v1225_v0  ;;  %v1445_v10 = vrot.slane %v1439_v44, 1  ;;  %v1686_v5 = vmul.f32 %v1674_v28, %v9619_v49  ;;  %v1821_v33 = vpop.permute.xlu0 %1820 }
  0xee   : > { %v1446_v11 = vrot.slane %v1440_v4, 1  ;;  %v1438_v12 = vadd.f32 %v1435_v36, %v1413_v21  ;;  %v1448_v22 = vrot.slane %v1441_v53, 1  ;;  %v1692_v41 = vmul.f32 %v1674_v28, %v9615_v45 }
  0xef   : > { %v1660_v15 = vsel %vm799_vm6, %v1657_v26, %v1659_v46  ;;  %8740 = vmatpush3.bf16.msra.mxu0 %v8739_v32  ;;  %v1437_v63 = vadd.f32 %v1434_v50, %v1412_v60  ;;  %v1664_v13 = vadd.f32 %v1658_v55, %v9811_v29  ;;  %v1687_v62 = vmul.f32 %v1679_v24, %v9619_v49 }
  0xf0   : > { %v1447_v7 = vsel %vm799_vm6, %v1445_v10, %v1446_v11  ;;  %v1449_v19 = vsel %vm799_vm6, %v1446_v11, %v1448_v22  ;;  %v1455_v20 = vadd.f32 %v1448_v22, %v1438_v12  ;;  %v1665_v27 = vadd.f32 %v1660_v15, %v9820_v48  ;;  %8744 = vmatprep.subr.bf16.mxu0 %v9314_v57 }
  0xf1   : > { %v1853_v9 = vpop.permute.xlu1 %1852  ;;  %v1453_v37 = vadd.f32 %v1447_v7, %v1436_v56  ;;  %v1454_v28 = vadd.f32 %v1449_v19, %v1437_v63  ;;  %v1689_v30 = vadd.f32 %v1686_v5, %v1664_v13  ;;  %v1698_v26 = vrot.slane %v1692_v41, 1  ;;  %v9887_v38 = vpop.permute.xlu0 %1857 }
  0xf2   : > { %v1693_v17 = vmul.f32 %v1679_v24, %v9615_v45  ;;  %7969 = vmatmul.mubr.msk.f32.vlgmr.msra.gmra.mrb[4].mxu0 %vm970_vm7, %v9622_v54  ;;  %v1458_v29 = vmul.f32 %v9641_v23, %v1455_v20  ;;  %v1690_v52 = vadd.f32 %v1687_v62, %v1665_v27  ;;  %v1666_v61 = vadd.f32 %v1659_v46, %v1646_v39 }
  0xf3   : > { %v1688_v8 = vmul.f32 %v1684_v40, %v9619_v49  ;;  %v9894_v48 = vmul.f32 %v9641_v23, %v1453_v37  ;;  %v1643_v51 = vmax.f32 %v9868_v3, 0.0  ;;  %v1694_v56 = vmul.f32 %v1684_v40, %v9615_v45  ;;  %7982 = vmatprep.mubr.msk.f32.mxu0 %vm9313_vm4, %v9312_v2 }
  0xf4   : > { %v1699_v43 = vrot.slane %v1693_v17, 1  ;;  %v9901_v44 = vmul.f32 %v9641_v23, %v1454_v28  ;;  %v1823_v39 = vmul.f32 %v1811_v47, %v9612_v42  ;;  %v1829_v46 = vmul.f32 %v1811_v47, %v9609_v31 }
  0xf5   : > { %v1863_v24 = vpop.permute.xlu1 %1862  ;;  %v1691_v59 = vadd.f32 %v1688_v8, %v1666_v61  ;;  %v9906_v58 = vadd.f32 %v9650_v34, %v1458_v29  ;;  %v1701_v50 = vrot.slane %v1694_v56, 1  ;;  %v1830_v40 = vmul.f32 %v1816_v6, %v9609_v31  ;;  %v2064_v0 = vpop.permute.xlu0 %2063 }
  0xf6   : > { %v1700_v60 = vsel %vm799_vm6, %v1698_v26, %v1699_v43  ;;  %v1824_v3 = vmul.f32 %v1816_v6, %v9612_v42  ;;  %v1825_v4 = vmul.f32 %v1821_v33, %v9612_v42  ;;  %v1831_v21 = vmul.f32 %v1821_v33, %v9609_v31 }
  0xf7   : > { %v1706_v1 = vadd.f32 %v1700_v60, %v1689_v30  ;;  %v1702_v36 = vsel %vm799_vm6, %v1699_v43, %v1701_v50  ;;  %v1708_v53 = vadd.f32 %v1701_v50, %v1691_v59  ;;  %v1835_v47 = vrot.slane %v1829_v46, 1 }
  0xf8   : > { %v1836_v55 = vrot.slane %v1830_v40, 1  ;;  %v1707_v11 = vadd.f32 %v1702_v36, %v1690_v52  ;;  %v1838_v5 = vrot.slane %v1831_v21, 1  ;;  %v1871_v12 = vmul.f32 %v1853_v9, %v9615_v45 }
  0xf9   : > { %v2069_v32 = vpop.permute.xlu1 %2068  ;;  %v1709_v10 = vmul.f32 %v9641_v23, %v1706_v1  ;;  %v1711_v22 = vmul.f32 %v9641_v23, %v1708_v53  ;;  %v1865_v41 = vmul.f32 %v1853_v9, %v9619_v49  ;;  %v9920_v33 = vmul.f32 %v1853_v9, %v9609_v31  ;;  %v9932_v27 = vpop.permute.xlu0 %2073 }
  0xfa   : > { %v1837_v6 = vsel %vm799_vm6, %v1835_v47, %v1836_v55  ;;  %v1710_v63 = vmul.f32 %v9641_v23, %v1707_v11  ;;  %v1839_v13 = vsel %vm799_vm6, %v1836_v55, %v1838_v5  ;;  %v1464_v62 = vmax.f32 %v9906_v58, 0.0 }
  0xfb   : > { %v9923_v15 = vadd.f32 %v9650_v34, %v1709_v10  ;;  %v1843_v7 = vadd.f32 %v1837_v6, %v1823_v39  ;;  %v1714_v37 = vadd.f32 %v9650_v34, %v1711_v22  ;;  %v1844_v19 = vadd.f32 %v1839_v13, %v1824_v3 }
  0xfc   : > { %v9930_v20 = vmul.f32 %v1853_v9, %v9612_v42  ;;  %v9936_v30 = vadd.f32 %v9650_v34, %v1710_v63  ;;  %v1845_v26 = vadd.f32 %v1838_v5, %v1825_v4  ;;  %v1877_v17 = vrot.slane %v1871_v12, 1 }
  0xfd   : > { %v1715_v28 = vmax.f32 %v9923_v15, 0.0  ;;  %v1717_v29 = vmax.f32 %v1714_v37, 0.0  ;;  %v1868_v52 = vadd.f32 %v1865_v41, %v1843_v7  ;;  %v1866_v61 = vmul.f32 %v9887_v38, %v9619_v49  ;;  %v2106_v43 = vpop.permute.xlu1 %2105  ;;  %v9965_v47 = vpop.permute.xlu0 %2110 }
  0xfe   : > { %v1872_v8 = vmul.f32 %v9887_v38, %v9615_v45  ;;  %v1909_v9 = vrot.slane %v9920_v33, 1  ;;  %v9945_v56 = vmul.f32 %v9887_v38, %v9609_v31  ;;  %v1867_v59 = vmul.f32 %v1863_v24, %v9619_v49 }
  0xff   : > { %v1873_v39 = vmul.f32 %v1863_v24, %v9615_v45  ;;  %v1716_v46 = vmax.f32 %v9936_v30, 0.0  ;;  %v9950_v58 = vmax.f32 %v1643_v51, %v1717_v29  ;;  %v9954_v50 = vmul.f32 %v9887_v38, %v9612_v42 }
 0x100   : > { %v1878_v60 = vrot.slane %v1872_v8, 1  ;;  %v1869_v40 = vadd.f32 %v1866_v61, %v1844_v19  ;;  %v1870_v1 = vadd.f32 %v1867_v59, %v1845_v26  ;;  %v9957_v4 = vmul.f32 %v1863_v24, %v9609_v31 }
 0x101   : > { %v1880_v3 = vrot.slane %v1873_v39, 1  ;;  %v1910_v36 = vrot.slane %v9945_v56, 1  ;;  %v9962_v53 = vmul.f32 %v1863_v24, %v9612_v42  ;;  %v2082_v51 = vmul.f32 %v2064_v0, %v9609_v31  ;;  %v9972_v41 = vpop.permute.xlu1 %2115 }
 0x102   : > { %v1879_v21 = vsel %vm799_vm6, %v1877_v17, %v1878_v60  ;;  %v1727_v38 = vrot.slane %v9950_v58, 1  ;;  %v1912_v12 = vrot.slane %v9957_v4, 1  ;;  %v2076_v22 = vmul.f32 %v2064_v0, %v9612_v42 }
 0x103   : > { %v1885_v55 = vadd.f32 %v1879_v21, %v1868_v52  ;;  %v1881_v10 = vsel %vm799_vm6, %v1878_v60, %v1880_v3  ;;  %v1887_v11 = vadd.f32 %v1880_v3, %v1870_v1  ;;  %v2083_v6 = vmul.f32 %v2069_v32, %v9609_v31 }
 0x104   : > { %v1886_v5 = vadd.f32 %v1881_v10, %v1869_v40  ;;  %v2088_v24 = vrot.slane %v2082_v51, 1  ;;  %v2077_v63 = vmul.f32 %v2069_v32, %v9612_v42  ;;  %v1382_v7 = vmul.f32 %v9641_v23, %v9798_v14 }
 0x105   : > { %v1383_v13 = vmul.f32 %v9641_v23, %v9801_v16  ;;  %v9980_v37 = vmul.f32 %v9641_v23, %v1885_v55  ;;  %v2089_v19 = vrot.slane %v2083_v6, 1  ;;  %v1387_v0 = vadd.f32 %v9650_v34, %v9804_v18  ;;  %v9995_v18 = vpop.permute.xlu0 %1926  ;;  %v10001_v21 = vpop.permute.xlu1 %1931 }
 0x106   : > { %v1459_v26 = vadd.f32 %v9650_v34, %v9894_v48  ;;  %v1890_v17 = vmul.f32 %v9641_v23, %v1887_v11  ;;  %v1385_v32 = vadd.f32 %v9650_v34, %v1382_v7  ;;  %v1460_v14 = vadd.f32 %v9650_v34, %v9901_v44 }
 0x107   : > { %v1386_v29 = vadd.f32 %v9650_v34, %v1383_v13  ;;  %v9992_v16 = vmul.f32 %v9641_v23, %v1886_v5  ;;  %v2090_v52 = vsel %vm799_vm6, %v2088_v24, %v2089_v19  ;;  %v1390_v61 = vmax.f32 %v1387_v0, 0.0 }
 0x108   : > { %v1462_v8 = vmax.f32 %v1459_v26, 0.0  ;;  %v2096_v59 = vadd.f32 %v2090_v52, %v2076_v22  ;;  %v1388_v48 = vmax.f32 %v1385_v32, 0.0  ;;  %v1463_v60 = vmax.f32 %v1460_v14, 0.0 }
 0x109   : > { %v1389_v39 = vmax.f32 %v1386_v29, 0.0  ;;  %v1467_v40 = vmax.f32 %v1390_v61, %v1464_v62  ;;  %v2084_v1 = vmul.f32 %v9932_v27, %v9609_v31  ;;  %v2118_v3 = vmul.f32 %v2106_v43, %v9619_v49  ;;  %v10020_v14 = vpop.permute.xlu0 %1936 }
 0x10a   : > { %v2124_v44 = vmul.f32 %v2106_v43, %v9615_v45  ;;  %v10004_v51 = vadd.f32 %v9650_v34, %v1890_v17  ;;  %v1465_v55 = vmax.f32 %v1388_v48, %v1462_v8  ;;  %v10007_v11 = vmul.f32 %v2106_v43, %v9609_v31 }
 0x10b   : > { %v1466_v10 = vmax.f32 %v1389_v39, %v1463_v60  ;;  %v1474_v5 = vrot.slane %v1467_v40, 1  ;;  %v2078_v62 = vmul.f32 %v9932_v27, %v9612_v42  ;;  %v2091_v22 = vrot.slane %v2084_v1, 1  ;;  %v10026_v39 = vpop.permute.xlu1 %2179 }
 0x10c   : > { %v10012_v6 = vmul.f32 %v2106_v43, %v9612_v42  ;;  %v1471_v24 = vrot.slane %v1465_v55, 1  ;;  %v2121_v13 = vadd.f32 %v2118_v3, %v2096_v59  ;;  %v2130_v0 = vrot.slane %v2124_v44, 1 }
 0x10d   : > { %v1472_v7 = vrot.slane %v1466_v10, 1  ;;  %v2092_v26 = vsel %vm799_vm6, %v2089_v19, %v2091_v22  ;;  %v2162_v17 = vrot.slane %v10007_v11, 1  ;;  %v2119_v32 = vmul.f32 %v9965_v47, %v9619_v49 }
 0x10e   : > { %v2125_v29 = vmul.f32 %v9965_v47, %v9615_v45  ;;  %v2097_v52 = vadd.f32 %v2092_v26, %v2077_v63  ;;  %v2098_v61 = vadd.f32 %v2091_v22, %v2078_v62  ;;  %v1638_v19 = vadd.f32 %v9650_v34, %v9846_v25 }
 0x10f   : > { %v1473_v27 = vsel %vm799_vm6, %v1471_v24, %v1472_v7  ;;  %v1475_v43 = vsel %vm799_vm6, %v1472_v7, %v1474_v5  ;;  %v10030_v60 = vmul.f32 %v9965_v47, %v9612_v42  ;;  %v10034_v40 = vmul.f32 %v9965_v47, %v9609_v31 }
 0x110   : > { %v1478_v8 = vmax.f32 %v1465_v55, %v1473_v27  ;;  %v1479_v59 = vmax.f32 %v1466_v10, %v1475_v43  ;;  %v2131_v48 = vrot.slane %v2125_v29, 1  ;;  %v1639_v63 = vadd.f32 %v9650_v34, %v9857_v35  ;;  %v10069_v27 = vpop.permute.xlu1 %2189 }
 0x111   : > { %v2120_v1 = vmul.f32 %v9972_v41, %v9619_v49  ;;  %v1641_v25 = vmax.f32 %v1638_v19, 0.0  ;;  %v2126_v55 = vmul.f32 %v9972_v41, %v9615_v45  ;;  %v2122_v10 = vadd.f32 %v2119_v32, %v2097_v52 }
 0x112   : > { %v8742_v3 = vpack.c.bf16 %v1479_v59, %v1478_v8  ;;  %v2132_v44 = vsel %vm799_vm6, %v2130_v0, %v2131_v48  ;;  %v1642_v62 = vmax.f32 %v1639_v63, 0.0  ;;  %v10047_v35 = vmul.f32 %v9972_v41, %v9609_v31  ;;  %v2185_v0 = vpop.permute.xlu0 %2184 }
 0x113   : > { %v2138_v5 = vadd.f32 %v2132_v44, %v2121_v13  ;;  %v2123_v22 = vadd.f32 %v2120_v1, %v2098_v61  ;;  %v1718_v47 = vmax.f32 %v1641_v25, %v1715_v28  ;;  %v2133_v24 = vrot.slane %v2126_v55, 1 }
 0x114   : > { %8743 = vmatpush3.bf16.msra.mxu1 %v8742_v3  ;;  %v1911_v7 = vsel %vm799_vm6, %v1909_v9, %v1910_v36  ;;  %v2163_v13 = vrot.slane %v10034_v40, 1  ;;  %v1719_v26 = vmax.f32 %v1642_v62, %v1716_v46  ;;  %v10059_v15 = vmul.f32 %v9972_v41, %v9612_v42 }
 0x115   : > { %v1939_v28 = vmul.f32 %v9995_v18, %v9619_v49  ;;  %8747 = vmatprep.subr.bf16.mxu1 %v9314_v57  ;;  %v10065_v32 = vmul.f32 %v9641_v23, %v2138_v5  ;;  %v2134_v33 = vsel %vm799_vm6, %v2131_v48, %v2133_v24  ;;  %v2140_v9 = vadd.f32 %v2133_v24, %v2123_v22 }
 0x116   : > { %v1917_v29 = vadd.f32 %v1911_v7, %v9930_v20  ;;  %v1724_v30 = vrot.slane %v1718_v47, 1  ;;  %v1725_v46 = vrot.slane %v1719_v26, 1  ;;  %v2139_v43 = vadd.f32 %v2134_v33, %v2122_v10  ;;  %v2317_v44 = vpop.permute.xlu0 %2316 }
 0x117   : > { %v1945_v41 = vmul.f32 %v9995_v18, %v9615_v45  ;;  %7976 = vmatmul.mubr.msk.f32.vlgmr.msra.gmra.mrb[0].mxu1 %vm970_vm7, %v9622_v54  ;;  %v2143_v52 = vmul.f32 %v9641_v23, %v2140_v9  ;;  %v2165_v61 = vrot.slane %v10047_v35, 1  ;;  %v1946_v59 = vmul.f32 %v10001_v21, %v9615_v45 }
 0x118   : > { %v1942_v8 = vadd.f32 %v1939_v28, %v1917_v29  ;;  %7989 = vmatprep.mubr.msk.f32.mxu1 %vm9313_vm4, %v9312_v2  ;;  %v1726_v20 = vsel %vm799_vm6, %v1724_v30, %v1725_v46  ;;  %v1728_v18 = vsel %vm799_vm6, %v1725_v46, %v1727_v38  ;;  %v1913_v48 = vsel %vm799_vm6, %v1910_v36, %v1912_v12  ;;  %v10135_v29 = vld [vmem:[%s11419_s4] ss:$0 sm:$0xff] }
 0x119   : > { %v1940_v19 = vmul.f32 %v10001_v21, %v9619_v49  ;;  %v1731_v40 = vmax.f32 %v1718_v47, %v1726_v20  ;;  %v1732_v63 = vmax.f32 %v1719_v26, %v1728_v18  ;;  %v10093_v1 = vmul.f32 %v9641_v23, %v2139_v43  ;;  %v10127_v26 = vpop.f32.mrb[0].mxu0 }
 0x11a   : > { %v1951_v3 = vrot.slane %v1945_v41, 1  ;;  %v10096_v58 = vadd.f32 %v9650_v34, %v2143_v52  ;;  %v1952_v38 = vrot.slane %v1946_v59, 1  ;;  %v1919_v56 = vadd.f32 %v1912_v12, %v9962_v53  ;;  %v2322_v34 = vpop.permute.xlu1 %2321  ;;  %v7956_v9 = vpop.f32.mrb[1].mxu0 }
 0x11b   : > { %v1941_v36 = vmul.f32 %v10020_v14, %v9619_v49  ;;  %v8745_v25 = vpack.c.bf16 %v1732_v63, %v1731_v40  ;;  %v1918_v21 = vadd.f32 %v1913_v48, %v9954_v50  ;;  %v1947_v23 = vmul.f32 %v10020_v14, %v9615_v45 }
 0x11c   : > { %v2164_v55 = vsel %vm799_vm6, %v2162_v17, %v2163_v13  ;;  %v1953_v10 = vsel %vm799_vm6, %v1951_v3, %v1952_v38  ;;  %v2192_v53 = vmul.f32 %v10026_v39, %v9619_v49  ;;  %v2198_v50 = vmul.f32 %v10026_v39, %v9615_v45 }
 0x11d   : > { %v1944_v5 = vadd.f32 %v1941_v36, %v1919_v56  ;;  %v2170_v4 = vadd.f32 %v2164_v55, %v10012_v6  ;;  %8746 = vmatpush3.bf16.msra.mxu0 %v8745_v25  ;;  %v1959_v12 = vadd.f32 %v1953_v10, %v1942_v8  ;;  %v1954_v62 = vrot.slane %v1947_v23, 1  ;;  %v10123_v6 = vld [vmem:[%s11418_s3] ss:$0 sm:$0xff] }
 0x11e   : > { %v2166_v14 = vsel %vm799_vm6, %v2163_v13, %v2165_v61  ;;  %v1943_v11 = vadd.f32 %v1940_v19, %v1918_v21  ;;  %v1896_v17 = vmax.f32 %v10004_v51, 0.0  ;;  %v2193_v22 = vmul.f32 %v2185_v0, %v9619_v49  ;;  %8750 = vmatprep.subr.bf16.mxu0 %v9314_v57  ;;  %v2327_v13 = vpop.permute.xlu0 %2326  ;;  %v2359_v41 = vpop.permute.xlu1 %2358 }
 0x11f   : > { %v2199_v47 = vmul.f32 %v2185_v0, %v9615_v45  ;;  %v1962_v24 = vmul.f32 %v10123_v6, %v1959_v12  ;;  %v1955_v39 = vsel %vm799_vm6, %v1952_v38, %v1954_v62  ;;  %v1961_v35 = vadd.f32 %v1954_v62, %v1944_v5 }
 0x120   : > { %v2195_v7 = vadd.f32 %v2192_v53, %v2170_v4  ;;  %v1960_v51 = vadd.f32 %v1955_v39, %v1943_v11  ;;  %v2204_v28 = vrot.slane %v2198_v50, 1  ;;  %v2171_v0 = vadd.f32 %v2166_v14, %v10030_v60  ;;  %7983 = vmatmul.mubr.msk.f32.vlgmr.msra.gmra.mrb[6].mxu0 %vm970_vm7, %v9622_v54 }
 0x121   : > { %v2205_v33 = vrot.slane %v2199_v47, 1  ;;  %v10138_v30 = vadd.f32 %v10135_v29, %v1962_v24  ;;  %v1964_v46 = vmul.f32 %v10123_v6, %v1961_v35  ;;  %v2172_v43 = vadd.f32 %v2165_v61, %v10059_v15  ;;  %7996 = vmatprep.mubr.msk.f32.mxu0 %vm9313_vm4, %v9312_v2 }
 0x122   : > { %v2194_v60 = vmul.f32 %v10069_v27, %v9619_v49  ;;  %v1963_v52 = vmul.f32 %v10123_v6, %v1960_v51  ;;  %v2196_v8 = vadd.f32 %v2193_v22, %v2171_v0  ;;  %v2200_v20 = vmul.f32 %v10069_v27, %v9615_v45  ;;  %v2364_v25 = vpop.permute.xlu0 %2363  ;;  %v2369_v53 = vpop.permute.xlu1 %2368 }
 0x123   : > { %v2206_v59 = vsel %vm799_vm6, %v2204_v28, %v2205_v33  ;;  %v1967_v18 = vadd.f32 %v10135_v29, %v1964_v46  ;;  %v2149_v15 = vmax.f32 %v10096_v58, 0.0  ;;  %v1968_v19 = vmax.f32 %v10138_v30, 0.0 }
 0x124   : > { %v2212_v48 = vadd.f32 %v2206_v59, %v2195_v7  ;;  %v2197_v61 = vadd.f32 %v2194_v60, %v2172_v43  ;;  %v2207_v40 = vrot.slane %v2200_v20, 1  ;;  %v2329_v63 = vmul.f32 %v2317_v44, %v9612_v42 }
 0x125   : > { %v2335_v3 = vmul.f32 %v2317_v44, %v9609_v31  ;;  %v10156_v38 = vadd.f32 %v10135_v29, %v1963_v52  ;;  %v1970_v56 = vmax.f32 %v1967_v18, 0.0  ;;  %v2336_v27 = vmul.f32 %v2322_v34, %v9609_v31 }
 0x126   : > { %v2215_v36 = vmul.f32 %v10123_v6, %v2212_v48  ;;  %v2208_v21 = vsel %vm799_vm6, %v2205_v33, %v2207_v40  ;;  %v2214_v58 = vadd.f32 %v2207_v40, %v2197_v61  ;;  %v2330_v55 = vmul.f32 %v2322_v34, %v9612_v42  ;;  %v2570_v0 = vpop.permute.xlu0 %2569  ;;  %v2575_v20 = vpop.permute.xlu1 %2574 }
 0x127   : > { %v2341_v23 = vrot.slane %v2335_v3, 1  ;;  %v10162_v10 = vmax.f32 %v1896_v17, %v1970_v56  ;;  %v2213_v44 = vadd.f32 %v2208_v21, %v2196_v8  ;;  %v2342_v4 = vrot.slane %v2336_v27, 1 }
 0x128   : > { %v10165_v5 = vadd.f32 %v10135_v29, %v2215_v36  ;;  %v2217_v12 = vmul.f32 %v10123_v6, %v2214_v58  ;;  %v2331_v62 = vmul.f32 %v2327_v13, %v9612_v42  ;;  %v2337_v50 = vmul.f32 %v2327_v13, %v9609_v31 }
 0x129   : > { %v2377_v14 = vmul.f32 %v2359_v41, %v9615_v45  ;;  %v1969_v11 = vmax.f32 %v10156_v38, 0.0  ;;  %v2216_v34 = vmul.f32 %v10123_v6, %v2213_v44  ;;  %v2343_v17 = vsel %vm799_vm6, %v2341_v23, %v2342_v4 }
 0x12a   : > { %v2371_v22 = vmul.f32 %v2359_v41, %v9619_v49  ;;  %v1980_v47 = vrot.slane %v10162_v10, 1  ;;  %v2220_v24 = vadd.f32 %v10135_v29, %v2217_v12  ;;  %v2349_v39 = vadd.f32 %v2343_v17, %v2329_v63 }
 0x12b   : > { %v2344_v35 = vrot.slane %v2337_v50, 1  ;;  %v2221_v7 = vmax.f32 %v10165_v5, 0.0  ;;  %v10179_v13 = vadd.f32 %v10135_v29, %v2216_v34  ;;  %v2383_v51 = vrot.slane %v2377_v14, 1 }
 0x12c   : > { %v10182_v28 = vmul.f32 %v2359_v41, %v9609_v31  ;;  %v2223_v33 = vmax.f32 %v2220_v24, 0.0  ;;  %v10186_v46 = vmul.f32 %v2359_v41, %v9612_v42  ;;  %v2372_v43 = vmul.f32 %v2364_v25, %v9619_v49 }
 0x12d   : > { %v2345_v9 = vsel %vm799_vm6, %v2342_v4, %v2344_v35  ;;  %v2351_v52 = vadd.f32 %v2344_v35, %v2331_v62  ;;  %v2374_v8 = vadd.f32 %v2371_v22, %v2349_v39  ;;  %v2378_v59 = vmul.f32 %v2364_v25, %v9615_v45  ;;  %v2580_v4 = vpop.permute.xlu0 %2579  ;;  %v2612_v22 = vpop.permute.xlu1 %2611 }
 0x12e   : > { %v2350_v60 = vadd.f32 %v2345_v9, %v2330_v55  ;;  %v2222_v18 = vmax.f32 %v10179_v13, 0.0  ;;  %v10191_v48 = vmax.f32 %v2149_v15, %v2223_v33  ;;  %v10194_v61 = vmul.f32 %v2364_v25, %v9609_v31 }
 0x12f   : > { %v2373_v40 = vmul.f32 %v2369_v53, %v9619_v49  ;;  %v2415_v41 = vrot.slane %v10182_v28, 1  ;;  %v2384_v63 = vrot.slane %v2378_v59, 1  ;;  %v10199_v3 = vmul.f32 %v2364_v25, %v9612_v42 }
 0x130   : > { %v2379_v56 = vmul.f32 %v2369_v53, %v9615_v45  ;;  %v2375_v36 = vadd.f32 %v2372_v43, %v2350_v60  ;;  %v10203_v21 = vmul.f32 %v2369_v53, %v9612_v42  ;;  %v10206_v15 = vmul.f32 %v2369_v53, %v9609_v31 }
 0x131   : > { %v2376_v27 = vadd.f32 %v2373_v40, %v2351_v52  ;;  %v2233_v58 = vrot.slane %v10191_v48, 1  ;;  %v2385_v23 = vsel %vm799_vm6, %v2383_v51, %v2384_v63  ;;  %v2588_v44 = vmul.f32 %v2570_v0, %v9609_v31 }
 0x132   : > { %v2386_v55 = vrot.slane %v2379_v56, 1  ;;  %v2391_v25 = vadd.f32 %v2385_v23, %v2374_v8  ;;  %v2416_v12 = vrot.slane %v10194_v61, 1  ;;  %v2582_v62 = vmul.f32 %v2570_v0, %v9612_v42  ;;  %v2617_v56 = vpop.permute.xlu0 %2616 }
 0x133   : > { %v2589_v50 = vmul.f32 %v2575_v20, %v9609_v31  ;;  %v2418_v53 = vrot.slane %v10206_v15, 1  ;;  %v1891_v17 = vadd.f32 %v10135_v29, %v9980_v37  ;;  %v2594_v39 = vrot.slane %v2588_v44, 1 }
 0x134   : > { %v2387_v14 = vsel %vm799_vm6, %v2384_v63, %v2386_v55  ;;  %v2393_v34 = vadd.f32 %v2386_v55, %v2376_v27  ;;  %v1892_v51 = vadd.f32 %v10135_v29, %v9992_v16  ;;  %v2583_v0 = vmul.f32 %v2575_v20, %v9612_v42 }
 0x135   : > { %v2392_v24 = vadd.f32 %v2387_v14, %v2375_v36  ;;  %v2595_v35 = vrot.slane %v2589_v50, 1  ;;  %v1894_v9 = vmax.f32 %v1891_v17, 0.0  ;;  %v2590_v43 = vmul.f32 %v2580_v4, %v9609_v31 }
 0x136   : > { %v2396_v33 = vmul.f32 %v10123_v6, %v2393_v34  ;;  %v10224_v60 = vmul.f32 %v10123_v6, %v2391_v25  ;;  %v1895_v37 = vmax.f32 %v1892_v51, 0.0  ;;  %v2624_v8 = vmul.f32 %v2612_v22, %v9619_v49 }
 0x137   : > { %v2596_v52 = vsel %vm799_vm6, %v2594_v39, %v2595_v35  ;;  %v1971_v40 = vmax.f32 %v1894_v9, %v1968_v19  ;;  %v2584_v16 = vmul.f32 %v2580_v4, %v9612_v42  ;;  %v2597_v63 = vrot.slane %v2590_v43, 1  ;;  %v2622_v4 = vpop.permute.xlu1 %2621  ;;  %v2433_v43 = vpop.permute.xlu0 %2432 }
 0x138   : > { %v2602_v59 = vadd.f32 %v2596_v52, %v2582_v62  ;;  %v10232_v20 = vmul.f32 %v10123_v6, %v2392_v24  ;;  %v1972_v36 = vmax.f32 %v1895_v37, %v1969_v11  ;;  %v2630_v27 = vmul.f32 %v2612_v22, %v9615_v45 }
 0x139   : > { %v10238_v23 = vmul.f32 %v2612_v22, %v9609_v31  ;;  %v10241_v55 = vadd.f32 %v10135_v29, %v2396_v33  ;;  %v1977_v30 = vrot.slane %v1971_v40, 1  ;;  %v2598_v19 = vsel %vm799_vm6, %v2595_v35, %v2597_v63 }
 0x13a   : > { %v10245_v44 = vmul.f32 %v2612_v22, %v9612_v42  ;;  %v1978_v25 = vrot.slane %v1972_v36, 1  ;;  %v2603_v62 = vadd.f32 %v2598_v19, %v2583_v0  ;;  %v2604_v50 = vadd.f32 %v2597_v63, %v2584_v16 }
 0x13b   : > { %v2627_v38 = vadd.f32 %v2624_v8, %v2602_v59  ;;  %v2636_v11 = vrot.slane %v2630_v27, 1  ;;  %v2668_v14 = vrot.slane %v10238_v23, 1  ;;  %v2625_v34 = vmul.f32 %v2617_v56, %v9619_v49 }
 0x13c   : > { %v2631_v17 = vmul.f32 %v2617_v56, %v9615_v45  ;;  %v1979_v24 = vsel %vm799_vm6, %v1977_v30, %v1978_v25  ;;  %v1981_v39 = vsel %vm799_vm6, %v1978_v25, %v1980_v47  ;;  %v2144_v22 = vadd.f32 %v10135_v29, %v10065_v32 }
 0x13d   : > { %v2145_v35 = vadd.f32 %v10135_v29, %v10093_v1  ;;  %v1984_v51 = vmax.f32 %v1971_v40, %v1979_v24  ;;  %v1985_v33 = vmax.f32 %v1972_v36, %v1981_v39  ;;  %v10259_v9 = vmul.f32 %v2617_v56, %v9612_v42  ;;  %v2438_v1 = vpop.permute.xlu1 %2437 }
 0x13e   : > { %v2637_v0 = vrot.slane %v2631_v17, 1  ;;  %v2663_v52 = vmul.f32 %v2617_v56, %v9609_v31  ;;  %v2147_v37 = vmax.f32 %v2144_v22, 0.0  ;;  %v2626_v10 = vmul.f32 %v2622_v4, %v9619_v49 }
 0x13f   : > { %v2148_v8 = vmax.f32 %v2145_v35, 0.0  ;;  %v8748_v47 = vpack.c.bf16 %v1985_v33, %v1984_v51  ;;  %v2628_v59 = vadd.f32 %v2625_v34, %v2603_v62  ;;  %v2632_v16 = vmul.f32 %v2622_v4, %v9615_v45 }
 0x140   : > { %v2638_v32 = vsel %vm799_vm6, %v2636_v11, %v2637_v0  ;;  %v2224_v63 = vmax.f32 %v2147_v37, %v2221_v7  ;;  %v2629_v27 = vadd.f32 %v2626_v10, %v2604_v50  ;;  %v10270_v30 = vmul.f32 %v2622_v4, %v9609_v31  ;;  %v2443_v11 = vpop.permute.xlu0 %2442 }
 0x141   : > { %v2644_v40 = vadd.f32 %v2638_v32, %v2627_v38  ;;  %v2225_v36 = vmax.f32 %v2148_v8, %v2222_v18  ;;  %8749 = vmatpush3.bf16.msra.mxu1 %v8748_v47  ;;  %v2639_v56 = vrot.slane %v2632_v16, 1  ;;  %v2417_v19 = vsel %vm799_vm6, %v2415_v41, %v2416_v12  ;;  %v2686_v39 = vpop.permute.xlu1 %2685 }
 0x142   : > { %v2445_v25 = vmul.f32 %v2433_v43, %v9619_v49  ;;  %v2669_v62 = vrot.slane %v2663_v52, 1  ;;  %v2230_v5 = vrot.slane %v2224_v63, 1  ;;  %v2658_v13 = vmul.f32 %v2622_v4, %v9612_v42  ;;  %8753 = vmatprep.subr.bf16.mxu1 %v9314_v57 }
 0x143   : > { %v2231_v7 = vrot.slane %v2225_v36, 1  ;;  %v2640_v18 = vsel %vm799_vm6, %v2637_v0, %v2639_v56  ;;  %v2646_v50 = vadd.f32 %v2639_v56, %v2629_v27  ;;  %v2423_v31 = vadd.f32 %v2417_v19, %v10186_v46 }
 0x144   : > { %v2451_v38 = vmul.f32 %v2433_v43, %v9615_v45  ;;  %v10284_v28 = vmul.f32 %v10123_v6, %v2644_v40  ;;  %v2645_v42 = vadd.f32 %v2640_v18, %v2628_v59  ;;  %7990 = vmatmul.mubr.msk.f32.vlgmr.msra.gmra.mrb[2].mxu1 %vm970_vm7, %v9622_v54  ;;  %v2671_v46 = vrot.slane %v10270_v30, 1  ;;  %v2691_v15 = vpop.permute.xlu0 %2690 }
 0x145   : > { %v2232_v41 = vsel %vm799_vm6, %v2230_v5, %v2231_v7  ;;  %v2234_v34 = vsel %vm799_vm6, %v2231_v7, %v2233_v58  ;;  %v2448_v24 = vadd.f32 %v2445_v25, %v2423_v31  ;;  %8003 = vmatprep.mubr.msk.f32.mxu1 %vm9313_vm4, %v9312_v2  ;;  %v10296_v22 = vmul.f32 %v10123_v6, %v2646_v50  ;;  %v2696_v40 = vpop.permute.xlu1 %2695 }
 0x146   : > { %v2237_v4 = vmax.f32 %v2224_v63, %v2232_v41  ;;  %v2238_v17 = vmax.f32 %v2225_v36, %v2234_v34  ;;  %v2457_v35 = vrot.slane %v2451_v38, 1  ;;  %v2419_v48 = vsel %vm799_vm6, %v2416_v12, %v2418_v53 }
 0x147   : > { %v2452_v58 = vmul.f32 %v2438_v1, %v9615_v45  ;;  %v10305_v33 = vmul.f32 %v10123_v6, %v2645_v42  ;;  %v2446_v0 = vmul.f32 %v2438_v1, %v9619_v49  ;;  %v2425_v43 = vadd.f32 %v2418_v53, %v10203_v21 }
 0x148   : > { %v8751_v51 = vpack.c.bf16 %v2238_v17, %v2237_v4  ;;  %v2447_v37 = vmul.f32 %v2443_v11, %v9619_v49  ;;  %v2453_v8 = vmul.f32 %v2443_v11, %v9615_v45  ;;  %v2670_v61 = vsel %vm799_vm6, %v2668_v14, %v2669_v62 }
 0x149   : > { %v2458_v52 = vrot.slane %v2452_v58, 1  ;;  %v2424_v12 = vadd.f32 %v2419_v48, %v10199_v3  ;;  %v2676_v10 = vadd.f32 %v2670_v61, %v10245_v44  ;;  %v2698_v47 = vmul.f32 %v2686_v39, %v9619_v49 }
 0x14a   : > { %8752 = vmatpush3.bf16.msra.mxu0 %v8751_v51  ;;  %v2704_v59 = vmul.f32 %v2686_v39, %v9615_v45  ;;  %v2450_v53 = vadd.f32 %v2447_v37, %v2425_v43  ;;  %v2460_v32 = vrot.slane %v2453_v8, 1  ;;  %v2672_v16 = vsel %vm799_vm6, %v2669_v62, %v2671_v46 }
 0x14b   : > { %v2459_v21 = vsel %vm799_vm6, %v2457_v35, %v2458_v52  ;;  %8756 = vmatprep.subr.bf16.mxu0 %v9314_v57  ;;  %v2449_v23 = vadd.f32 %v2446_v0, %v2424_v12  ;;  %v2402_v1 = vmax.f32 %v10241_v55, 0.0  ;;  %v2701_v3 = vadd.f32 %v2698_v47, %v2676_v10 }
 0x14c   : > { %v2465_v14 = vadd.f32 %v2459_v21, %v2448_v24  ;;  %v2461_v44 = vsel %vm799_vm6, %v2458_v52, %v2460_v32  ;;  %v2467_v63 = vadd.f32 %v2460_v32, %v2450_v53  ;;  %v2699_v36 = vmul.f32 %v2691_v15, %v9619_v49 }
 0x14d   : > { %v2705_v27 = vmul.f32 %v2691_v15, %v9615_v45  ;;  %7997 = vmatmul.mubr.msk.f32.vlgmr.msra.gmra.mrb[8].mxu0 %vm970_vm7, %v9622_v54  ;;  %v2466_v30 = vadd.f32 %v2461_v44, %v2449_v23  ;;  %v2710_v19 = vrot.slane %v2704_v59, 1  ;;  %v2677_v25 = vadd.f32 %v2672_v16, %v10259_v9 }
 0x14e   : > { %v2468_v56 = vmul.f32 %v10123_v6, %v2465_v14  ;;  %8010 = vmatprep.mubr.msk.f32.mxu0 %vm9313_vm4, %v9312_v2  ;;  %v2470_v55 = vmul.f32 %v10123_v6, %v2467_v63  ;;  %v2678_v5 = vadd.f32 %v2671_v46, %v2658_v13  ;;  %v2700_v7 = vmul.f32 %v2696_v40, %v9619_v49 }
 0x14f   : > { %v2711_v62 = vrot.slane %v2705_v27, 1  ;;  %v2469_v50 = vmul.f32 %v10123_v6, %v2466_v30  ;;  %v2702_v31 = vadd.f32 %v2699_v36, %v2677_v25  ;;  %v2706_v38 = vmul.f32 %v2696_v40, %v9615_v45  ;;  %v7340_v30 = vld [vmem:[%s11420_s5 + $0x30] sm:$0xff] }
 0x150   : > { %v2471_v18 = vadd.f32 %v10135_v29, %v2468_v56  ;;  %v2473_v11 = vadd.f32 %v10135_v29, %v2470_v55  ;;  %v2703_v41 = vadd.f32 %v2700_v7, %v2678_v5  ;;  %v2397_v34 = vadd.f32 %v10135_v29, %v10224_v60 }
 0x151   : > { %v2712_v9 = vsel %vm799_vm6, %v2710_v19, %v2711_v62  ;;  %v2472_v13 = vadd.f32 %v10135_v29, %v2469_v50  ;;  %v2713_v49 = vrot.slane %v2706_v38, 1  ;;  %v2398_v46 = vadd.f32 %v10135_v29, %v10232_v20  ;;  %v7341_v19 = vld [vmem:[%s11420_s5 + $0x38] sm:$0xff] }
 0x152   : > { %v2474_v42 = vmax.f32 %v2471_v18, 0.0  ;;  %v2718_v4 = vadd.f32 %v2712_v9, %v2701_v3  ;;  %v2476_v17 = vmax.f32 %v2473_v11, 0.0  ;;  %v2400_v24 = vmax.f32 %v2397_v34, 0.0  ;;  %v2817_v18 = vld [vmem:[#allocation3] sm:$0xff]  ;;  %v2818_v38 = vld [vmem:[#allocation3 + $0x8] sm:$0x3] }
 0x153   : > { %v2650_v45 = vadd.f32 %v10135_v29, %v10284_v28  ;;  %v2475_v39 = vmax.f32 %v2472_v13, 0.0  ;;  %v2714_v48 = vsel %vm799_vm6, %v2711_v62, %v2713_v49  ;;  %v2720_v58 = vadd.f32 %v2713_v49, %v2703_v41  ;;  %v2819_v9 = vld [vmem:[%s11420_s5] sm:$0xff]  ;;  %v2820_v41 = vld [vmem:[%s11420_s5 + $0x8] sm:$0xff]  ;;  %v2821_v49 = vld [vmem:[%s11420_s5 + $0x10] sm:$0xff] }
 0x154   : > { %v2721_v35 = vmul.f32 %v10123_v6, %v2718_v4  ;;  %v2479_v60 = vmax.f32 %v2402_v1, %v2476_v17  ;;  %v2719_v51 = vadd.f32 %v2714_v48, %v2702_v31  ;;  %v2401_v0 = vmax.f32 %v2398_v46, 0.0  ;;  %v2822_v17 = vld [vmem:[%s11420_s5 + $0x18] sm:$0xff] }
 0x155   : > { %v2477_v43 = vmax.f32 %v2400_v24, %v2474_v42  ;;  %v2652_v37 = vadd.f32 %v10135_v29, %v10296_v22  ;;  %v2723_v20 = vmul.f32 %v10123_v6, %v2720_v58  ;;  %v2651_v28 = vadd.f32 %v10135_v29, %v10305_v33  ;;  %v7338_v33 = vld [vmem:[%s11420_s5 + $0x20] sm:$0xff]  ;;  %v7349_v48 = vld [vmem:[%s11420_s5 + $0x58] sm:$0xff] }
 0x156   : > { %v2724_v52 = vadd.f32 %v10135_v29, %v2721_v35  ;;  %v2486_v8 = vrot.slane %v2479_v60, 1  ;;  %v2722_v61 = vmul.f32 %v10123_v6, %v2719_v51  ;;  %v2478_v12 = vmax.f32 %v2401_v0, %v2475_v39  ;;  %v7339_v6 = vld [vmem:[%s11420_s5 + $0x28] sm:$0xff]  ;;  %v7346_v24 = vld [vmem:[%s11420_s5 + $0x40] sm:$0xff]  ;;  %v7348_v35 = vld [vmem:[%s11420_s5 + $0x50] sm:$0xff] }
 0x157   : > { %v2726_v47 = vadd.f32 %v10135_v29, %v2723_v20  ;;  %v2653_v59 = vmax.f32 %v2650_v45, 0.0  ;;  %v2483_v21 = vrot.slane %v2477_v43, 1  ;;  %v2655_v32 = vmax.f32 %v2652_v37, 0.0  ;;  %v7347_v45 = vld [vmem:[%s11420_s5 + $0x48] sm:$0xff]  ;;  %v7352_v60 = vld [vmem:[%s11420_s5 + $0x60] sm:$0xff]  ;;  %v7354_v37 = vld [vmem:[%s11420_s5 + $0x70] sm:$0xff] }
 0x158   : > { %v2727_v10 = vmax.f32 %v2724_v52, 0.0  ;;  %v2725_v15 = vadd.f32 %v10135_v29, %v2722_v61  ;;  %v2484_v53 = vrot.slane %v2478_v12, 1  ;;  %v2654_v16 = vmax.f32 %v2651_v28, 0.0  ;;  %v7353_v51 = vld [vmem:[%s11420_s5 + $0x68] sm:$0xff]  ;;  %v7355_v20 = vld [vmem:[%s11420_s5 + $0x78] sm:$0xff] }
 0x159   : > { %v2729_v22 = vmax.f32 %v2726_v47, 0.0  ;;  %v10402_v36 = vpack.c.bf16 %v7339_v6, %v7338_v33  ;;  %v10413_v7 = vpack.c.bf16 %v7341_v19, %v7340_v30  ;;  %v2830_v11 = vrot.slane %v2817_v18, 1  ;;  %v3595_v30 = vld [vmem:[%s11425_s10] sm:$0xff]  ;;  %v3596_v19 = vld [vmem:[%s11425_s10 + $0x8] sm:$0xff] }
 0x15a   : > { %v2728_v29 = vmax.f32 %v2725_v15, 0.0  ;;  %v2485_v23 = vsel %vm799_vm6, %v2483_v21, %v2484_v53  ;;  %v2487_v14 = vsel %vm799_vm6, %v2484_v53, %v2486_v8  ;;  %v2730_v1 = vmax.f32 %v2653_v59, %v2727_v10 }
 0x15b   : > { %v2732_v3 = vmax.f32 %v2655_v32, %v2729_v22  ;;  %v2490_v40 = vmax.f32 %v2477_v43, %v2485_v23  ;;  %v2491_v44 = vmax.f32 %v2478_v12, %v2487_v14  ;;  %v2831_v34 = vrot.slane %v2818_v38, 1 }
 0x15c   : > { %v2731_v63 = vmax.f32 %v2654_v16, %v2728_v29  ;;  %v2736_v25 = vrot.slane %v2730_v1, 1  ;;  %v10426_v4 = vpack.c.bf16 %v2820_v41, %v2819_v9  ;;  %v10438_v46 = vpack.c.bf16 %v2822_v17, %v2821_v49  ;;  %v10583_v49 = vld [vmem:[%s11422_s7] ss:$0 sm:$0xff] }
 0x15d   : > { %v2739_v27 = vrot.slane %v2732_v3, 1  ;;  %v8754_v56 = vpack.c.bf16 %v2491_v44, %v2490_v40  ;;  %v2832_v13 = vsel %vm799_vm6, %v2830_v11, %v2831_v34  ;;  %v10454_v39 = vpack.c.bf16 %v7347_v45, %v7346_v24  ;;  %v3602_v11 = vld [vmem:[%s11425_s10 + $0x38] sm:$0xff] }
 0x15e   : > { %v2737_v55 = vrot.slane %v2731_v63, 1  ;;  %v10466_v58 = vpack.c.bf16 %v7349_v48, %v7348_v35  ;;  %v10477_v0 = vpack.c.bf16 %v7353_v51, %v7352_v60  ;;  %v10489_v10 = vpack.c.bf16 %v7355_v20, %v7354_v37 }
 0x15f   : > { %8755 = vmatpush3.bf16.msra.mxu1 %v8754_v56 }
 0x160   : > { %v2738_v62 = vsel %vm799_vm6, %v2736_v25, %v2737_v55  ;;  %v2740_v5 = vsel %vm799_vm6, %v2737_v55, %v2739_v27  ;;  %8760 = vmatprep.subr.bf16.mxu1 %v10402_v36  ;;  %v8824_v25 = vpack.c.bf16 %v3596_v19, %v3595_v30  ;;  %v3597_v55 = vld [vmem:[%s11425_s10 + $0x10] sm:$0xff]  ;;  %v753_v30 = vld [vmem:[%s11426_s11 + $0x40] sm:$0xff]  ;;  %v754_v19 = vld [vmem:[%s11426_s11 + $0x48] sm:$0xff] }
 0x161   : > { %v2743_v50 = vmax.f32 %v2730_v1, %v2738_v62  ;;  %v2744_v31 = vmax.f32 %v2731_v63, %v2740_v5  ;;  %v3598_v62 = vld [vmem:[%s11425_s10 + $0x18] sm:$0xff] }
 0x162   : > { %8004 = vmatmul.mubr.msk.f32.vlgmr.msra.gmra.mrb[4].mxu1 %vm970_vm7, %v9622_v54  ;;  %v8827_v5 = vpack.c.bf16 %v3598_v62, %v3597_v55  ;;  %v755_v55 = vld [vmem:[%s11426_s11 + $0x50] sm:$0xff]  ;;  %v756_v62 = vld [vmem:[%s11426_s11 + $0x58] sm:$0xff] }
 0x163   : > { %v8757_v42 = vpack.c.bf16 %v2744_v31, %v2743_v50  ;;  %8762 = vmatpush3.bf16.msra.mxu1 %v10402_v36  ;;  %8021 = vmatprep.mubr.msk.f32.mxu1 %vm628_vm8, %v2832_v13  ;;  %v3600_v50 = vld [vmem:[%s11425_s10 + $0x28] sm:$0xff] }
 0x164   : > { %8764 = vmatprep.subr.bf16.mxu1 %v10413_v7 }
 0x165   : > { %8758 = vmatpush3.bf16.msra.mxu0 %v8757_v42  ;;  %v10577_v42 = vld [vmem:[%s11421_s6] ss:$0 sm:$0xff] }
 0x166   : > { %8792 = vmatprep.subr.bf16.mxu0 %v10402_v36 }
 0x167   : > { %8766 = vmatpush3.bf16.msra.mxu1 %v10413_v7 }
 0x168   : > { %8768 = vmatprep.subr.bf16.mxu1 %v10426_v4  ;;  %8011 = vmatmul.mubr.msk.f32.vlgmr.msra.gmra.mrb[10].mxu0 %vm970_vm7, %v9622_v54 }
 0x169   : > { %8794 = vmatpush3.bf16.msra.mxu0 %v10402_v36 }
 0x16a   : > { %8022 = vmatmul.mubr.msk.f32.vlgmr.msra.gmra.mrb[6].mxu1 %vm628_vm8, %v2831_v34  ;;  %8796 = vmatprep.subr.bf16.mxu0 %v10413_v7 }
 0x16b   : > { %8770 = vmatpush3.bf16.msra.mxu1 %v10426_v4  ;;  %8032 = vmatprep.mubr.msk.f32.mxu1 %vm628_vm8, %v2817_v18  ;;  %v3599_v18 = vld [vmem:[%s11425_s10 + $0x20] sm:$0xff] }
 0x16c   : > { %8772 = vmatprep.subr.bf16.mxu1 %v10438_v46  ;;  %v8830_v31 = vpack.c.bf16 %v3600_v50, %v3599_v18  ;;  %v757_v18 = vld [vmem:[%s11426_s11 + $0x60] sm:$0xff]  ;;  %v758_v50 = vld [vmem:[%s11426_s11 + $0x68] sm:$0xff] }
 0x16d   : > { %8798 = vmatpush3.bf16.msra.mxu0 %v10413_v7 }
 0x16e   : > { %8800 = vmatprep.subr.bf16.mxu0 %v10426_v4 }
 0x16f   : > { %8774 = vmatpush3.bf16.msra.mxu1 %v10438_v46 }
 0x170   : > { %8776 = vmatprep.subr.bf16.mxu1 %v10454_v39 }
 0x172   : > { %8033 = vmatmul.mubr.msk.f32.vlgmr.msra.gmra.mrb[6].mxu1 %vm628_vm8, %v2818_v38  ;;  %v3601_v38 = vld [vmem:[%s11425_s10 + $0x30] sm:$0xff] }
 0x173   : > { %8778 = vmatpush3.bf16.msra.mxu1 %v10454_v39  ;;  %v8833_v9 = vpack.c.bf16 %v3602_v11, %v3601_v38  ;;  %v759_v38 = vld [vmem:[%s11426_s11 + $0x70] sm:$0xff]  ;;  %v760_v11 = vld [vmem:[%s11426_s11 + $0x78] sm:$0xff] }
 0x174   : > { %8780 = vmatprep.subr.bf16.mxu1 %v10466_v58 }
 0x177   : > { %8782 = vmatpush3.bf16.msra.mxu1 %v10466_v58 }
 0x178   : > { %8784 = vmatprep.subr.bf16.mxu1 %v10477_v0 }
 0x1ae   : > { %v1040_v43 = vpop.f32.mrb[2].mxu0 }
 0x1af   : > { %1045 = vst.msk [vmem:[#allocation3 + $0x11] sm:$0xff] %vm628_vm8, %v1040_v43  ;;  %v7963_v52 = vpop.f32.mrb[3].mxu0 }
 0x1b6   : > { %v2991_v28 = vld [vmem:[#allocation3 + $0x10] sm:$0xff]  ;;  %v2992_v8 = vld [vmem:[#allocation3 + $0x18] sm:$0x3] }
 0x1b7   : > { %8043 = vmatprep.mubr.msk.f32.mxu1 %vm628_vm8, %v2991_v28  ;;  %v3086_v61 = vrot.slane %v2991_v28, 1  ;;  %v3087_v12 = vrot.slane %v2992_v8, 1 }
 0x1b8   : > { %8044 = vmatmul.mubr.msk.f32.vlgmr.msra.gmra.mrb[6].mxu1 %vm628_vm8, %v2992_v8 }
 0x1b9   : > { %8786 = vmatpush3.bf16.msra.mxu1 %v10477_v0  ;;  %v3088_v47 = vsel %vm799_vm6, %v3086_v61, %v3087_v12 }
 0x1ba   : > { %8054 = vmatprep.mubr.msk.f32.mxu1 %vm628_vm8, %v3088_v47  ;;  %8065 = vmatprep.mubr.msk.f32.mxu0 %vm628_vm8, %v3088_v47 }
 0x1bb   : > { %8066 = vmatmul.mubr.msk.f32.vlgmr.msra.gmra.mrb[12].mxu0 %vm628_vm8, %v3087_v12  ;;  %8788 = vmatprep.subr.bf16.mxu1 %v10489_v10 }
 0x1bc   : > { %8802 = vmatpush3.bf16.msra.mxu0 %v10426_v4  ;;  %8076 = vmatprep.mubr.msk.f32.mxu0 %vm628_vm8, %v2991_v28 }
 0x1bd   : > { %8790 = vmatpush3.bf16.msra.mxu1 %v10489_v10  ;;  %8804 = vmatprep.subr.bf16.mxu0 %v10438_v46 }
 0x1be   : > { %8101 = vmatprep.subr.mxu1 %v9312_v2 }
 0x1c0   : > { %8055 = vmatmul.mubr.msk.f32.vlgmr.msra.gmra.mrb[6].mxu1 %vm628_vm8, %v3087_v12  ;;  %8806 = vmatpush3.bf16.msra.mxu0 %v10438_v46 }
 0x1c1   : > { %8808 = vmatprep.subr.bf16.mxu0 %v10454_v39  ;;  %8103 = vmatprep.mubr.msk.f32.mxu1 %vm9313_vm4, %v9312_v2 }
 0x1c3   : > { %8077 = vmatmul.mubr.msk.f32.vlgmr.msra.gmra.mrb[12].mxu0 %vm628_vm8, %v2992_v8 }
 0x1c4   : > { %8810 = vmatpush3.bf16.msra.mxu0 %v10454_v39 }
 0x1c5   : > { %8812 = vmatprep.subr.bf16.mxu0 %v10466_v58  ;;  %v1293_v59 = vpop.f32.mrb[4].mxu0 }
 0x1c6   : > { %1298 = vst.msk [vmem:[#allocation3 + $0x21] sm:$0xff] %vm628_vm8, %v1293_v59  ;;  %v7970_v15 = vpop.f32.mrb[5].mxu0 }
 0x1c7   : > { %v745_v15 = vld [vmem:[%s11426_s11] sm:$0xff] }
 0x1c8   : > { %8814 = vmatpush3.bf16.msra.mxu0 %v10466_v58 }
 0x1c9   : > { %8816 = vmatprep.subr.bf16.mxu0 %v10477_v0 }
 0x1cd   : > { %v10514_v21 = vld [vmem:[#allocation3 + $0x20] sm:$0xff]  ;;  %v10516_v53 = vld [vmem:[#allocation3 + $0x28] sm:$0x3] }
 0x1ce   : > { %8087 = vmatprep.mubr.msk.f32.mxu0 %vm628_vm8, %v10514_v21  ;;  %v3423_v32 = vrot.slane %v10514_v21, 1  ;;  %v10522_v22 = vrot.slane %v10516_v53, 1 }
 0x1cf   : > { %8088 = vmatmul.mubr.msk.f32.vlgmr.msra.gmra.mrb[12].mxu0 %vm628_vm8, %v10516_v53 }
 0x1d0   : > { %8818 = vmatpush3.bf16.msra.mxu0 %v10477_v0  ;;  %v10529_v16 = vsel %vm799_vm6, %v3423_v32, %v10522_v22  ;;  %v746_v32 = vld [vmem:[%s11426_s11 + $0x8] sm:$0xff] }
 0x1d1   : > { %8098 = vmatprep.mubr.msk.f32.mxu0 %vm628_vm8, %v10529_v16  ;;  %8820 = vmatprep.subr.bf16.mxu0 %v10489_v10 }
 0x1d4   : > { %8822 = vmatpush3.bf16.msra.mxu0 %v10489_v10 }
 0x1d5   : > { %8823 = vmatprep.subr.bf16.mxu0 %v9314_v57 }
 0x1d7   : > { %8099 = vmatmul.mubr.msk.f32.vlgmr.msra.gmra.mrb[12].mxu0 %vm628_vm8, %v10522_v22 }
 0x1d8   : > { %8122 = vmatprep.mubr.msk.f32.mxu0 %vm9313_vm4, %v9312_v2  ;;  %8825 = vmatpush3.bf16.msra.mxu0 %v8824_v25  ;;  %v8848_v25 = vpack.c.bf16 %v754_v19, %v753_v30  ;;  %v7379_v30 = vld [vmem:[%s11425_s10 + $0x80] sm:$0xff]  ;;  %v7380_v19 = vld [vmem:[%s11425_s10 + $0x88] sm:$0xff] }
 0x1d9   : > { %8826 = vmatprep.subr.bf16.mxu0 %v9314_v57 }
 0x1dc   : > { %8828 = vmatpush3.bf16.msra.mxu0 %v8827_v5  ;;  %v8851_v5 = vpack.c.bf16 %v756_v62, %v755_v55  ;;  %v7381_v62 = vld [vmem:[%s11425_s10 + $0x90] sm:$0xff] }
 0x1dd   : > { %8829 = vmatprep.subr.bf16.mxu0 %v9314_v57 }
 0x1e0   : > { %8831 = vmatpush3.bf16.msra.mxu0 %v8830_v31  ;;  %v8854_v31 = vpack.c.bf16 %v758_v50, %v757_v18 }
 0x1e1   : > { %8832 = vmatprep.subr.bf16.mxu0 %v9314_v57 }
 0x1e4   : > { %8834 = vmatpush3.bf16.msra.mxu0 %v8833_v9  ;;  %v665_v9 = vld [vmem:[%s11424_s9] sm:$0x1] }
 0x1e5   : > { %8859 = vmatprep.subr.bf16.mxu0 %v9314_v57 }
 0x1ea   : > { %v1546_v33 = vpop.f32.mrb[0].mxu1 }
 0x1eb   : > { %1551 = vst.msk [vmem:[#allocation3 + $0x31] sm:$0xff] %vm628_vm8, %v1546_v33  ;;  %v7977_v6 = vpop.f32.mrb[1].mxu1 }
 0x1f3   : > { %v1799_v29 = vpop.f32.mrb[6].mxu0 }
 0x1f4   : > { %1804 = vst.msk [vmem:[#allocation3 + $0x41] sm:$0xff] %vm628_vm8, %v1799_v29  ;;  %v7984_v23 = vpop.f32.mrb[7].mxu0  ;;  %v8836_v29 = vpack.c.bf16 %v746_v32, %v745_v15  ;;  %v7372_v32 = vld [vmem:[%s11425_s10 + $0x50] sm:$0xff] }
 0x1f5   : > { %v747_v23 = vld [vmem:[%s11426_s11 + $0x10] sm:$0xff] }
 0x1fb   : > { %v10768_v50 = vld [vmem:[#allocation3 + $0x40] sm:$0xff] }
 0x217   : > { %v2052_v14 = vpop.f32.mrb[2].mxu1 }
 0x218   : > { %2057 = vst.msk [vmem:[#allocation3 + $0x51] sm:$0xff] %vm628_vm8, %v2052_v14  ;;  %v7991_v1 = vpop.f32.mrb[3].mxu1  ;;  %v748_v14 = vld [vmem:[%s11426_s11 + $0x18] sm:$0xff] }
 0x219   : > { %v8839_v1 = vpack.c.bf16 %v748_v14, %v747_v23 }
 0x220   : > { %v2305_v3 = vpop.f32.mrb[8].mxu0 }
 0x221   : > { %2310 = vst.msk [vmem:[#allocation3 + $0x61] sm:$0xff] %vm628_vm8, %v2305_v3  ;;  %v7998_v40 = vpop.f32.mrb[9].mxu0  ;;  %v749_v3 = vld [vmem:[%s11426_s11 + $0x20] sm:$0xff] }
 0x222   : > { %v750_v40 = vld [vmem:[%s11426_s11 + $0x28] sm:$0xff] }
 0x235   : > { %v2558_v44 = vpop.f32.mrb[4].mxu1 }
 0x236   : > { %2563 = vst.msk [vmem:[#allocation3 + $0x71] sm:$0xff] %vm628_vm8, %v2558_v44  ;;  %v8005_v63 = vpop.f32.mrb[5].mxu1  ;;  %v8842_v44 = vpack.c.bf16 %v750_v40, %v749_v3  ;;  %v7374_v3 = vld [vmem:[%s11425_s10 + $0x60] sm:$0xff]  ;;  %v7375_v40 = vld [vmem:[%s11425_s10 + $0x68] sm:$0xff] }
 0x237   : > { %v751_v63 = vld [vmem:[%s11426_s11 + $0x30] sm:$0xff] }
 0x23b   : > { %v2811_v27 = vpop.f32.mrb[10].mxu0 }
 0x23c   : > { %2816 = vst.msk [vmem:[#allocation3 + $0x81] sm:$0xff] %vm628_vm8, %v2811_v27  ;;  %v8012_v56 = vpop.f32.mrb[11].mxu0  ;;  %v752_v27 = vld [vmem:[%s11426_s11 + $0x38] sm:$0xff] }
 0x23d   : > { %v8845_v56 = vpack.c.bf16 %v752_v27, %v751_v63  ;;  %v7376_v63 = vld [vmem:[%s11425_s10 + $0x70] sm:$0xff]  ;;  %v7377_v27 = vld [vmem:[%s11425_s10 + $0x78] sm:$0xff] }
 0x293   : > { %v8056_v41 = vpop.f32.mrb[6].mxu1 }
 0x294   : > { %v3159_v34 = vpop.f32.mrb[7].mxu1  ;;  %v3177_v13 = vmul.f32 %v8056_v41, %v10577_v42  ;;  %v8857_v41 = vpack.c.bf16 %v760_v11, %v759_v38  ;;  %v7384_v38 = vld [vmem:[%s11425_s10 + $0xa8] sm:$0xff]  ;;  %v10780_v11 = vld [vmem:[#allocation3 + $0x48] sm:$0x3] }
 0x295   : > { %v3176_v17 = vmul.f32 %v10577_v42, %v3159_v34  ;;  %v741_v34 = vadd.f32 %v10127_v26, %v665_v9  ;;  %v7391_v26 = vld [vmem:[%s11425_s10 + $0xd8] sm:$0xff] }
 0x296   : > { %v3185_v45 = vadd.f32 %v10583_v49, %v3177_v13  ;;  %v7388_v13 = vld [vmem:[%s11425_s10 + $0xc0] sm:$0xff] }
 0x297   : > { %v3184_v60 = vadd.f32 %v10583_v49, %v3176_v17  ;;  %v7389_v17 = vld [vmem:[%s11425_s10 + $0xc8] sm:$0xff] }
 0x298   : > { %v3187_v37 = vmax.f32 %v3185_v45, 0.0  ;;  %v744_v45 = vmax.f32 %v741_v34, 0.0  ;;  %v10786_v34 = vrot.slane %v10780_v11, 1 }
 0x299   : > { %v3186_v28 = vmax.f32 %v3184_v60, 0.0  ;;  %v7392_v60 = vld [vmem:[%s11425_s10 + $0xe0] sm:$0xff] }
 0x2aa   : > { %v8100_v24 = vpop.f32.mrb[12].mxu0 }
 0x2ab   : > { %v3508_v35 = vmul.f32 %v8100_v24, %v10577_v42  ;;  %v3496_v48 = vpop.f32.mrb[13].mxu0  ;;  %v8884_v24 = vpack.c.bf16 %v7389_v17, %v7388_v13  ;;  %v7385_v13 = vld [vmem:[%s11425_s10 + $0xb0] sm:$0xff]  ;;  %v7386_v17 = vld [vmem:[%s11425_s10 + $0xb8] sm:$0xff] }
 0x2ac   : > { %v3507_v51 = vmul.f32 %v10577_v42, %v3496_v48 }
 0x2ad   : > { %v3510_v43 = vadd.f32 %v10583_v49, %v3508_v35  ;;  %v7390_v35 = vld [vmem:[%s11425_s10 + $0xd0] sm:$0xff] }
 0x2ae   : > { %v3509_v52 = vadd.f32 %v10583_v49, %v3507_v51  ;;  %v8887_v48 = vpack.c.bf16 %v7391_v26, %v7390_v35  ;;  %v7393_v51 = vld [vmem:[%s11425_s10 + $0xe8] sm:$0xff] }
 0x2af   : > { %v3512_v20 = vmax.f32 %v3510_v43, 0.0  ;;  %v8890_v43 = vpack.c.bf16 %v7393_v51, %v7392_v60  ;;  %v7417_v60 = vld [vmem:[%s11425_s10 + $0x118] sm:$0xff] }
 0x2b0   : > { %v3511_v8 = vmax.f32 %v3509_v52, 0.0  ;;  %v7394_v52 = vld [vmem:[%s11425_s10 + $0xf0] sm:$0xff] }
 0x2b1   : > { %v3514_v61 = vmax.f32 %v3187_v37, %v3512_v20  ;;  %v7395_v37 = vld [vmem:[%s11425_s10 + $0xf8] sm:$0xff] }
 0x2b2   : > { %v3513_v12 = vmax.f32 %v3186_v28, %v3511_v8  ;;  %v8893_v20 = vpack.c.bf16 %v7395_v37, %v7394_v52  ;;  %v7370_v28 = vld [vmem:[%s11425_s10 + $0x40] sm:$0xff]  ;;  %v7371_v8 = vld [vmem:[%s11425_s10 + $0x48] sm:$0xff] }
 0x2b3   : > { %v3518_v47 = vrot.slane %v3514_v61, 1  ;;  %v10694_v61 = vld [vmem:[#allocation3 + $0x30] sm:$0xff]  ;;  %v7419_v52 = vld [vmem:[%s11425_s10 + $0x128] sm:$0xff] }
 0x2b4   : > { %v3517_v59 = vrot.slane %v3513_v12, 1 }
 0x2b6   : > { %v3519_v33 = vsel %vm799_vm6, %v3517_v59, %v3518_v47  ;;  %v8860_v47 = vpack.c.bf16 %v7371_v8, %v7370_v28  ;;  %v4231_v59 = vrot.slane %v10694_v61, 1  ;;  %v7421_v28 = vld [vmem:[%s11425_s10 + $0x138] sm:$0xff] }
 0x2b7   : > { %v3521_v6 = vmax.f32 %v3513_v12, %v3519_v33  ;;  %v10696_v12 = vld [vmem:[#allocation3 + $0x38] sm:$0x3]  ;;  %v7373_v33 = vld [vmem:[%s11425_s10 + $0x58] sm:$0xff] }
 0x2b8   : > { %v10700_v15 = vrot.slane %v10696_v12, 1  ;;  %v8863_v14 = vpack.c.bf16 %v7373_v33, %v7372_v32 }
 0x2b9   : > { %8102 = vmatpush3.msra.mxu1 %v3521_v6 }
 0x2ba   : > { %8104 = vmatmul.mubr.msk.f32.vlgmr.msra.gmra.mrb[8].mxu1 %vm3522_vm10, %v9622_v54  ;;  %8835 = vmatprep.subr.bf16.mxu1 %v9314_v57 }
 0x2bb   : > { %8837 = vmatpush3.bf16.msra.mxu1 %v8836_v29  ;;  %8157 = vmatprep.mubr.msk.f32.mxu1 %vm9313_vm4, %v9312_v2 }
 0x2bc   : > { %8838 = vmatprep.subr.bf16.mxu1 %v9314_v57 }
 0x2bf   : > { %8840 = vmatpush3.bf16.msra.mxu1 %v8839_v1  ;;  %v10719_v1 = vsel %vm799_vm6, %v4231_v59, %v10700_v15 }
 0x2c0   : > { %8841 = vmatprep.subr.bf16.mxu1 %v9314_v57 }
 0x2c3   : > { %8843 = vmatpush3.bf16.msra.mxu1 %v8842_v44  ;;  %v8866_v44 = vpack.c.bf16 %v7375_v40, %v7374_v3 }
 0x2c4   : > { %8844 = vmatprep.subr.bf16.mxu1 %v9314_v57 }
 0x2c7   : > { %8846 = vmatpush3.bf16.msra.mxu1 %v8845_v56  ;;  %v8869_v56 = vpack.c.bf16 %v7377_v27, %v7376_v63 }
 0x2c8   : > { %8847 = vmatprep.subr.bf16.mxu1 %v9314_v57 }
 0x2cb   : > { %8849 = vmatpush3.bf16.msra.mxu1 %v8848_v25  ;;  %v8872_v25 = vpack.c.bf16 %v7380_v19, %v7379_v30 }
 0x2cc   : > { %8850 = vmatprep.subr.bf16.mxu1 %v9314_v57 }
 0x2cf   : > { %8852 = vmatpush3.bf16.msra.mxu1 %v8851_v5  ;;  %v7382_v5 = vld [vmem:[%s11425_s10 + $0x98] sm:$0xff] }
 0x2d0   : > { %8853 = vmatprep.subr.bf16.mxu1 %v9314_v57  ;;  %v8875_v18 = vpack.c.bf16 %v7382_v5, %v7381_v62 }
 0x2d3   : > { %8855 = vmatpush3.bf16.msra.mxu1 %v8854_v31  ;;  %v7383_v31 = vld [vmem:[%s11425_s10 + $0xa0] sm:$0xff] }
 0x2d4   : > { %8856 = vmatprep.subr.bf16.mxu1 %v9314_v57  ;;  %v8878_v9 = vpack.c.bf16 %v7384_v38, %v7383_v31 }
 0x2d7   : > { %8858 = vmatpush3.bf16.msra.mxu1 %v8857_v41  ;;  %v4556_v41 = vrot.slane %v10768_v50, 1 }
 0x2d8   : > { %8883 = vmatprep.subr.bf16.mxu1 %v9314_v57 }
 0x2da   : > { %8158 = vmatmul.mubr.f32.vlgmr.msra.gmra.mrb[10].mxu1 %v744_v45  ;;  %v10800_v45 = vsel %vm799_vm6, %v4556_v41, %v10786_v34 }
 0x2db   : > { %8885 = vmatpush3.bf16.msra.mxu1 %v8884_v24  ;;  %8214 = vmatprep.mubr.msk.f32.mxu1 %vm9313_vm4, %v9312_v2  ;;  %v8881_v24 = vpack.c.bf16 %v7386_v17, %v7385_v13 }
 0x2dc   : > { %8886 = vmatprep.subr.bf16.mxu1 %v9314_v57 }
 0x2df   : > { %8888 = vmatpush3.bf16.msra.mxu1 %v8887_v48 }
 0x2e0   : > { %8889 = vmatprep.subr.bf16.mxu1 %v9314_v57 }
 0x2e3   : > { %8891 = vmatpush3.bf16.msra.mxu1 %v8890_v43  ;;  %v7418_v43 = vld [vmem:[%s11425_s10 + $0x120] sm:$0xff] }
 0x2e4   : > { %8892 = vmatprep.subr.bf16.mxu1 %v9314_v57  ;;  %v8966_v37 = vpack.c.bf16 %v7419_v52, %v7418_v43  ;;  %v7428_v43 = vld [vmem:[%s11425_s10 + $0x168] sm:$0xff] }
 0x2e7   : > { %8894 = vmatpush3.bf16.msra.mxu1 %v8893_v20  ;;  %v7420_v20 = vld [vmem:[%s11425_s10 + $0x130] sm:$0xff] }
 0x2e8   : > { %8928 = vmatprep.subr.bf16.mxu1 %v10402_v36  ;;  %v8969_v8 = vpack.c.bf16 %v7421_v28, %v7420_v20  ;;  %v7430_v20 = vld [vmem:[%s11425_s10 + $0x178] sm:$0xff] }
 0x38d   : > { %v10708_v6 = vpop.f32.mrb[8].mxu1 }
 0x38e   : > { %v3922_v29 = vrot.slane %v10708_v6, 3  ;;  %v8105_v23 = vpop.f32.mrb[9].mxu1  ;;  %8123 = vmatmul.mubr.msk.f32.vlgmr.msra.gmra.mrb[14].mxu0 %vm3603_vm11, %v10708_v6  ;;  %v3756_v55 = vrot.slane %v10708_v6, 1  ;;  %v3839_v35 = vrot.slane %v10708_v6, 2 }
 0x38f   : > { %8861 = vmatpush3.bf16.msra.mxu0 %v8860_v47  ;;  %8176 = vmatprep.mubr.msk.f32.mxu0 %vm9313_vm4, %v9312_v2 }
 0x390   : > { %8215 = vmatmul.mubr.msk.f32.vlgmr.msra.gmra.mrb[12].mxu1 %vm3603_vm11, %v3922_v29  ;;  %8862 = vmatprep.subr.bf16.mxu0 %v9314_v57 }
 0x391   : > { %8930 = vmatpush3.bf16.msra.mxu1 %v10402_v36  ;;  %8269 = vmatprep.mubr.msk.f32.mxu1 %vm628_vm8, %v10719_v1 }
 0x392   : > { %8932 = vmatprep.subr.bf16.mxu1 %v10413_v7 }
 0x393   : > { %8864 = vmatpush3.bf16.msra.mxu0 %v8863_v14 }
 0x394   : > { %8865 = vmatprep.subr.bf16.mxu0 %v9314_v57 }
 0x395   : > { %8934 = vmatpush3.bf16.msra.mxu1 %v10413_v7 }
 0x396   : > { %8936 = vmatprep.subr.bf16.mxu1 %v10426_v4 }
 0x397   : > { %8867 = vmatpush3.bf16.msra.mxu0 %v8866_v44 }
 0x398   : > { %8270 = vmatmul.mubr.msk.f32.vlgmr.msra.gmra.mrb[14].mxu1 %vm628_vm8, %v10700_v15  ;;  %8868 = vmatprep.subr.bf16.mxu0 %v9314_v57 }
 0x399   : > { %8938 = vmatpush3.bf16.msra.mxu1 %v10426_v4  ;;  %8280 = vmatprep.mubr.msk.f32.mxu1 %vm628_vm8, %v10694_v61 }
 0x39a   : > { %8940 = vmatprep.subr.bf16.mxu1 %v10438_v46 }
 0x39b   : > { %8870 = vmatpush3.bf16.msra.mxu0 %v8869_v56 }
 0x39c   : > { %8871 = vmatprep.subr.bf16.mxu0 %v9314_v57 }
 0x39d   : > { %8942 = vmatpush3.bf16.msra.mxu1 %v10438_v46 }
 0x39e   : > { %8177 = vmatmul.mubr.msk.f32.vlgmr.msra.gmra.mrb[16].mxu0 %vm3603_vm11, %v3756_v55  ;;  %8944 = vmatprep.subr.bf16.mxu1 %v10454_v39 }
 0x39f   : > { %8873 = vmatpush3.bf16.msra.mxu0 %v8872_v25  ;;  %8195 = vmatprep.mubr.msk.f32.mxu0 %vm9313_vm4, %v9312_v2 }
 0x3a0   : > { %8281 = vmatmul.mubr.msk.f32.vlgmr.msra.gmra.mrb[14].mxu1 %vm628_vm8, %v10696_v12  ;;  %8874 = vmatprep.subr.bf16.mxu0 %v9314_v57 }
 0x3a1   : > { %8946 = vmatpush3.bf16.msra.mxu1 %v10454_v39  ;;  %8291 = vmatprep.mubr.msk.f32.mxu1 %vm628_vm8, %v10768_v50 }
 0x3a2   : > { %8948 = vmatprep.subr.bf16.mxu1 %v10466_v58 }
 0x3a3   : > { %8876 = vmatpush3.bf16.msra.mxu0 %v8875_v18 }
 0x3a4   : > { %8877 = vmatprep.subr.bf16.mxu0 %v9314_v57 }
 0x3a5   : > { %8950 = vmatpush3.bf16.msra.mxu1 %v10466_v58 }
 0x3a6   : > { %8952 = vmatprep.subr.bf16.mxu1 %v10477_v0 }
 0x3a7   : > { %8879 = vmatpush3.bf16.msra.mxu0 %v8878_v9 }
 0x3a8   : > { %8292 = vmatmul.mubr.msk.f32.vlgmr.msra.gmra.mrb[14].mxu1 %vm628_vm8, %v10780_v11  ;;  %8880 = vmatprep.subr.bf16.mxu0 %v9314_v57 }
 0x3a9   : > { %8954 = vmatpush3.bf16.msra.mxu1 %v10477_v0  ;;  %8302 = vmatprep.mubr.msk.f32.mxu1 %vm628_vm8, %v10800_v45 }
 0x3aa   : > { %8956 = vmatprep.subr.bf16.mxu1 %v10489_v10 }
 0x3ab   : > { %8882 = vmatpush3.bf16.msra.mxu0 %v8881_v24 }
 0x3ac   : > { %8896 = vmatprep.subr.bf16.mxu0 %v10402_v36 }
 0x3ad   : > { %8958 = vmatpush3.bf16.msra.mxu1 %v10489_v10  ;;  %v3743_v26 = vpop.f32.mrb[10].mxu1 }
 0x3ae   : > { %8196 = vmatmul.mubr.msk.f32.vlgmr.msra.gmra.mrb[18].mxu0 %vm3603_vm11, %v3839_v35  ;;  %v8159_v48 = vpop.f32.mrb[11].mxu1  ;;  %8959 = vmatprep.subr.bf16.mxu1 %v9314_v57  ;;  %v7423_v35 = vld [vmem:[%s11425_s10 + $0x140] sm:$0xff] }
 0x3af   : > { %8898 = vmatpush3.bf16.msra.mxu0 %v10402_v36  ;;  %8225 = vmatprep.mubr.msk.f32.mxu0 %vm628_vm8, %v10529_v16  ;;  %v7416_v16 = vld [vmem:[%s11425_s10 + $0x110] sm:$0xff] }
 0x3b0   : > { %8303 = vmatmul.mubr.msk.f32.vlgmr.msra.gmra.mrb[14].mxu1 %vm628_vm8, %v10786_v34  ;;  %8900 = vmatprep.subr.bf16.mxu0 %v10413_v7  ;;  %v8963_v51 = vpack.c.bf16 %v7417_v60, %v7416_v16  ;;  %v7426_v16 = vld [vmem:[%s11425_s10 + $0x158] sm:$0xff] }
 0x3b1   : > { %8326 = vmatprep.mubr.msk.f32.mxu1 %vm9313_vm4, %v9312_v2 }
 0x3b3   : > { %8902 = vmatpush3.bf16.msra.mxu0 %v10413_v7 }
 0x3b4   : > { %8904 = vmatprep.subr.bf16.mxu0 %v10426_v4 }
 0x3b6   : > { %8226 = vmatmul.mubr.msk.f32.vlgmr.msra.gmra.mrb[20].mxu0 %vm628_vm8, %v10522_v22 }
 0x3b7   : > { %8906 = vmatpush3.bf16.msra.mxu0 %v10426_v4  ;;  %8236 = vmatprep.mubr.msk.f32.mxu0 %vm628_vm8, %v10514_v21  ;;  %v7414_v21 = vld [vmem:[%s11425_s10 + $0x100] sm:$0xff] }
 0x3b8   : > { %8908 = vmatprep.subr.bf16.mxu0 %v10438_v46 }
 0x3bb   : > { %8910 = vmatpush3.bf16.msra.mxu0 %v10438_v46 }
 0x3bc   : > { %8912 = vmatprep.subr.bf16.mxu0 %v10454_v39 }
 0x3be   : > { %8237 = vmatmul.mubr.msk.f32.vlgmr.msra.gmra.mrb[20].mxu0 %vm628_vm8, %v10516_v53  ;;  %v7415_v53 = vld [vmem:[%s11425_s10 + $0x108] sm:$0xff] }
 0x3bf   : > { %8914 = vmatpush3.bf16.msra.mxu0 %v10454_v39  ;;  %8247 = vmatprep.mubr.msk.f32.mxu0 %vm628_vm8, %v10694_v61  ;;  %v8960_v22 = vpack.c.bf16 %v7415_v53, %v7414_v21 }
 0x3c0   : > { %8916 = vmatprep.subr.bf16.mxu0 %v10466_v58 }
 0x3c1   : > { %8961 = vmatpush3.bf16.msra.mxu1 %v8960_v22  ;;  %v7425_v22 = vld [vmem:[%s11425_s10 + $0x150] sm:$0xff] }
 0x3c2   : > { %8962 = vmatprep.subr.bf16.mxu1 %v9314_v57  ;;  %v8975_v60 = vpack.c.bf16 %v7426_v16, %v7425_v22  ;;  %v7469_v16 = vld [vmem:[%s11425_s10 + $0x210] sm:$0xff] }
 0x3c3   : > { %8918 = vmatpush3.bf16.msra.mxu0 %v10466_v58 }
 0x3c4   : > { %8920 = vmatprep.subr.bf16.mxu0 %v10477_v0 }
 0x3c5   : > { %8964 = vmatpush3.bf16.msra.mxu1 %v8963_v51  ;;  %v7427_v51 = vld [vmem:[%s11425_s10 + $0x160] sm:$0xff] }
 0x3c6   : > { %8248 = vmatmul.mubr.msk.f32.vlgmr.msra.gmra.mrb[20].mxu0 %vm628_vm8, %v10696_v12  ;;  %8965 = vmatprep.subr.bf16.mxu1 %v9314_v57  ;;  %v8978_v52 = vpack.c.bf16 %v7428_v43, %v7427_v51  ;;  %v7471_v43 = vld [vmem:[%s11425_s10 + $0x220] sm:$0xff] }
 0x3c7   : > { %8922 = vmatpush3.bf16.msra.mxu0 %v10477_v0  ;;  %8258 = vmatprep.mubr.msk.f32.mxu0 %vm628_vm8, %v10719_v1 }
 0x3c8   : > { %8924 = vmatprep.subr.bf16.mxu0 %v10489_v10 }
 0x3c9   : > { %8967 = vmatpush3.bf16.msra.mxu1 %v8966_v37  ;;  %v7429_v37 = vld [vmem:[%s11425_s10 + $0x170] sm:$0xff] }
 0x3ca   : > { %8968 = vmatprep.subr.bf16.mxu1 %v9314_v57  ;;  %v8981_v28 = vpack.c.bf16 %v7430_v20, %v7429_v37  ;;  %v7473_v20 = vld [vmem:[%s11425_s10 + $0x230] sm:$0xff] }
 0x3cb   : > { %8926 = vmatpush3.bf16.msra.mxu0 %v10489_v10 }
 0x3cc   : > { %8305 = vmatprep.subr.mxu0 %v9312_v2 }
 0x3cd   : > { %8970 = vmatpush3.bf16.msra.mxu1 %v8969_v8  ;;  %v7432_v8 = vld [vmem:[%s11425_s10 + $0x180] sm:$0xff] }
 0x3ce   : > { %8259 = vmatmul.mubr.msk.f32.vlgmr.msra.gmra.mrb[20].mxu0 %vm628_vm8, %v10700_v15  ;;  %8983 = vmatprep.subr.bf16.mxu1 %v9314_v57 }
 0x3cf   : > { %8307 = vmatprep.mubr.msk.f32.mxu0 %vm9313_vm4, %v9312_v2 }
 0x461   : > { %v3673_v61 = vpop.f32.mrb[14].mxu0 }
 0x462   : > { %v3744_v12 = vadd.f32 %v3743_v26, %v3673_v61  ;;  %v8124_v47 = vpop.f32.mrb[15].mxu0  ;;  %v7424_v26 = vld [vmem:[%s11425_s10 + $0x148] sm:$0xff] }
 0x463   : > { %v3991_v59 = vpop.f32.mrb[12].mxu1  ;;  %v8972_v53 = vpack.c.bf16 %v7424_v26, %v7423_v35  ;;  %v7433_v61 = vld [vmem:[%s11425_s10 + $0x188] sm:$0xff] }
 0x464   : > { %v8216_v15 = vpop.f32.mrb[13].mxu1  ;;  %v7442_v47 = vld [vmem:[%s11425_s10 + $0x1c8] sm:$0xff] }
 0x465   : > { %v7434_v15 = vld [vmem:[%s11425_s10 + $0x190] sm:$0xff] }
 0x471   : > { %v3825_v32 = vpop.f32.mrb[16].mxu0 }
 0x472   : > { %v3829_v33 = vadd.f32 %v3825_v32, %v3744_v12  ;;  %v8178_v6 = vpop.f32.mrb[17].mxu0  ;;  %v7441_v12 = vld [vmem:[%s11425_s10 + $0x1c0] sm:$0xff]  ;;  %v7435_v32 = vld [vmem:[%s11425_s10 + $0x198] sm:$0xff] }
 0x473   : > { %v8996_v6 = vpack.c.bf16 %v7442_v47, %v7441_v12 }
 0x481   : > { %v3908_v29 = vpop.f32.mrb[18].mxu0 }
 0x482   : > { %v3912_v23 = vadd.f32 %v3908_v29, %v3829_v33  ;;  %v8197_v14 = vpop.f32.mrb[19].mxu0 }
 0x483   : > { %v8304_v1 = vpop.f32.mrb[14].mxu1  ;;  %v7443_v14 = vld [vmem:[%s11425_s10 + $0x1d0] sm:$0xff] }
 0x484   : > { %v4629_v3 = vpop.f32.mrb[15].mxu1  ;;  %v10878_v40 = vadd.f32 %v3991_v59, %v3912_v23  ;;  %v4641_v44 = vmul.f32 %v8304_v1, %v10577_v42  ;;  %v8984_v59 = vpack.c.bf16 %v7433_v61, %v7432_v8  ;;  %v7444_v1 = vld [vmem:[%s11425_s10 + $0x1d8] sm:$0xff] }
 0x485   : > { %v4640_v63 = vmul.f32 %v10577_v42, %v4629_v3  ;;  %v8987_v3 = vpack.c.bf16 %v7435_v32, %v7434_v15 }
 0x486   : > { %v4643_v56 = vadd.f32 %v10583_v49, %v4641_v44  ;;  %v7436_v44 = vld [vmem:[%s11425_s10 + $0x1a0] sm:$0xff] }
 0x487   : > { %v4642_v25 = vadd.f32 %v10583_v49, %v4640_v63  ;;  %v7437_v63 = vld [vmem:[%s11425_s10 + $0x1a8] sm:$0xff] }
 0x488   : > { %v4645_v18 = vmax.f32 %v4643_v56, 0.0  ;;  %v7445_v56 = vld [vmem:[%s11425_s10 + $0x1e0] sm:$0xff] }
 0x489   : > { %v4644_v38 = vmax.f32 %v4642_v25, 0.0  ;;  %v7438_v25 = vld [vmem:[%s11425_s10 + $0x1b0] sm:$0xff] }
 0x4a1   : > { %v8260_v27 = vpop.f32.mrb[20].mxu0 }
 0x4a2   : > { %v4316_v30 = vmul.f32 %v8260_v27, %v10577_v42  ;;  %v4304_v19 = vpop.f32.mrb[21].mxu0  ;;  %v8999_v27 = vpack.c.bf16 %v7444_v1, %v7443_v14 }
 0x4a3   : > { %v4315_v55 = vmul.f32 %v10577_v42, %v4304_v19  ;;  %v8990_v19 = vpack.c.bf16 %v7437_v63, %v7436_v44 }
 0x4a4   : > { %v4318_v62 = vadd.f32 %v10583_v49, %v4316_v30  ;;  %v7446_v30 = vld [vmem:[%s11425_s10 + $0x1e8] sm:$0xff] }
 0x4a5   : > { %v4317_v5 = vadd.f32 %v10583_v49, %v4315_v55  ;;  %v7439_v55 = vld [vmem:[%s11425_s10 + $0x1b8] sm:$0xff] }
 0x4a6   : > { %v4320_v31 = vmax.f32 %v4318_v62, 0.0  ;;  %v9002_v62 = vpack.c.bf16 %v7446_v30, %v7445_v56 }
 0x4a7   : > { %v4319_v9 = vmax.f32 %v4317_v5, 0.0  ;;  %v7447_v5 = vld [vmem:[%s11425_s10 + $0x1f0] sm:$0xff] }
 0x4a8   : > { %v4647_v41 = vmax.f32 %v4320_v31, %v4645_v18  ;;  %v7448_v18 = vld [vmem:[%s11425_s10 + $0x1f8] sm:$0xff]  ;;  %v8993_v31 = vpack.c.bf16 %v7439_v55, %v7438_v25 }
 0x4a9   : > { %v4646_v13 = vmax.f32 %v4319_v9, %v4644_v38  ;;  %v9005_v38 = vpack.c.bf16 %v7448_v18, %v7447_v5  ;;  %v5207_v9 = vld [vmem:[#allocation3 + $0x50] sm:$0xff] }
 0x4aa   : > { %v4651_v17 = vrot.slane %v4647_v41, 1  ;;  %v5208_v41 = vld [vmem:[#allocation3 + $0x58] sm:$0x3] }
 0x4ab   : > { %v4650_v24 = vrot.slane %v4646_v13, 1 }
 0x4ad   : > { %v4652_v48 = vsel %vm799_vm6, %v4650_v24, %v4651_v17  ;;  %v5292_v17 = vrot.slane %v5207_v9, 1  ;;  %v5293_v24 = vrot.slane %v5208_v41, 1 }
 0x4ae   : > { %v4654_v21 = vmax.f32 %v4646_v13, %v4652_v48 }
 0x4af   : > { %v5294_v26 = vsel %vm799_vm6, %v5292_v17, %v5293_v24 }
 0x4b0   : > { %8306 = vmatpush3.msra.mxu0 %v4654_v21  ;;  %v7467_v21 = vld [vmem:[%s11425_s10 + $0x200] sm:$0xff] }
 0x4b1   : > { %8308 = vmatmul.mubr.msk.f32.vlgmr.msra.gmra.mrb[22].mxu0 %vm3522_vm10, %v9622_v54  ;;  %8971 = vmatprep.subr.bf16.mxu0 %v9314_v57 }
 0x4b2   : > { %8973 = vmatpush3.bf16.msra.mxu0 %v8972_v53  ;;  %8345 = vmatprep.mubr.msk.f32.mxu0 %vm9313_vm4, %v9312_v2  ;;  %v7468_v53 = vld [vmem:[%s11425_s10 + $0x208] sm:$0xff] }
 0x4b3   : > { %8974 = vmatprep.subr.bf16.mxu0 %v9314_v57  ;;  %v9072_v22 = vpack.c.bf16 %v7468_v53, %v7467_v21  ;;  %v7478_v21 = vld [vmem:[%s11425_s10 + $0x250] sm:$0xff]  ;;  %v7479_v53 = vld [vmem:[%s11425_s10 + $0x258] sm:$0xff] }
 0x4b6   : > { %8976 = vmatpush3.bf16.msra.mxu0 %v8975_v60  ;;  %v7470_v60 = vld [vmem:[%s11425_s10 + $0x218] sm:$0xff] }
 0x4b7   : > { %8977 = vmatprep.subr.bf16.mxu0 %v9314_v57  ;;  %v9075_v51 = vpack.c.bf16 %v7470_v60, %v7469_v16  ;;  %v7480_v16 = vld [vmem:[%s11425_s10 + $0x260] sm:$0xff]  ;;  %v7481_v60 = vld [vmem:[%s11425_s10 + $0x268] sm:$0xff] }
 0x4ba   : > { %8979 = vmatpush3.bf16.msra.mxu0 %v8978_v52  ;;  %v7472_v52 = vld [vmem:[%s11425_s10 + $0x228] sm:$0xff] }
 0x4bb   : > { %8980 = vmatprep.subr.bf16.mxu0 %v9314_v57  ;;  %v9078_v37 = vpack.c.bf16 %v7472_v52, %v7471_v43  ;;  %v7482_v43 = vld [vmem:[%s11425_s10 + $0x270] sm:$0xff]  ;;  %v7483_v52 = vld [vmem:[%s11425_s10 + $0x278] sm:$0xff] }
 0x4be   : > { %8982 = vmatpush3.bf16.msra.mxu0 %v8981_v28  ;;  %v7474_v28 = vld [vmem:[%s11425_s10 + $0x238] sm:$0xff] }
 0x4bf   : > { %8995 = vmatprep.subr.bf16.mxu0 %v9314_v57  ;;  %v9081_v8 = vpack.c.bf16 %v7474_v28, %v7473_v20  ;;  %v7485_v20 = vld [vmem:[%s11425_s10 + $0x280] sm:$0xff]  ;;  %v7486_v28 = vld [vmem:[%s11425_s10 + $0x288] sm:$0xff] }
 0x584   : > { %v4721_v33 = vpop.f32.mrb[22].mxu0 }
 0x585   : > { %v4817_v29 = vrot.slane %v4721_v33, 1  ;;  %v8309_v23 = vpop.f32.mrb[23].mxu0  ;;  %8327 = vmatmul.mubr.msk.f32.vlgmr.msra.gmra.mrb[16].mxu1 %vm3603_vm11, %v4721_v33  ;;  %v4900_v13 = vrot.slane %v4721_v33, 2  ;;  %v4983_v35 = vrot.slane %v4721_v33, 3 }
 0x586   : > { %8985 = vmatpush3.bf16.msra.mxu1 %v8984_v59  ;;  %8364 = vmatprep.mubr.msk.f32.mxu1 %vm9313_vm4, %v9312_v2 }
 0x587   : > { %8346 = vmatmul.mubr.msk.f32.vlgmr.msra.gmra.mrb[24].mxu0 %vm3603_vm11, %v4817_v29  ;;  %8986 = vmatprep.subr.bf16.mxu1 %v9314_v57 }
 0x588   : > { %8997 = vmatpush3.bf16.msra.mxu0 %v8996_v6  ;;  %8383 = vmatprep.mubr.msk.f32.mxu0 %vm9313_vm4, %v9312_v2 }
 0x589   : > { %8998 = vmatprep.subr.bf16.mxu0 %v9314_v57 }
 0x58a   : > { %8988 = vmatpush3.bf16.msra.mxu1 %v8987_v3 }
 0x58b   : > { %8989 = vmatprep.subr.bf16.mxu1 %v9314_v57 }
 0x58c   : > { %9000 = vmatpush3.bf16.msra.mxu0 %v8999_v27 }
 0x58d   : > { %9001 = vmatprep.subr.bf16.mxu0 %v9314_v57 }
 0x58e   : > { %8991 = vmatpush3.bf16.msra.mxu1 %v8990_v19 }
 0x58f   : > { %8992 = vmatprep.subr.bf16.mxu1 %v9314_v57 }
 0x590   : > { %9003 = vmatpush3.bf16.msra.mxu0 %v9002_v62 }
 0x591   : > { %9004 = vmatprep.subr.bf16.mxu0 %v9314_v57 }
 0x592   : > { %8994 = vmatpush3.bf16.msra.mxu1 %v8993_v31 }
 0x593   : > { %9008 = vmatprep.subr.bf16.mxu1 %v10402_v36 }
 0x594   : > { %9006 = vmatpush3.bf16.msra.mxu0 %v9005_v38 }
 0x595   : > { %8365 = vmatmul.mubr.msk.f32.vlgmr.msra.gmra.mrb[18].mxu1 %vm3603_vm11, %v4900_v13  ;;  %9040 = vmatprep.subr.bf16.mxu0 %v10402_v36 }
 0x596   : > { %9010 = vmatpush3.bf16.msra.mxu1 %v10402_v36  ;;  %8394 = vmatprep.mubr.msk.f32.mxu1 %vm628_vm8, %v10800_v45 }
 0x597   : > { %8384 = vmatmul.mubr.msk.f32.vlgmr.msra.gmra.mrb[26].mxu0 %vm3603_vm11, %v4983_v35  ;;  %9012 = vmatprep.subr.bf16.mxu1 %v10413_v7  ;;  %v7476_v35 = vld [vmem:[%s11425_s10 + $0x240] sm:$0xff] }
 0x598   : > { %9042 = vmatpush3.bf16.msra.mxu0 %v10402_v36  ;;  %8438 = vmatprep.mubr.msk.f32.mxu0 %vm628_vm8, %v5294_v26 }
 0x599   : > { %9044 = vmatprep.subr.bf16.mxu0 %v10413_v7 }
 0x59a   : > { %9014 = vmatpush3.bf16.msra.mxu1 %v10413_v7 }
 0x59b   : > { %9016 = vmatprep.subr.bf16.mxu1 %v10426_v4 }
 0x59c   : > { %9046 = vmatpush3.bf16.msra.mxu0 %v10413_v7 }
 0x59d   : > { %8395 = vmatmul.mubr.msk.f32.vlgmr.msra.gmra.mrb[20].mxu1 %vm628_vm8, %v10786_v34  ;;  %9048 = vmatprep.subr.bf16.mxu0 %v10426_v4  ;;  %v11023_v34 = vld [vmem:[#allocation3 + $0x68] sm:$0x3] }
 0x59e   : > { %9018 = vmatpush3.bf16.msra.mxu1 %v10426_v4  ;;  %8405 = vmatprep.mubr.msk.f32.mxu1 %vm628_vm8, %v10768_v50  ;;  %v11017_v50 = vld [vmem:[#allocation3 + $0x60] sm:$0xff]  ;;  %v11030_v45 = vrot.slane %v11023_v34, 1 }
 0x59f   : > { %8439 = vmatmul.mubr.msk.f32.vlgmr.msra.gmra.mrb[28].mxu0 %vm628_vm8, %v5293_v24  ;;  %9020 = vmatprep.subr.bf16.mxu1 %v10438_v46 }
 0x5a0   : > { %9050 = vmatpush3.bf16.msra.mxu0 %v10426_v4  ;;  %8449 = vmatprep.mubr.msk.f32.mxu0 %vm628_vm8, %v5207_v9 }
 0x5a1   : > { %9052 = vmatprep.subr.bf16.mxu0 %v10438_v46 }
 0x5a2   : > { %9022 = vmatpush3.bf16.msra.mxu1 %v10438_v46 }
 0x5a3   : > { %9024 = vmatprep.subr.bf16.mxu1 %v10454_v39 }
 0x5a4   : > { %9054 = vmatpush3.bf16.msra.mxu0 %v10438_v46 }
 0x5a5   : > { %8406 = vmatmul.mubr.msk.f32.vlgmr.msra.gmra.mrb[20].mxu1 %vm628_vm8, %v10780_v11  ;;  %9056 = vmatprep.subr.bf16.mxu0 %v10454_v39  ;;  %v5617_v11 = vrot.slane %v11017_v50, 1 }
 0x5a6   : > { %9026 = vmatpush3.bf16.msra.mxu1 %v10454_v39  ;;  %8416 = vmatprep.mubr.msk.f32.mxu1 %vm628_vm8, %v5207_v9 }
 0x5a7   : > { %8450 = vmatmul.mubr.msk.f32.vlgmr.msra.gmra.mrb[28].mxu0 %vm628_vm8, %v5208_v41  ;;  %9028 = vmatprep.subr.bf16.mxu1 %v10466_v58  ;;  %v11041_v48 = vsel %vm799_vm6, %v5617_v11, %v11030_v45 }
 0x5a8   : > { %9058 = vmatpush3.bf16.msra.mxu0 %v10454_v39  ;;  %8460 = vmatprep.mubr.msk.f32.mxu0 %vm628_vm8, %v11017_v50 }
 0x5a9   : > { %9060 = vmatprep.subr.bf16.mxu0 %v10466_v58 }
 0x5aa   : > { %9030 = vmatpush3.bf16.msra.mxu1 %v10466_v58 }
 0x5ab   : > { %9032 = vmatprep.subr.bf16.mxu1 %v10477_v0 }
 0x5ac   : > { %9062 = vmatpush3.bf16.msra.mxu0 %v10466_v58 }
 0x5ad   : > { %8417 = vmatmul.mubr.msk.f32.vlgmr.msra.gmra.mrb[20].mxu1 %vm628_vm8, %v5208_v41  ;;  %9064 = vmatprep.subr.bf16.mxu0 %v10477_v0 }
 0x5ae   : > { %9034 = vmatpush3.bf16.msra.mxu1 %v10477_v0  ;;  %8427 = vmatprep.mubr.msk.f32.mxu1 %vm628_vm8, %v5294_v26 }
 0x5af   : > { %8461 = vmatmul.mubr.msk.f32.vlgmr.msra.gmra.mrb[28].mxu0 %vm628_vm8, %v11023_v34  ;;  %9036 = vmatprep.subr.bf16.mxu1 %v10489_v10 }
 0x5b0   : > { %9066 = vmatpush3.bf16.msra.mxu0 %v10477_v0  ;;  %8471 = vmatprep.mubr.msk.f32.mxu0 %vm628_vm8, %v11041_v48 }
 0x5b1   : > { %9068 = vmatprep.subr.bf16.mxu0 %v10489_v10 }
 0x5b2   : > { %9038 = vmatpush3.bf16.msra.mxu1 %v10489_v10 }
 0x5b3   : > { %8474 = vmatprep.subr.mxu1 %v9312_v2 }
 0x5b4   : > { %9070 = vmatpush3.bf16.msra.mxu0 %v10489_v10 }
 0x5b5   : > { %8428 = vmatmul.mubr.msk.f32.vlgmr.msra.gmra.mrb[20].mxu1 %vm628_vm8, %v5293_v24  ;;  %9071 = vmatprep.subr.bf16.mxu0 %v9314_v57 }
 0x5b6   : > { %8476 = vmatprep.mubr.msk.f32.mxu1 %vm9313_vm4, %v9312_v2 }
 0x5b7   : > { %8472 = vmatmul.mubr.msk.f32.vlgmr.msra.gmra.mrb[28].mxu0 %vm628_vm8, %v11030_v45 }
 0x5b8   : > { %8495 = vmatprep.mubr.msk.f32.mxu0 %vm9313_vm4, %v9312_v2  ;;  %9073 = vmatpush3.bf16.msra.mxu0 %v9072_v22  ;;  %v9087_v22 = vpack.c.bf16 %v7479_v53, %v7478_v21 }
 0x5b9   : > { %9074 = vmatprep.subr.bf16.mxu0 %v9314_v57 }
 0x5bc   : > { %9076 = vmatpush3.bf16.msra.mxu0 %v9075_v51  ;;  %v9090_v51 = vpack.c.bf16 %v7481_v60, %v7480_v16 }
 0x5bd   : > { %9077 = vmatprep.subr.bf16.mxu0 %v9314_v57 }
 0x5c0   : > { %9079 = vmatpush3.bf16.msra.mxu0 %v9078_v37  ;;  %v9093_v37 = vpack.c.bf16 %v7483_v52, %v7482_v43 }
 0x5c1   : > { %9080 = vmatprep.subr.bf16.mxu0 %v9314_v57 }
 0x5c4   : > { %9082 = vmatpush3.bf16.msra.mxu0 %v9081_v8  ;;  %v7494_v8 = vld [vmem:[%s11425_s10 + $0x2c0] sm:$0xff] }
 0x5c5   : > { %9095 = vmatprep.subr.bf16.mxu0 %v9314_v57 }
 0x658   : > { %v4803_v61 = vpop.f32.mrb[16].mxu1 }
 0x659   : > { %v4807_v12 = vadd.f32 %v4803_v61, %v10878_v40  ;;  %v8328_v47 = vpop.f32.mrb[17].mxu1  ;;  %v7495_v61 = vld [vmem:[%s11425_s10 + $0x2c8] sm:$0xff] }
 0x65a   : > { %v4886_v59 = vpop.f32.mrb[24].mxu0  ;;  %v7487_v47 = vld [vmem:[%s11425_s10 + $0x290] sm:$0xff] }
 0x65b   : > { %v4890_v15 = vadd.f32 %v4886_v59, %v4807_v12  ;;  %v8347_v32 = vpop.f32.mrb[25].mxu0  ;;  %v9096_v12 = vpack.c.bf16 %v7486_v28, %v7485_v20  ;;  %v7488_v59 = vld [vmem:[%s11425_s10 + $0x298] sm:$0xff] }
 0x65c   : > { %v9108_v32 = vpack.c.bf16 %v7495_v61, %v7494_v8 }
 0x668   : > { %v4969_v33 = vpop.f32.mrb[18].mxu1 }
 0x669   : > { %v4973_v6 = vadd.f32 %v4969_v33, %v4890_v15  ;;  %v8366_v29 = vpop.f32.mrb[19].mxu1 }
 0x66a   : > { %v5052_v23 = vpop.f32.mrb[26].mxu0  ;;  %v7496_v29 = vld [vmem:[%s11425_s10 + $0x2d0] sm:$0xff] }
 0x66b   : > { %v11088_v14 = vadd.f32 %v5052_v23, %v4973_v6  ;;  %v8385_v1 = vpop.f32.mrb[27].mxu0  ;;  %v7497_v23 = vld [vmem:[%s11425_s10 + $0x2d8] sm:$0xff] }
 0x66c   : > { %v9099_v1 = vpack.c.bf16 %v7488_v59, %v7487_v47 }
 0x688   : > { %v8429_v3 = vpop.f32.mrb[20].mxu1 }
 0x689   : > { %v5377_v44 = vmul.f32 %v8429_v3, %v10577_v42  ;;  %v5365_v63 = vpop.f32.mrb[21].mxu1  ;;  %v7489_v3 = vld [vmem:[%s11425_s10 + $0x2a0] sm:$0xff] }
 0x68a   : > { %v5376_v27 = vmul.f32 %v10577_v42, %v5365_v63  ;;  %v8473_v56 = vpop.f32.mrb[28].mxu0  ;;  %v9111_v63 = vpack.c.bf16 %v7497_v23, %v7496_v29 }
 0x68b   : > { %v5379_v40 = vadd.f32 %v10583_v49, %v5377_v44  ;;  %v5702_v30 = vmul.f32 %v8473_v56, %v10577_v42  ;;  %v5690_v19 = vpop.f32.mrb[29].mxu0  ;;  %v7490_v44 = vld [vmem:[%s11425_s10 + $0x2a8] sm:$0xff] }
 0x68c   : > { %v5378_v25 = vadd.f32 %v10583_v49, %v5376_v27  ;;  %v5701_v55 = vmul.f32 %v10577_v42, %v5690_v19  ;;  %v7477_v42 = vld [vmem:[%s11425_s10 + $0x248] sm:$0xff]  ;;  %v7498_v27 = vld [vmem:[%s11425_s10 + $0x2e0] sm:$0xff]  ;;  %v7492_v19 = vld [vmem:[%s11425_s10 + $0x2b8] sm:$0xff] }
 0x68d   : > { %v5704_v62 = vadd.f32 %v10583_v49, %v5702_v30  ;;  %v5381_v18 = vmax.f32 %v5379_v40, 0.0  ;;  %v7499_v56 = vld [vmem:[%s11425_s10 + $0x2e8] sm:$0xff]  ;;  %v9102_v40 = vpack.c.bf16 %v7490_v44, %v7489_v3  ;;  %v7491_v30 = vld [vmem:[%s11425_s10 + $0x2b0] sm:$0xff] }
 0x68e   : > { %v5703_v5 = vadd.f32 %v10583_v49, %v5701_v55  ;;  %v5380_v38 = vmax.f32 %v5378_v25, 0.0  ;;  %v9084_v49 = vpack.c.bf16 %v7477_v42, %v7476_v35  ;;  %v9114_v25 = vpack.c.bf16 %v7499_v56, %v7498_v27  ;;  %v7500_v55 = vld [vmem:[%s11425_s10 + $0x2f0] sm:$0xff]  ;;  %v7525_v35 = vld [vmem:[%s11425_s10 + $0x328] sm:$0xff] }
 0x68f   : > { %v5706_v31 = vmax.f32 %v5704_v62, 0.0  ;;  %v7501_v62 = vld [vmem:[%s11425_s10 + $0x2f8] sm:$0xff] }
 0x690   : > { %v5705_v9 = vmax.f32 %v5703_v5, 0.0  ;;  %v9105_v5 = vpack.c.bf16 %v7492_v19, %v7491_v30 }
 0x691   : > { %v5708_v41 = vmax.f32 %v5381_v18, %v5706_v31  ;;  %v9117_v18 = vpack.c.bf16 %v7501_v62, %v7500_v55  ;;  %v6268_v31 = vld [vmem:[#allocation3 + $0x70] sm:$0xff] }
 0x692   : > { %v5707_v13 = vmax.f32 %v5380_v38, %v5705_v9  ;;  %v6269_v38 = vld [vmem:[#allocation3 + $0x78] sm:$0x3]  ;;  %v7529_v62 = vld [vmem:[%s11425_s10 + $0x340] sm:$0xff] }
 0x693   : > { %v5712_v17 = vrot.slane %v5708_v41, 1  ;;  %v6353_v41 = vrot.slane %v6268_v31, 1 }
 0x694   : > { %v5711_v24 = vrot.slane %v5707_v13, 1 }
 0x696   : > { %v5713_v26 = vsel %vm799_vm6, %v5711_v24, %v5712_v17 }
 0x697   : > { %v5715_v11 = vmax.f32 %v5707_v13, %v5713_v26  ;;  %v6354_v13 = vrot.slane %v6269_v38, 1  ;;  %v7526_v26 = vld [vmem:[%s11425_s10 + $0x330] sm:$0xff] }
 0x699   : > { %8475 = vmatpush3.msra.mxu1 %v5715_v11  ;;  %v6355_v24 = vsel %vm799_vm6, %v6353_v41, %v6354_v13  ;;  %v7527_v11 = vld [vmem:[%s11425_s10 + $0x338] sm:$0xff] }
 0x69a   : > { %8477 = vmatmul.mubr.msk.f32.vlgmr.msra.gmra.mrb[22].mxu1 %vm3522_vm10, %v9622_v54  ;;  %9083 = vmatprep.subr.bf16.mxu1 %v9314_v57  ;;  %v7532_v41 = vld [vmem:[%s11425_s10 + $0x358] sm:$0xff] }
 0x69b   : > { %9085 = vmatpush3.bf16.msra.mxu1 %v9084_v49  ;;  %8514 = vmatprep.mubr.msk.f32.mxu1 %vm9313_vm4, %v9312_v2  ;;  %v9193_v49 = vpack.c.bf16 %v7527_v11, %v7526_v26  ;;  %v7549_v26 = vld [vmem:[%s11425_s10 + $0x3d0] sm:$0xff]  ;;  %v7550_v11 = vld [vmem:[%s11425_s10 + $0x3d8] sm:$0xff] }
 0x69c   : > { %9086 = vmatprep.subr.bf16.mxu1 %v9314_v57 }
 0x69f   : > { %9088 = vmatpush3.bf16.msra.mxu1 %v9087_v22 }
 0x6a0   : > { %9089 = vmatprep.subr.bf16.mxu1 %v9314_v57 }
 0x6a3   : > { %9091 = vmatpush3.bf16.msra.mxu1 %v9090_v51 }
 0x6a4   : > { %9092 = vmatprep.subr.bf16.mxu1 %v9314_v57 }
 0x6a7   : > { %9094 = vmatpush3.bf16.msra.mxu1 %v9093_v37 }
 0x6a8   : > { %9107 = vmatprep.subr.bf16.mxu1 %v9314_v57 }
 0x76d   : > { %v5782_v15 = vpop.f32.mrb[22].mxu1 }
 0x76e   : > { %v5878_v33 = vrot.slane %v5782_v15, 1  ;;  %v8478_v6 = vpop.f32.mrb[23].mxu1  ;;  %8496 = vmatmul.mubr.msk.f32.vlgmr.msra.gmra.mrb[30].mxu0 %vm3603_vm11, %v5782_v15  ;;  %v5961_v9 = vrot.slane %v5782_v15, 2  ;;  %v6044_v17 = vrot.slane %v5782_v15, 3 }
 0x76f   : > { %9097 = vmatpush3.bf16.msra.mxu0 %v9096_v12  ;;  %8533 = vmatprep.mubr.msk.f32.mxu0 %vm9313_vm4, %v9312_v2  ;;  %v9301_v12 = vld [vmem:[%s11421_s6] ss:$0 sm:$0xff] }
 0x770   : > { %8515 = vmatmul.mubr.msk.f32.vlgmr.msra.gmra.mrb[24].mxu1 %vm3603_vm11, %v5878_v33  ;;  %9098 = vmatprep.subr.bf16.mxu0 %v9314_v57 }
 0x771   : > { %9109 = vmatpush3.bf16.msra.mxu1 %v9108_v32  ;;  %8552 = vmatprep.mubr.msk.f32.mxu1 %vm9313_vm4, %v9312_v2  ;;  %v9302_v32 = vld [vmem:[%s11422_s7] ss:$0 sm:$0xff] }
 0x772   : > { %9110 = vmatprep.subr.bf16.mxu1 %v9314_v57 }
 0x773   : > { %9100 = vmatpush3.bf16.msra.mxu0 %v9099_v1 }
 0x774   : > { %9101 = vmatprep.subr.bf16.mxu0 %v9314_v57 }
 0x775   : > { %9112 = vmatpush3.bf16.msra.mxu1 %v9111_v63 }
 0x776   : > { %9113 = vmatprep.subr.bf16.mxu1 %v9314_v57 }
 0x777   : > { %9103 = vmatpush3.bf16.msra.mxu0 %v9102_v40 }
 0x778   : > { %9104 = vmatprep.subr.bf16.mxu0 %v9314_v57 }
 0x779   : > { %9115 = vmatpush3.bf16.msra.mxu1 %v9114_v25 }
 0x77a   : > { %9116 = vmatprep.subr.bf16.mxu1 %v9314_v57 }
 0x77b   : > { %9106 = vmatpush3.bf16.msra.mxu0 %v9105_v5  ;;  %v7530_v5 = vld [vmem:[%s11425_s10 + $0x348] sm:$0xff] }
 0x77c   : > { %9120 = vmatprep.subr.bf16.mxu0 %v10402_v36 }
 0x77d   : > { %9118 = vmatpush3.bf16.msra.mxu1 %v9117_v18 }
 0x77e   : > { %8534 = vmatmul.mubr.msk.f32.vlgmr.msra.gmra.mrb[32].mxu0 %vm3603_vm11, %v5961_v9  ;;  %9152 = vmatprep.subr.bf16.mxu1 %v10402_v36  ;;  %v7531_v9 = vld [vmem:[%s11425_s10 + $0x350] sm:$0xff] }
 0x77f   : > { %9122 = vmatpush3.bf16.msra.mxu0 %v10402_v36  ;;  %8563 = vmatprep.mubr.msk.f32.mxu0 %vm628_vm8, %v11041_v48  ;;  %v7524_v48 = vld [vmem:[%s11425_s10 + $0x320] sm:$0xff] }
 0x780   : > { %8553 = vmatmul.mubr.msk.f32.vlgmr.msra.gmra.mrb[26].mxu1 %vm3603_vm11, %v6044_v17  ;;  %9124 = vmatprep.subr.bf16.mxu0 %v10413_v7  ;;  %v9190_v42 = vpack.c.bf16 %v7525_v35, %v7524_v48  ;;  %v7533_v17 = vld [vmem:[%s11425_s10 + $0x360] sm:$0xff] }
 0x781   : > { %9154 = vmatpush3.bf16.msra.mxu1 %v10402_v36  ;;  %8607 = vmatprep.mubr.msk.f32.mxu1 %vm628_vm8, %v6355_v24  ;;  %v6593_v36 = vld [vmem:[#allocation3 + $0x80] sm:$0xff] }
 0x782   : > { %9156 = vmatprep.subr.bf16.mxu1 %v10413_v7 }
 0x783   : > { %9126 = vmatpush3.bf16.msra.mxu0 %v10413_v7 }
 0x784   : > { %9128 = vmatprep.subr.bf16.mxu0 %v10426_v4 }
 0x785   : > { %9158 = vmatpush3.bf16.msra.mxu1 %v10413_v7  ;;  %v6594_v7 = vld [vmem:[#allocation3 + $0x88] sm:$0x3] }
 0x786   : > { %8564 = vmatmul.mubr.msk.f32.vlgmr.msra.gmra.mrb[34].mxu0 %vm628_vm8, %v11030_v45  ;;  %9160 = vmatprep.subr.bf16.mxu1 %v10426_v4 }
 0x787   : > { %9130 = vmatpush3.bf16.msra.mxu0 %v10426_v4  ;;  %8574 = vmatprep.mubr.msk.f32.mxu0 %vm628_vm8, %v11017_v50  ;;  %v7522_v50 = vld [vmem:[%s11425_s10 + $0x310] sm:$0xff] }
 0x788   : > { %8608 = vmatmul.mubr.msk.f32.vlgmr.msra.gmra.mrb[28].mxu1 %vm628_vm8, %v6354_v13  ;;  %9132 = vmatprep.subr.bf16.mxu0 %v10438_v46 }
 0x789   : > { %9162 = vmatpush3.bf16.msra.mxu1 %v10426_v4  ;;  %8618 = vmatprep.mubr.msk.f32.mxu1 %vm628_vm8, %v6268_v31  ;;  %v6678_v4 = vrot.slane %v6593_v36, 1 }
 0x78a   : > { %9164 = vmatprep.subr.bf16.mxu1 %v10438_v46 }
 0x78b   : > { %9134 = vmatpush3.bf16.msra.mxu0 %v10438_v46 }
 0x78c   : > { %9136 = vmatprep.subr.bf16.mxu0 %v10454_v39 }
 0x78d   : > { %9166 = vmatpush3.bf16.msra.mxu1 %v10438_v46  ;;  %v6679_v46 = vrot.slane %v6594_v7, 1 }
 0x78e   : > { %8575 = vmatmul.mubr.msk.f32.vlgmr.msra.gmra.mrb[34].mxu0 %vm628_vm8, %v11023_v34  ;;  %9168 = vmatprep.subr.bf16.mxu1 %v10454_v39  ;;  %v7523_v34 = vld [vmem:[%s11425_s10 + $0x318] sm:$0xff] }
 0x78f   : > { %9138 = vmatpush3.bf16.msra.mxu0 %v10454_v39  ;;  %8585 = vmatprep.mubr.msk.f32.mxu0 %vm628_vm8, %v6268_v31  ;;  %v9187_v45 = vpack.c.bf16 %v7523_v34, %v7522_v50  ;;  %v7540_v50 = vld [vmem:[%s11425_s10 + $0x390] sm:$0xff]  ;;  %v7541_v34 = vld [vmem:[%s11425_s10 + $0x398] sm:$0xff] }
 0x790   : > { %8619 = vmatmul.mubr.msk.f32.vlgmr.msra.gmra.mrb[28].mxu1 %vm628_vm8, %v6269_v38  ;;  %9140 = vmatprep.subr.bf16.mxu0 %v10466_v58 }
 0x791   : > { %9170 = vmatpush3.bf16.msra.mxu1 %v10454_v39  ;;  %8629 = vmatprep.mubr.msk.f32.mxu1 %vm628_vm8, %v6593_v36  ;;  %v6680_v39 = vsel %vm799_vm6, %v6678_v4, %v6679_v46 }
 0x792   : > { %9172 = vmatprep.subr.bf16.mxu1 %v10466_v58 }
 0x793   : > { %9142 = vmatpush3.bf16.msra.mxu0 %v10466_v58 }
 0x794   : > { %9144 = vmatprep.subr.bf16.mxu0 %v10477_v0 }
 0x795   : > { %9174 = vmatpush3.bf16.msra.mxu1 %v10466_v58  ;;  %v7520_v58 = vld [vmem:[%s11425_s10 + $0x300] sm:$0xff] }
 0x796   : > { %8586 = vmatmul.mubr.msk.f32.vlgmr.msra.gmra.mrb[34].mxu0 %vm628_vm8, %v6269_v38  ;;  %9176 = vmatprep.subr.bf16.mxu1 %v10477_v0  ;;  %v9196_v38 = vpack.c.bf16 %v7530_v5, %v7529_v62 }
 0x797   : > { %9146 = vmatpush3.bf16.msra.mxu0 %v10477_v0  ;;  %8596 = vmatprep.mubr.msk.f32.mxu0 %vm628_vm8, %v6355_v24  ;;  %v7534_v24 = vld [vmem:[%s11425_s10 + $0x368] sm:$0xff] }
 0x798   : > { %8630 = vmatmul.mubr.msk.f32.vlgmr.msra.gmra.mrb[28].mxu1 %vm628_vm8, %v6594_v7  ;;  %9148 = vmatprep.subr.bf16.mxu0 %v10489_v10  ;;  %v9202_v36 = vpack.c.bf16 %v7534_v24, %v7533_v17  ;;  %v7536_v7 = vld [vmem:[%s11425_s10 + $0x378] sm:$0xff] }
 0x799   : > { %9178 = vmatpush3.bf16.msra.mxu1 %v10477_v0  ;;  %8640 = vmatprep.mubr.msk.f32.mxu1 %vm628_vm8, %v6680_v39  ;;  %v7521_v0 = vld [vmem:[%s11425_s10 + $0x308] sm:$0xff] }
 0x79a   : > { %9180 = vmatprep.subr.bf16.mxu1 %v10489_v10  ;;  %v7539_v39 = vld [vmem:[%s11425_s10 + $0x388] sm:$0xff] }
 0x79b   : > { %9150 = vmatpush3.bf16.msra.mxu0 %v10489_v10 }
 0x79c   : > { %8643 = vmatprep.subr.mxu0 %v9312_v2 }
 0x79d   : > { %9182 = vmatpush3.bf16.msra.mxu1 %v10489_v10  ;;  %v9184_v10 = vpack.c.bf16 %v7521_v0, %v7520_v58  ;;  %v7547_v58 = vld [vmem:[%s11425_s10 + $0x3c0] sm:$0xff]  ;;  %v7548_v0 = vld [vmem:[%s11425_s10 + $0x3c8] sm:$0xff] }
 0x79e   : > { %8597 = vmatmul.mubr.msk.f32.vlgmr.msra.gmra.mrb[34].mxu0 %vm628_vm8, %v6354_v13  ;;  %9183 = vmatprep.subr.bf16.mxu1 %v9314_v57  ;;  %v9199_v13 = vpack.c.bf16 %v7532_v41, %v7531_v9  ;;  %v9220_v48 = vpack.c.bf16 %v7548_v0, %v7547_v58 }
 0x79f   : > { %8645 = vmatprep.mubr.msk.f32.mxu0 %vm9313_vm4, %v9312_v2 }
 0x7a0   : > { %8641 = vmatmul.mubr.msk.f32.vlgmr.msra.gmra.mrb[28].mxu1 %vm628_vm8, %v6679_v46  ;;  %v7538_v46 = vld [vmem:[%s11425_s10 + $0x380] sm:$0xff] }
 0x7a1   : > { %8664 = vmatprep.mubr.msk.f32.mxu1 %vm9313_vm4, %v9312_v2  ;;  %9185 = vmatpush3.bf16.msra.mxu1 %v9184_v10  ;;  %v9208_v10 = vpack.c.bf16 %v7539_v39, %v7538_v46 }
 0x7a2   : > { %9186 = vmatprep.subr.bf16.mxu1 %v9314_v57 }
 0x7a5   : > { %9188 = vmatpush3.bf16.msra.mxu1 %v9187_v45 }
 0x7a6   : > { %9189 = vmatprep.subr.bf16.mxu1 %v9314_v57 }
 0x7a9   : > { %9191 = vmatpush3.bf16.msra.mxu1 %v9190_v42 }
 0x7aa   : > { %9192 = vmatprep.subr.bf16.mxu1 %v9314_v57 }
 0x7ad   : > { %9194 = vmatpush3.bf16.msra.mxu1 %v9193_v49  ;;  %v9211_v49 = vpack.c.bf16 %v7541_v34, %v7540_v50 }
 0x7ae   : > { %9207 = vmatprep.subr.bf16.mxu1 %v9314_v57 }
 0x841   : > { %v5864_v21 = vpop.f32.mrb[30].mxu0 }
 0x842   : > { %v5868_v53 = vadd.f32 %v5864_v21, %v11088_v14  ;;  %v8497_v22 = vpop.f32.mrb[31].mxu0  ;;  %v7542_v21 = vld [vmem:[%s11425_s10 + $0x3a0] sm:$0xff] }
 0x843   : > { %v5947_v16 = vpop.f32.mrb[24].mxu1  ;;  %v9223_v22 = vpack.c.bf16 %v7550_v11, %v7549_v26 }
 0x844   : > { %v5951_v60 = vadd.f32 %v5947_v16, %v5868_v53  ;;  %v8516_v51 = vpop.f32.mrb[25].mxu1  ;;  %v7543_v53 = vld [vmem:[%s11425_s10 + $0x3a8] sm:$0xff]  ;;  %v7551_v16 = vld [vmem:[%s11425_s10 + $0x3e0] sm:$0xff] }
 0x845   : > { %v9214_v51 = vpack.c.bf16 %v7543_v53, %v7542_v21 }
 0x851   : > { %v6030_v43 = vpop.f32.mrb[32].mxu0 }
 0x852   : > { %v6034_v52 = vadd.f32 %v6030_v43, %v5951_v60  ;;  %v8535_v37 = vpop.f32.mrb[33].mxu0  ;;  %v7552_v60 = vld [vmem:[%s11425_s10 + $0x3e8] sm:$0xff]  ;;  %v7544_v43 = vld [vmem:[%s11425_s10 + $0x3b0] sm:$0xff] }
 0x853   : > { %v6113_v20 = vpop.f32.mrb[26].mxu1  ;;  %v9226_v37 = vpack.c.bf16 %v7552_v60, %v7551_v16 }
 0x854   : > { %v11283_v28 = vadd.f32 %v6113_v20, %v6034_v52  ;;  %v8554_v8 = vpop.f32.mrb[27].mxu1  ;;  %v7545_v52 = vld [vmem:[%s11425_s10 + $0x3b8] sm:$0xff]  ;;  %v7553_v20 = vld [vmem:[%s11425_s10 + $0x3f0] sm:$0xff] }
 0x855   : > { %v7554_v8 = vld [vmem:[%s11425_s10 + $0x3f8] sm:$0xff] }
 0x871   : > { %v8598_v61 = vpop.f32.mrb[34].mxu0 }
 0x872   : > { %v6438_v47 = vmul.f32 %v9301_v12, %v8598_v61  ;;  %v6426_v59 = vpop.f32.mrb[35].mxu0  ;;  %v9217_v61 = vpack.c.bf16 %v7545_v52, %v7544_v43 }
 0x873   : > { %v6437_v15 = vmul.f32 %v9301_v12, %v6426_v59  ;;  %v8642_v14 = vpop.f32.mrb[28].mxu1 }
 0x874   : > { %v6440_v33 = vadd.f32 %v9302_v32, %v6438_v47  ;;  %v6763_v6 = vmul.f32 %v9301_v12, %v8642_v14  ;;  %v6751_v29 = vpop.f32.mrb[29].mxu1  ;;  %v7183_v14 = vld [vmem:[%s11428_s13 + $0x8] sm:$0xff] }
 0x875   : > { %v6439_v23 = vadd.f32 %v9302_v32, %v6437_v15  ;;  %v6762_v1 = vmul.f32 %v9301_v12, %v6751_v29  ;;  %v9229_v12 = vpack.c.bf16 %v7554_v8, %v7553_v20  ;;  %v7182_v15 = vld [vmem:[%s11428_s13] sm:$0xff] }
 0x876   : > { %v6765_v3 = vadd.f32 %v9302_v32, %v6763_v6  ;;  %v6442_v63 = vmax.f32 %v6440_v33, 0.0  ;;  %v9232_v33 = vpack.c.bf16 %v7183_v14, %v7182_v15  ;;  %v7185_v6 = vld [vmem:[%s11428_s13 + $0x18] sm:$0xff] }
 0x877   : > { %v6764_v44 = vadd.f32 %v9302_v32, %v6762_v1  ;;  %v6441_v56 = vmax.f32 %v6439_v23, 0.0  ;;  %v7184_v32 = vld [vmem:[%s11428_s13 + $0x10] sm:$0xff] }
 0x878   : > { %v6767_v27 = vmax.f32 %v6765_v3, 0.0 }
 0x879   : > { %v6766_v40 = vmax.f32 %v6764_v44, 0.0 }
 0x87a   : > { %v6769_v30 = vmax.f32 %v6442_v63, %v6767_v27 }
 0x87b   : > { %v6768_v19 = vmax.f32 %v6441_v56, %v6766_v40 }
 0x87c   : > { %v6773_v25 = vrot.slane %v6769_v30, 1 }
 0x87d   : > { %v6772_v55 = vrot.slane %v6768_v19, 1 }
 0x87f   : > { %v6774_v18 = vsel %vm799_vm6, %v6772_v55, %v6773_v25 }
 0x880   : > { %v6776_v31 = vmax.f32 %v6768_v19, %v6774_v18  ;;  %v7179_v19 = vld [vmem:[%s11427_s12] sm:$0x1] }
 0x882   : > { %8644 = vmatpush3.msra.mxu0 %v6776_v31 }
 0x883   : > { %8646 = vmatmul.mubr.msk.f32.vlgmr.msra.gmra.mrb[36].mxu0 %vm3522_vm10, %v9622_v54  ;;  %9195 = vmatprep.subr.bf16.mxu0 %v9314_v57  ;;  %v7535_v54 = vld [vmem:[%s11425_s10 + $0x370] sm:$0xff] }
 0x884   : > { %9197 = vmatpush3.bf16.msra.mxu0 %v9196_v38  ;;  %8683 = vmatprep.mubr.msk.f32.mxu0 %vm9313_vm4, %v9312_v2  ;;  %v9205_v4 = vpack.c.bf16 %v7536_v7, %v7535_v54 }
 0x885   : > { %9198 = vmatprep.subr.bf16.mxu0 %v9314_v57 }
 0x888   : > { %9200 = vmatpush3.bf16.msra.mxu0 %v9199_v13 }
 0x889   : > { %9201 = vmatprep.subr.bf16.mxu0 %v9314_v57 }
 0x88c   : > { %9203 = vmatpush3.bf16.msra.mxu0 %v9202_v36 }
 0x88d   : > { %9204 = vmatprep.subr.bf16.mxu0 %v9314_v57 }
 0x890   : > { %9206 = vmatpush3.bf16.msra.mxu0 %v9205_v4 }
 0x891   : > { %9219 = vmatprep.subr.bf16.mxu0 %v9314_v57 }
 0x956   : > { %v6843_v45 = vpop.f32.mrb[36].mxu0 }
 0x957   : > { %v6939_v35 = vrot.slane %v6843_v45, 1  ;;  %8665 = vmatmul.mubr.msk.f32.vlgmr.msra.gmra.mrb[30].mxu1 %vm3603_vm11, %v6843_v45  ;;  %v8647_v42 = vpop.f32.mrb[37].mxu0  ;;  %v7022_v47 = vrot.slane %v6843_v45, 2  ;;  %v7105_v59 = vrot.slane %v6843_v45, 3 }
 0x958   : > { %9209 = vmatpush3.bf16.msra.mxu1 %v9208_v10  ;;  %8702 = vmatprep.mubr.msk.f32.mxu1 %vm9313_vm4, %v9312_v2 }
 0x959   : > { %8684 = vmatmul.mubr.msk.f32.vlgmr.msra.gmra.mrb[38].mxu0 %vm3603_vm11, %v6939_v35  ;;  %9210 = vmatprep.subr.bf16.mxu1 %v9314_v57 }
 0x95a   : > { %9221 = vmatpush3.bf16.msra.mxu0 %v9220_v48  ;;  %8721 = vmatprep.mubr.msk.f32.mxu0 %vm9313_vm4, %v9312_v2 }
 0x95b   : > { %9222 = vmatprep.subr.bf16.mxu0 %v9314_v57 }
 0x95c   : > { %9212 = vmatpush3.bf16.msra.mxu1 %v9211_v49 }
 0x95d   : > { %9213 = vmatprep.subr.bf16.mxu1 %v9314_v57 }
 0x95e   : > { %9224 = vmatpush3.bf16.msra.mxu0 %v9223_v22 }
 0x95f   : > { %9225 = vmatprep.subr.bf16.mxu0 %v9314_v57 }
 0x960   : > { %9215 = vmatpush3.bf16.msra.mxu1 %v9214_v51 }
 0x961   : > { %9216 = vmatprep.subr.bf16.mxu1 %v9314_v57 }
 0x962   : > { %9227 = vmatpush3.bf16.msra.mxu0 %v9226_v37 }
 0x963   : > { %9228 = vmatprep.subr.bf16.mxu0 %v9314_v57 }
 0x964   : > { %9218 = vmatpush3.bf16.msra.mxu1 %v9217_v61 }
 0x965   : > { %9231 = vmatprep.subr.bf16.mxu1 %v9314_v57 }
 0x966   : > { %9230 = vmatpush3.bf16.msra.mxu0 %v9229_v12 }
 0x967   : > { %8703 = vmatmul.mubr.msk.f32.vlgmr.msra.gmra.mrb[32].mxu1 %vm3603_vm11, %v7022_v47 }
 0x968   : > { %8732 = vmatprep.mubr.msk.f32.mxu1 %vm9313_vm4, %v9312_v2  ;;  %9233 = vmatpush3.bf16.msra.mxu1 %v9232_v33  ;;  %v9235_v2 = vpack.c.bf16 %v7185_v6, %v7184_v32 }
 0x969   : > { %8722 = vmatmul.mubr.msk.f32.vlgmr.msra.gmra.mrb[40].mxu0 %vm3603_vm11, %v7105_v59  ;;  %9234 = vmatprep.subr.bf16.mxu1 %v9314_v57 }
 0x96c   : > { %9236 = vmatpush3.bf16.msra.mxu1 %v9235_v2 }
 0xa2a   : > { %v6925_v29 = vpop.f32.mrb[30].mxu1 }
 0xa2b   : > { %v6929_v23 = vadd.f32 %v6925_v29, %v11283_v28  ;;  %v8666_v1 = vpop.f32.mrb[31].mxu1  ;;  %v7186_v28 = vld [vmem:[#allocation4] sm:$0x1] }
 0xa2c   : > { %v7008_v3 = vpop.f32.mrb[38].mxu0 }
 0xa2d   : > { %v7012_v44 = vadd.f32 %v7008_v3, %v6929_v23  ;;  %v8685_v63 = vpop.f32.mrb[39].mxu0 }
 0xa3a   : > { %v7091_v27 = vpop.f32.mrb[32].mxu1 }
 0xa3b   : > { %v7095_v56 = vadd.f32 %v7091_v27, %v7012_v44  ;;  %v8704_v40 = vpop.f32.mrb[33].mxu1 }
 0xa3c   : > { %v7174_v30 = vpop.f32.mrb[40].mxu0 }
 0xa3d   : > { %v7178_v25 = vadd.f32 %v7174_v30, %v7095_v56  ;;  %v8723_v55 = vpop.f32.mrb[41].mxu0 }
 0xa3f   : > { %v7180_v57 = vadd.f32 %v7179_v19, %v7178_v25 }
 0xa41   : > { %v7181_v62 = vmax.f32 %v7180_v57, 0.0 }
 0xa43   : > { %8733 = vmatmul.mubr.msk.f32.vlgmr.msra.gmra.mrb[34].mxu1 %vm628_vm8, %v7181_v62 }
 0xb16   : > { %v7256_v5 = vpop.f32.mrb[34].mxu1 }
 0xb17   : > { %v7257_v18 = vadd.f32 %v7256_v5, %v7186_v28  ;;  %v8734_v31 = vpop.f32.mrb[35].mxu1 }
 0xb19   : > { %7261 = vst.msk [vmem:[%s506_s18] sm:$0x1] %vm7260_vm12, %v7257_v18 }
 0xb1a PF: > { %s27_s20 = sadd.s32 1, %s9309_s20  }
 0xb1b   : > { %p24_p4 = scmp.ge.s32.totalorder %s27_s20, 4  }
 0xb1d   :  { %26 = sbr.rel (!%p24_p4) target bundleno = 3 (0x3), region = 155 }

</bundles_post_ra>
